<compile_context>
chip_gen: v7x
topology: tpu7x:2x2x1
jax: 0.10.0
libtpu: 0.0.40
codegen_flags: <defaults>
</compile_context>

<pallas_src>
import math
import functools

import jax
import jax.numpy as jnp
from jax.experimental import pallas as pl
from jax.experimental.pallas import tpu as pltpu


def _flash_attn_kernel(q_ref, k_ref, v_ref, o_ref, m_scr, l_scr, acc_scr, *,
                       scale, causal, block_q, block_k, kv_chunk):
    # q_ref: (1,1,1,block_q,D)   k_ref/v_ref: (1,1,1,kv_chunk,D)   o_ref: (1,1,block_q,D)
    # scratch: m/l (block_q,1) f32, acc (block_q,D) f32 (persist across kv_outer axis)
    q_idx = pl.program_id(2)
    ko = pl.program_id(3)
    n_inner = kv_chunk // block_k

    @pl.when(ko == 0)
    def _():
        m_scr[...] = jnp.full_like(m_scr, -jnp.inf)
        l_scr[...] = jnp.zeros_like(l_scr)
        acc_scr[...] = jnp.zeros_like(acc_scr)

    # Hoisted per-tile work: Q loaded & scaled once, not once per KV tile.
    q = q_ref[0, 0, 0] * scale                     # (block_q, D), input dtype

    chunk_start = ko * kv_chunk
    q_lo = q_idx * block_q

    if causal:
        # relative (col - row) iota, built once per kernel invocation
        rel = (jax.lax.broadcasted_iota(jnp.int32, (block_q, block_k), 1)
               - jax.lax.broadcasted_iota(jnp.int32, (block_q, block_k), 0))

    def tile_step(t, carry, masked):
        m_prev, l_prev, acc_prev = carry
        start = pl.multiple_of(t * block_k, block_k)
        k = k_ref[0, 0, 0, pl.ds(start, block_k), :]        # (block_k, D)
        v = v_ref[0, 0, 0, pl.ds(start, block_k), :]        # (block_k, D)
        # scores = (q*scale) @ k^T: contraction on dim 1 of both operands
        # (no transposed copy of K), f32 accumulation on the MXU.
        s = jax.lax.dot_general(q, k, (((1,), (1,)), ((), ())),
                                preferred_element_type=jnp.float32)
        if masked:
            # keep iff col_global <= row_global  <=>  (col-row) <= offset
            offset = q_lo - chunk_start - t * block_k
            s = jnp.where(rel <= offset, s, jnp.float32(-1e30))
        m_new = jnp.maximum(m_prev, jnp.max(s, axis=-1, keepdims=True))
        alpha = jnp.exp(m_prev - m_new)
        p = jnp.exp(s - m_new)
        l_new = alpha * l_prev + jnp.sum(p, axis=-1, keepdims=True)
        acc_new = alpha * acc_prev + jnp.dot(p.astype(v.dtype), v,
                                             preferred_element_type=jnp.float32)
        return m_new, l_new, acc_new

    carry = (m_scr[...], l_scr[...], acc_scr[...])
    if causal:
        q_hi = q_lo + block_q - 1
        # KV tiles fully below the diagonal (no masking needed)
        n_full = jnp.clip((q_lo - chunk_start + 1) // block_k, 0, n_inner)
        # KV tiles that contribute at all (dynamic trip count: fully-masked
        # tiles cost neither DMA -- index_map clamp -- nor compute)
        n_live = jnp.clip((q_hi - chunk_start + block_k) // block_k, 0, n_inner)
        carry = jax.lax.fori_loop(
            0, n_full, functools.partial(tile_step, masked=False), carry)
        carry = jax.lax.fori_loop(
            n_full, n_live, functools.partial(tile_step, masked=True), carry)
    else:
        carry = jax.lax.fori_loop(
            0, n_inner, functools.partial(tile_step, masked=False), carry)
    m_scr[...], l_scr[...], acc_scr[...] = carry

    @pl.when(ko == pl.num_programs(3) - 1)
    def _():
        # exact reciprocal (approx=True trades accuracy; keep strict softmax parity)
        o_ref[0, 0] = (acc_scr[...] *
                       pl.reciprocal(l_scr[...], approx=False)).astype(o_ref.dtype)


def _pick_block(seq_len, preferred):
    """Largest divisor of seq_len <= preferred that is a multiple of 8
    (TPU second-minor tiling); falls back to the full sequence."""
    if seq_len <= preferred:
        return seq_len
    for b in range(preferred, 7, -1):
        if seq_len % b == 0 and b % 8 == 0:
            return b
    # TODO(synk): pad odd/prime sequence lengths instead; a full-S block here can
    #             blow VMEM for very long sequences (notably on v7x's 64 MiB).
    return seq_len


def _pick_kv_chunk(seq_len, block_k, head_dim, itemsize,
                   budget_bytes=24 * 1024 * 1024):
    """Largest multiple of block_k dividing seq_len such that resident K+V
    (double-buffered) stays within budget_bytes (safe for v7x's 64 MiB VMEM)."""
    n_kv = seq_len // block_k
    max_tiles = max(1, budget_bytes // (4 * block_k * head_dim * itemsize))
    t = min(n_kv, max_tiles)
    while n_kv % t:
        t -= 1
    return t * block_k


def self_attention(qkv, causal=False, softmax_scale=None,
                   block_q=256, block_k=512):
    """qkv: (B, S, 3, H, D)  ->  output: (B, S, H, D)   (matches PyTorch 'bthd')."""
    B, S, three, H, D = qkv.shape
    assert three == 3
    scale = float(softmax_scale) if softmax_scale is not None else 1.0 / math.sqrt(D)

    block_q = _pick_block(S, block_q)
    block_k = _pick_block(S, block_k)
    itemsize = jnp.dtype(qkv.dtype).itemsize
    kv_chunk = _pick_kv_chunk(S, block_k, D, itemsize)
    n_q = S // block_q
    n_kvo = S // kv_chunk          # usually 1: K/V fully VMEM-resident per (b, h)

    # Single head-major transpose; q/k/v are selected out of the size-3 axis by
    # the BlockSpec index maps (no per-tensor split + transpose copies).
    qkv_t = jnp.transpose(qkv, (0, 2, 3, 1, 4))      # (B, 3, H, S, D)

    if causal:
        def kv_block(qi, ko):
            # clamp to the last contributing chunk: fully-masked chunks repeat the
            # previous block index, so no new DMA is issued for them.
            return jnp.minimum(ko, (qi * block_q + block_q - 1) // kv_chunk)
    else:
        def kv_block(qi, ko):
            return ko

    q_spec = pl.BlockSpec((1, 1, 1, block_q, D),
                          lambda b, h, qi, ko: (b, 0, h, qi, 0))
    k_spec = pl.BlockSpec((1, 1, 1, kv_chunk, D),
                          lambda b, h, qi, ko: (b, 1, h, kv_block(qi, ko), 0))
    v_spec = pl.BlockSpec((1, 1, 1, kv_chunk, D),
                          lambda b, h, qi, ko: (b, 2, h, kv_block(qi, ko), 0))
    o_spec = pl.BlockSpec((1, 1, block_q, D),
                          lambda b, h, qi, ko: (b, h, qi, 0))

    kernel = functools.partial(
        _flash_attn_kernel, scale=scale, causal=bool(causal),
        block_q=block_q, block_k=block_k, kv_chunk=kv_chunk)

    flops = 4 * B * H * S * S * D
    transcendentals = B * H * S * S
    if causal:
        flops //= 2
        transcendentals //= 2
    kv_passes = 1 if n_kvo == 1 else n_q
    cost = pl.CostEstimate(
        flops=int(flops),
        transcendentals=int(transcendentals),
        bytes_accessed=int(itemsize * B * H * S * D * (2 + 2 * kv_passes)))

    out_bhsd = pl.pallas_call(
        kernel,
        out_shape=jax.ShapeDtypeStruct((B, H, S, D), qkv.dtype),
        grid_spec=pltpu.PrefetchScalarGridSpec(
            num_scalar_prefetch=0,
            grid=(B, H, n_q, n_kvo),
            in_specs=[q_spec, k_spec, v_spec],
            out_specs=o_spec,
            scratch_shapes=[
                pltpu.VMEM((block_q, 1), jnp.float32),   # running max
                pltpu.VMEM((block_q, 1), jnp.float32),   # running denominator
                pltpu.VMEM((block_q, D), jnp.float32),   # output accumulator
            ]),
        compiler_params=pltpu.CompilerParams(
            dimension_semantics=("parallel", "parallel", "parallel", "arbitrary"),
            vmem_limit_bytes=48 * 1024 * 1024),
        cost_estimate=cost,
    )(qkv_t, qkv_t, qkv_t)

    # back to (B, S, H, D)
    return jnp.transpose(out_bhsd, (0, 2, 1, 3))


def _reference(qkv, causal=False, softmax_scale=None):
    B, S, _, H, D = qkv.shape
    scale = softmax_scale if softmax_scale is not None else 1.0 / math.sqrt(D)
    q, k, v = qkv[:, :, 0], qkv[:, :, 1], qkv[:, :, 2]
    scores = jnp.einsum('bthd,bshd->bhts', q, k * scale)
    if causal:
        mask = jnp.triu(jnp.full((S, S), -10000.0, dtype=scores.dtype), 1)
        scores = scores + mask
    attn = jax.nn.softmax(scores, axis=-1)
    return jnp.einsum('bhts,bshd->bthd', attn, v)


if __name__ == "__main__":
    B, S, H, D = 2, 256, 2, 64
    key = jax.random.PRNGKey(0)
    qkv = jax.random.normal(key, (B, S, 3, H, D), dtype=jnp.float32)

    for causal in (False, True):
        out = self_attention(qkv, causal=causal)
        jax.block_until_ready(out)
        ref = _reference(qkv, causal=causal)
        assert out.shape == (B, S, H, D)
        assert jnp.allclose(out, ref, atol=2e-3, rtol=2e-3), f"mismatch (causal={causal})"

    print("KERNEL_OK")
</pallas_src>

<mosaic_0001>
module attributes {stable_mosaic.version = 11 : i64} {
  func.func @_flash_attn_kernel(%arg0: i32, %arg1: i32, %arg2: i32, %arg3: i32, %arg4: memref<1x1x1x256x64xf32, #tpu.memory_space<vmem>>, %arg5: memref<1x1x1x256x64xf32, #tpu.memory_space<vmem>>, %arg6: memref<1x1x1x256x64xf32, #tpu.memory_space<vmem>>, %arg7: memref<1x1x256x64xf32, #tpu.memory_space<vmem>>, %arg8: memref<256x1xf32, #tpu.memory_space<vmem>>, %arg9: memref<256x1xf32, #tpu.memory_space<vmem>>, %arg10: memref<256x64xf32, #tpu.memory_space<vmem>>) attributes {dimension_semantics = [#tpu.dimension_semantics<parallel>, #tpu.dimension_semantics<parallel>, #tpu.dimension_semantics<parallel>, #tpu.dimension_semantics<arbitrary>], iteration_bounds = array<i64: 2, 2, 1, 1>, scalar_prefetch = 0 : i64, scratch_operands = 3 : i64, tpu.core_type = #tpu.core_type<tc>, window_params = [{transform_indices = @transform_0, window_bounds = array<i64: 1, 1, 1, 256, 64>}, {transform_indices = @transform_1, window_bounds = array<i64: 1, 1, 1, 256, 64>}, {transform_indices = @transform_2, window_bounds = array<i64: 1, 1, 1, 256, 64>}, {transform_indices = @transform_3, window_bounds = array<i64: 1, 1, 256, 64>}]} {
    %c0_i32 = arith.constant 0 : i32
    %0 = arith.cmpi eq, %arg3, %c0_i32 : i32
    %1 = arith.extui %0 : i1 to i32
    %c0_i32_0 = arith.constant 0 : i32
    %2 = arith.cmpi ne, %1, %c0_i32_0 : i32
    scf.if %2 {
      %cst_32 = arith.constant 0xFF800000 : f32
      %41 = vector.broadcast %cst_32 : f32 to vector<256x1xf32>
      %c0_33 = arith.constant 0 : index
      %c0_34 = arith.constant 0 : index
      %42 = vector.load %arg8[%c0_33, %c0_34] : memref<256x1xf32, #tpu.memory_space<vmem>>, vector<256x1xf32>
      tpu.vector_store %arg8[%c0_33, %c0_34], %41 {strides = array<i32>} : memref<256x1xf32, #tpu.memory_space<vmem>>, vector<256x1xf32>,
      %cst_35 = arith.constant 0.000000e+00 : f32
      %43 = vector.broadcast %cst_35 : f32 to vector<256x1xf32>
      %c0_36 = arith.constant 0 : index
      %c0_37 = arith.constant 0 : index
      %44 = vector.load %arg9[%c0_36, %c0_37] : memref<256x1xf32, #tpu.memory_space<vmem>>, vector<256x1xf32>
      tpu.vector_store %arg9[%c0_36, %c0_37], %43 {strides = array<i32>} : memref<256x1xf32, #tpu.memory_space<vmem>>, vector<256x1xf32>,
      %cst_38 = arith.constant 0.000000e+00 : f32
      %45 = vector.broadcast %cst_38 : f32 to vector<256x64xf32>
      %c0_39 = arith.constant 0 : index
      %c0_40 = arith.constant 0 : index
      %46 = vector.load %arg10[%c0_39, %c0_40] : memref<256x64xf32, #tpu.memory_space<vmem>>, vector<256x64xf32>
      tpu.vector_store %arg10[%c0_39, %c0_40], %45 {strides = array<i32>} : memref<256x64xf32, #tpu.memory_space<vmem>>, vector<256x64xf32>,
    } else {
    }
    %c0 = arith.constant 0 : index
    %c0_1 = arith.constant 0 : index
    %c0_2 = arith.constant 0 : index
    %c0_3 = arith.constant 0 : index
    %c0_4 = arith.constant 0 : index
    %3 = vector.load %arg4[%c0, %c0_1, %c0_2, %c0_3, %c0_4] : memref<1x1x1x256x64xf32, #tpu.memory_space<vmem>>, vector<1x1x1x256x64xf32>
    %4 = vector.shape_cast %3 : vector<1x1x1x256x64xf32> to vector<256x64xf32>
    %cst = arith.constant 1.250000e-01 : f32
    %5 = vector.broadcast %cst : f32 to vector<256x64xf32>
    %6 = arith.mulf %4, %5 : vector<256x64xf32>
    %c0_5 = arith.constant 0 : index
    %c0_6 = arith.constant 0 : index
    %7 = vector.load %arg8[%c0_5, %c0_6] : memref<256x1xf32, #tpu.memory_space<vmem>>, vector<256x1xf32>
    %c0_7 = arith.constant 0 : index
    %c0_8 = arith.constant 0 : index
    %8 = vector.load %arg9[%c0_7, %c0_8] : memref<256x1xf32, #tpu.memory_space<vmem>>, vector<256x1xf32>
    %c0_9 = arith.constant 0 : index
    %c0_10 = arith.constant 0 : index
    %9 = vector.load %arg10[%c0_9, %c0_10] : memref<256x64xf32, #tpu.memory_space<vmem>>, vector<256x64xf32>
    %c0_i32_11 = arith.constant 0 : i32
    %c256_i32 = arith.constant 256 : i32
    %10 = arith.muli %c0_i32_11, %c256_i32 : i32
    %11 = tpu.assume_multiple %10, 256 : i32
    %c0_12 = arith.constant 0 : index
    %c0_13 = arith.constant 0 : index
    %c0_14 = arith.constant 0 : index
    %12 = arith.index_cast %11 : i32 to index
    %c0_15 = arith.constant 0 : index
    %13 = vector.load %arg5[%c0_12, %c0_13, %c0_14, %12, %c0_15] : memref<1x1x1x256x64xf32, #tpu.memory_space<vmem>>, vector<1x1x1x256x64xf32>
    %14 = vector.shape_cast %13 : vector<1x1x1x256x64xf32> to vector<256x64xf32>
    %c0_16 = arith.constant 0 : index
    %c0_17 = arith.constant 0 : index
    %c0_18 = arith.constant 0 : index
    %15 = arith.index_cast %11 : i32 to index
    %c0_19 = arith.constant 0 : index
    %16 = vector.load %arg6[%c0_16, %c0_17, %c0_18, %15, %c0_19] : memref<1x1x1x256x64xf32, #tpu.memory_space<vmem>>, vector<1x1x1x256x64xf32>
    %17 = vector.shape_cast %16 : vector<1x1x1x256x64xf32> to vector<256x64xf32>
    %cst_20 = arith.constant dense<0.000000e+00> : vector<256x256xf32>
    %18 = tpu.matmul %6, %14, %cst_20 {dimension_numbers = #tpu.dot_dimension_numbers<[1], [1], [0], [0], [0, 0, 1, 0], [], []>} : vector<256x64xf32>, vector<256x64xf32>, vector<256x256xf32> -> vector<256x256xf32>
    %cst_21 = arith.constant dense<0xFF800000> : vector<256xf32>
    %19 = vector.multi_reduction <maximumf>, %18, %cst_21 [1] : vector<256x256xf32> to vector<256xf32>
    %20 = vector.shape_cast %19 : vector<256xf32> to vector<256x1xf32>
    %21 = arith.maximumf %7, %20 : vector<256x1xf32>
    %22 = arith.subf %7, %21 : vector<256x1xf32>
    %23 = math.exp %22 : vector<256x1xf32>
    %24 = vector.broadcast %21 : vector<256x1xf32> to vector<256x256xf32>
    %25 = arith.subf %18, %24 : vector<256x256xf32>
    %26 = math.exp %25 : vector<256x256xf32>
    %27 = arith.mulf %23, %8 : vector<256x1xf32>
    %cst_22 = arith.constant dense<0.000000e+00> : vector<256xf32>
    %28 = vector.multi_reduction <add>, %26, %cst_22 [1] : vector<256x256xf32> to vector<256xf32>
    %29 = vector.shape_cast %28 : vector<256xf32> to vector<256x1xf32>
    %30 = arith.addf %27, %29 : vector<256x1xf32>
    %31 = vector.broadcast %23 : vector<256x1xf32> to vector<256x64xf32>
    %32 = arith.mulf %31, %9 : vector<256x64xf32>
    %cst_23 = arith.constant dense<0.000000e+00> : vector<256x64xf32>
    %33 = tpu.matmul %26, %17, %cst_23 {dimension_numbers = #tpu.dot_dimension_numbers<[1], [0], [0], [1], [0, 0, 1, 1], [], []>} : vector<256x256xf32>, vector<256x64xf32>, vector<256x64xf32> -> vector<256x64xf32>
    %34 = arith.addf %32, %33 : vector<256x64xf32>
    %c1_i32 = arith.constant 1 : i32
    %c0_24 = arith.constant 0 : index
    %c0_25 = arith.constant 0 : index
    %35 = vector.load %arg8[%c0_24, %c0_25] : memref<256x1xf32, #tpu.memory_space<vmem>>, vector<256x1xf32>
    tpu.vector_store %arg8[%c0_24, %c0_25], %21 {strides = array<i32>} : memref<256x1xf32, #tpu.memory_space<vmem>>, vector<256x1xf32>,
    %c0_26 = arith.constant 0 : index
    %c0_27 = arith.constant 0 : index
    %36 = vector.load %arg9[%c0_26, %c0_27] : memref<256x1xf32, #tpu.memory_space<vmem>>, vector<256x1xf32>
    tpu.vector_store %arg9[%c0_26, %c0_27], %30 {strides = array<i32>} : memref<256x1xf32, #tpu.memory_space<vmem>>, vector<256x1xf32>,
    %c0_28 = arith.constant 0 : index
    %c0_29 = arith.constant 0 : index
    %37 = vector.load %arg10[%c0_28, %c0_29] : memref<256x64xf32, #tpu.memory_space<vmem>>, vector<256x64xf32>
    tpu.vector_store %arg10[%c0_28, %c0_29], %34 {strides = array<i32>} : memref<256x64xf32, #tpu.memory_space<vmem>>, vector<256x64xf32>,
    %c0_i32_30 = arith.constant 0 : i32
    %38 = arith.cmpi eq, %arg3, %c0_i32_30 : i32
    %39 = arith.extui %38 : i1 to i32
    %c0_i32_31 = arith.constant 0 : i32
    %40 = arith.cmpi ne, %39, %c0_i32_31 : i32
    scf.if %40 {
      %c0_32 = arith.constant 0 : index
      %c0_33 = arith.constant 0 : index
      %41 = vector.load %arg10[%c0_32, %c0_33] : memref<256x64xf32, #tpu.memory_space<vmem>>, vector<256x64xf32>
      %c0_34 = arith.constant 0 : index
      %c0_35 = arith.constant 0 : index
      %42 = vector.load %arg9[%c0_34, %c0_35] : memref<256x1xf32, #tpu.memory_space<vmem>>, vector<256x1xf32>
      %43 = tpu.reciprocal %42 : vector<256x1xf32> -> vector<256x1xf32>
      %44 = vector.broadcast %43 : vector<256x1xf32> to vector<256x64xf32>
      %45 = arith.mulf %41, %44 : vector<256x64xf32>
      %c0_36 = arith.constant 0 : index
      %c0_37 = arith.constant 0 : index
      %c0_38 = arith.constant 0 : index
      %c0_39 = arith.constant 0 : index
      %46 = vector.load %arg7[%c0_36, %c0_37, %c0_38, %c0_39] : memref<1x1x256x64xf32, #tpu.memory_space<vmem>>, vector<1x1x256x64xf32>
      %47 = vector.shape_cast %46 : vector<1x1x256x64xf32> to vector<256x64xf32>
      %48 = vector.shape_cast %45 : vector<256x64xf32> to vector<1x1x256x64xf32>
      tpu.vector_store %arg7[%c0_36, %c0_37, %c0_38, %c0_39], %48 {strides = array<i32>} : memref<1x1x256x64xf32, #tpu.memory_space<vmem>>, vector<1x1x256x64xf32>,
    } else {
    }
    return
  }
  func.func @transform_0(%arg0: i32, %arg1: i32, %arg2: i32, %arg3: i32) -> (i32, i32, i32, i32, i32) {
    %c0_i32 = arith.constant 0 : i32
    %c0_i32_0 = arith.constant 0 : i32
    %c0_i32_1 = arith.constant 0 : i32
    return %arg0, %c0_i32, %arg1, %arg2, %c0_i32_0 : i32, i32, i32, i32, i32
  }
  func.func @transform_1(%arg0: i32, %arg1: i32, %arg2: i32, %arg3: i32) -> (i32, i32, i32, i32, i32) {
    %c1_i32 = arith.constant 1 : i32
    %c0_i32 = arith.constant 0 : i32
    %c0_i32_0 = arith.constant 0 : i32
    return %arg0, %c1_i32, %arg1, %arg3, %c0_i32 : i32, i32, i32, i32, i32
  }
  func.func @transform_2(%arg0: i32, %arg1: i32, %arg2: i32, %arg3: i32) -> (i32, i32, i32, i32, i32) {
    %c2_i32 = arith.constant 2 : i32
    %c0_i32 = arith.constant 0 : i32
    %c0_i32_0 = arith.constant 0 : i32
    return %arg0, %c2_i32, %arg1, %arg3, %c0_i32 : i32, i32, i32, i32, i32
  }
  func.func @transform_3(%arg0: i32, %arg1: i32, %arg2: i32, %arg3: i32) -> (i32, i32, i32, i32) {
    %c0_i32 = arith.constant 0 : i32
    %c0_i32_0 = arith.constant 0 : i32
    return %arg0, %arg1, %arg2, %c0_i32 : i32, i32, i32, i32
  }
}

</mosaic_0001>

<bundles_post_ra>
// kernel: tpu_custom_call.1
= control target key start
LH: loop header
LB: loop body
LE: loop exit
PB: predicated region body
PF: predicated region fallthrough
CT: control target
= control target key end

     0   :  { %s3610_s12 = smov 0   ;;  %s3612_s13 = smov 0   ;;  %s5134_s0 = inlined_call_operand.vmem [shape: f32[2,3,2,256,64], index: 0, kind: input, shape index: {}]   ;;  %s5135_s1 = inlined_call_operand.vmem [shape: f32[2,3,2,256,64], index: 1, kind: input, shape index: {}]   ;;  %s5136_s2 = inlined_call_operand.vmem [shape: f32[2,3,2,256,64], index: 2, kind: input, shape index: {}]   ;;  %s5137_s3 = inlined_call_operand.vmem [shape: f32[2,2,256,64], index: 3, kind: output, shape index: {}]  }
   0x1   :  { %s3614_s14 = smov 0   ;;  %s3616_s15 = smov 0  }
   0x2   :  { %s3618_s16 = smov 0  }
   0x3 LB: > { %s35_s17 = sadd.s32 1, %s3576_s14  ;;  %s39_s18 = sadd.s32 1, %s3580_s15  ;;  %s3584_s16 = sphi %s3618_s16, %s13_s16   ;;  %s3580_s15 = sphi %s3616_s15, %s5400_s15   ;;  %s3576_s14 = sphi %s3614_s14, %s5399_s14   ;;  %s3572_s13 = sphi %s3612_s13, %s5398_s13   ;;  %s3568_s12 = sphi %s3610_s12, %s5397_s12  }
   0x4   : > { %p37_p0 = scmp.ge.s32.totalorder %s35_s17, 2  ;;  %p2911_p1 = scmp.ge.s32.totalorder %s3584_s16, 1 }
   0x5   : > { %p228_p2 = scmp.lt.s32.totalorder %s3584_s16, 5 }
   0x6   : > { %s5402_s17 = smov (%p37_p0, %s35_s17), 0  ;;  %s5404_s18 = smov (!%p37_p0, %s39_s18), %s3580_s15 }
   0x7   : > { %p229_p3 = pnand %p2911_p1, %p228_p2  ;;  %p41_p4 = scmp.ge.s32.totalorder %s5404_s18, 2 }
   0x9   : > { %s5406_s18 = smov (%p41_p4, %s5404_s18), 0  ;;  %232 = sbr.rel (%p229_p3) target bundleno = 1025 (0x401), region = 32 }
  0x10   : > { %p297_p5 = scmp.lt.s32.totalorder %s3572_s13, 1  ;;  %p299_p6 = scmp.lt.s32.totalorder %s3568_s12, 1  ;;  %vm423_vm0 = vcmask 523264   ;;  %vm358_vm2 = vcmask 7168  }
  0x11   : > { %vm3658_vm1 = vmpackc.low %vm423_vm0, %vm423_vm0 }
  0x12   : > { %s5408_s13 = smov (!%p297_p5, %s3572_s13), 1  ;;  %s5410_s12 = smov (!%p299_p6, %s3568_s12), 1 }
  0x13   : > { %s3243_s19 = smul.u32 192, %s5408_s13  ;;  %s2912_s20 = sshll.u32 %s5410_s12, 5 }
  0x14   : > { %s2919_s5 = sshll.u32 %s5408_s13, 6 }
  0x15   : > { %s306_s21 = sadd.s32 %s3243_s19, %s2912_s20  ;;  %s350_s6 = sadd.s32 %s2919_s5, %s2912_s20 }
  0x16   : > { %s3648_s22 = sshll.u32 %s306_s21, 3  ;;  %s2920_s7 = sshll.u32 %s350_s6, 3 }
  0x17   : > { %s3654_s25 = scalar_lea.vmem %s5135_s1, %s3648_s22  ;;  %s3682_s28 = scalar_lea.vmem %s5134_s0, %s3648_s22 }
  0x18   : > { %v2937_v1 = vld [vmem:[%s3654_s25 + $0x280] sm:$0xff]  ;;  %v2938_v2 = vld [vmem:[%s3654_s25 + $0x288] sm:$0xff]  ;;  %v2939_v6 = vld [vmem:[%s3654_s25 + $0x290] sm:$0xff]  ;;  %s4140_s4 = scalar_lea.vmem %s5136_s2, %s3648_s22  ;;  %s5053_s10 = scalar_lea.vmem %s5137_s3, %s2920_s7 }
  0x19   : > { %v2921_v3 = vld [vmem:[%s3654_s25 + $0x200] sm:$0xff]  ;;  %v3147_v4 = vpack.c.bf16 %v2938_v2, %v2937_v1  ;;  %v2922_v5 = vld [vmem:[%s3654_s25 + $0x208] sm:$0xff]  ;;  %v2940_v7 = vld [vmem:[%s3654_s25 + $0x298] sm:$0xff] }
  0x1a   : > { %v3150_v8 = vpack.c.bf16 %v2922_v5, %v2921_v3  ;;  %v3153_v9 = vpack.c.bf16 %v2940_v7, %v2939_v6  ;;  %v2923_v10 = vld [vmem:[%s3654_s25 + $0x210] sm:$0xff]  ;;  %v2924_v11 = vld [vmem:[%s3654_s25 + $0x218] sm:$0xff]  ;;  %v2941_v12 = vld [vmem:[%s3654_s25 + $0x2a0] sm:$0xff] }
  0x1b   : > { %3149 = vmatprep.subr.msk.bf16.mxu0 %vm3658_vm1, %v3147_v4  ;;  %v2942_v13 = vld [vmem:[%s3654_s25 + $0x2a8] sm:$0xff]  ;;  %v3156_v14 = vpack.c.bf16 %v2924_v11, %v2923_v10  ;;  %v456_v16 = vld [vmem:[%s3682_s28] sm:$0xff]  ;;  %v2943_v20 = vld [vmem:[%s3654_s25 + $0x2b0] sm:$0xff] }
  0x1c   : > { %3152 = vmatpush3.bf16.xpose.msk.msra.mxu0 %vm3658_vm1, %v3150_v8  ;;  %v3159_v15 = vpack.c.bf16 %v2942_v13, %v2941_v12  ;;  %v488_v17 = vmul.f32 0.125, %v456_v16  ;;  %v2925_v18 = vld [vmem:[%s3654_s25 + $0x220] sm:$0xff]  ;;  %v2926_v19 = vld [vmem:[%s3654_s25 + $0x228] sm:$0xff]  ;;  %v2944_v21 = vld [vmem:[%s3654_s25 + $0x2b8] sm:$0xff] }
  0x1d   : > { %3155 = vmatprep.subr.msk.bf16.mxu0 %vm3658_vm1, %v3153_v9  ;;  %v3162_v22 = vpack.c.bf16 %v2926_v19, %v2925_v18  ;;  %v3165_v23 = vpack.c.bf16 %v2944_v21, %v2943_v20  ;;  %v2927_v24 = vld [vmem:[%s3654_s25 + $0x230] sm:$0xff]  ;;  %v2928_v25 = vld [vmem:[%s3654_s25 + $0x238] sm:$0xff]  ;;  %v2945_v26 = vld [vmem:[%s3654_s25 + $0x2c0] sm:$0xff] }
  0x1e   : > { %3083 = vmatprep.mubr.msk.f32.mxu0 %vm423_vm0, %v488_v17  ;;  %v2946_v27 = vld [vmem:[%s3654_s25 + $0x2c8] sm:$0xff]  ;;  %v3168_v28 = vpack.c.bf16 %v2928_v25, %v2927_v24  ;;  %v2929_v30 = vld [vmem:[%s3654_s25 + $0x240] sm:$0xff]  ;;  %v2947_v32 = vld [vmem:[%s3654_s25 + $0x2d0] sm:$0xff] }
  0x1f   : > { %v3171_v29 = vpack.c.bf16 %v2946_v27, %v2945_v26  ;;  %v2930_v31 = vld [vmem:[%s3654_s25 + $0x248] sm:$0xff]  ;;  %v2948_v33 = vld [vmem:[%s3654_s25 + $0x2d8] sm:$0xff]  ;;  %v2931_v36 = vld [vmem:[%s3654_s25 + $0x250] sm:$0xff] }
  0x20   : > { %v3174_v34 = vpack.c.bf16 %v2930_v31, %v2929_v30  ;;  %v3177_v35 = vpack.c.bf16 %v2948_v33, %v2947_v32  ;;  %v2932_v37 = vld [vmem:[%s3654_s25 + $0x258] sm:$0xff]  ;;  %v2949_v38 = vld [vmem:[%s3654_s25 + $0x2e0] sm:$0xff]  ;;  %v2950_v39 = vld [vmem:[%s3654_s25 + $0x2e8] sm:$0xff] }
  0x21   : > { %v3180_v40 = vpack.c.bf16 %v2932_v37, %v2931_v36  ;;  %v3183_v41 = vpack.c.bf16 %v2950_v39, %v2949_v38  ;;  %v2933_v42 = vld [vmem:[%s3654_s25 + $0x260] sm:$0xff]  ;;  %v2934_v43 = vld [vmem:[%s3654_s25 + $0x268] sm:$0xff]  ;;  %v2951_v44 = vld [vmem:[%s3654_s25 + $0x2f0] sm:$0xff] }
  0x22   : > { %v2952_v45 = vld [vmem:[%s3654_s25 + $0x2f8] sm:$0xff]  ;;  %v3186_v46 = vpack.c.bf16 %v2934_v43, %v2933_v42  ;;  %v2935_v48 = vld [vmem:[%s3654_s25 + $0x270] sm:$0xff]  ;;  %v457_v51 = vld [vmem:[%s3682_s28 + $0x8] sm:$0xff] }
  0x23   : > { %v3189_v47 = vpack.c.bf16 %v2952_v45, %v2951_v44  ;;  %v2936_v49 = vld [vmem:[%s3654_s25 + $0x278] sm:$0xff]  ;;  %v489_v52 = vmul.f32 0.125, %v457_v51  ;;  %v458_v53 = vld [vmem:[%s3682_s28 + $0x10] sm:$0xff]  ;;  %v460_v57 = vld [vmem:[%s3682_s28 + $0x20] sm:$0xff]  ;;  %v3586_v51 = vmov -inf  }
  0x24   : > { %3158 = vmatpush3.bf16.xpose.msk.msra.mxu0 %vm3658_vm1, %v3156_v14  ;;  %v3192_v50 = vpack.c.bf16 %v2936_v49, %v2935_v48  ;;  %v490_v54 = vmul.f32 0.125, %v458_v53  ;;  %v459_v55 = vld [vmem:[%s3682_s28 + $0x18] sm:$0xff]  ;;  %v492_v58 = vmul.f32 0.125, %v460_v57  ;;  %v461_v59 = vld [vmem:[%s3682_s28 + $0x28] sm:$0xff]  ;;  %v462_v61 = vld [vmem:[%s3682_s28 + $0x30] sm:$0xff]  ;;  %359 = vst.msk [vmem:[#allocation2] sm:$0xff] %vm358_vm2, %v3586_v51 }
  0x25   : > { %3161 = vmatprep.subr.msk.bf16.mxu0 %vm3658_vm1, %v3159_v15  ;;  %v491_v56 = vmul.f32 0.125, %v459_v55  ;;  %v493_v60 = vmul.f32 0.125, %v461_v59  ;;  %v494_v62 = vmul.f32 0.125, %v462_v61  ;;  %v463_v63 = vld [vmem:[%s3682_s28 + $0x38] sm:$0xff]  ;;  %v464_v1 = vld [vmem:[%s3682_s28 + $0x40] sm:$0xff]  ;;  %v465_v3 = vld [vmem:[%s3682_s28 + $0x48] sm:$0xff] }
  0x26   : > { %v495_v0 = vmul.f32 0.125, %v463_v63  ;;  %v496_v2 = vmul.f32 0.125, %v464_v1  ;;  %v497_v4 = vmul.f32 0.125, %v465_v3  ;;  %v466_v5 = vld [vmem:[%s3682_s28 + $0x50] sm:$0xff]  ;;  %v467_v7 = vld [vmem:[%s3682_s28 + $0x58] sm:$0xff]  ;;  %v468_v9 = vld [vmem:[%s3682_s28 + $0x60] sm:$0xff] }
  0x27   : > { %v498_v6 = vmul.f32 0.125, %v466_v5  ;;  %v499_v8 = vmul.f32 0.125, %v467_v7  ;;  %v500_v10 = vmul.f32 0.125, %v468_v9  ;;  %v469_v11 = vld [vmem:[%s3682_s28 + $0x68] sm:$0xff]  ;;  %v470_v13 = vld [vmem:[%s3682_s28 + $0x70] sm:$0xff]  ;;  %v471_v15 = vld [vmem:[%s3682_s28 + $0x78] sm:$0xff] }
  0x28   : > { %v501_v12 = vmul.f32 0.125, %v469_v11  ;;  %v502_v14 = vmul.f32 0.125, %v470_v13  ;;  %v503_v16 = vmul.f32 0.125, %v471_v15  ;;  %v473_v19 = vld [vmem:[%s3682_s28 + $0x88] sm:$0xff]  ;;  %v474_v21 = vld [vmem:[%s3682_s28 + $0x90] sm:$0xff]  ;;  %v476_v25 = vld [vmem:[%s3682_s28 + $0xa0] sm:$0xff] }
  0x29   : > { %v505_v20 = vmul.f32 0.125, %v473_v19  ;;  %v508_v26 = vmul.f32 0.125, %v476_v25  ;;  %v477_v27 = vld [vmem:[%s3682_s28 + $0xa8] sm:$0xff]  ;;  %v479_v31 = vld [vmem:[%s3682_s28 + $0xb8] sm:$0xff]  ;;  %v480_v33 = vld [vmem:[%s3682_s28 + $0xc0] sm:$0xff]  ;;  %360 = vst.msk [vmem:[#allocation2 + $0x8] sm:$0xff] %vm358_vm2, %v3586_v51 }
  0x2a   : > { %v511_v32 = vmul.f32 0.125, %v479_v31  ;;  %v482_v37 = vld [vmem:[%s3682_s28 + $0xd0] sm:$0xff]  ;;  %v483_v39 = vld [vmem:[%s3682_s28 + $0xd8] sm:$0xff]  ;;  %v485_v43 = vld [vmem:[%s3682_s28 + $0xe8] sm:$0xff]  ;;  %361 = vst.msk [vmem:[#allocation2 + $0x10] sm:$0xff] %vm358_vm2, %v3586_v51  ;;  %v3587_v1 = vmov 0  }
  0x2b   : > { %v514_v38 = vmul.f32 0.125, %v482_v37  ;;  %v517_v44 = vmul.f32 0.125, %v485_v43  ;;  %v486_v45 = vld [vmem:[%s3682_s28 + $0xf0] sm:$0xff]  ;;  %362 = vst.msk [vmem:[#allocation2 + $0x18] sm:$0xff] %vm358_vm2, %v3586_v51  ;;  %363 = vst.msk [vmem:[#allocation2 + $0x20] sm:$0xff] %vm358_vm2, %v3586_v51  ;;  %3288 = vset.pattern.permute.xlu0 %v3587_v1  ;;  %3289 = vset.pattern.permute.xlu1 %v3587_v1  ;;  %v3588_v9 = vmov 0.0  }
  0x2c   : > { %3164 = vmatpush3.bf16.xpose.msk.msra.mxu0 %vm3658_vm1, %v3162_v22  ;;  %v506_v22 = vmul.f32 0.125, %v474_v21  ;;  %364 = vst.msk [vmem:[#allocation2 + $0x28] sm:$0xff] %vm358_vm2, %v3586_v51  ;;  %365 = vst.msk [vmem:[#allocation2 + $0x30] sm:$0xff] %vm358_vm2, %v3586_v51 }
  0x2d   : > { %3167 = vmatprep.subr.msk.bf16.mxu0 %vm3658_vm1, %v3165_v23  ;;  %v475_v23 = vld [vmem:[%s3682_s28 + $0x98] sm:$0xff]  ;;  %366 = vst.msk [vmem:[#allocation2 + $0x38] sm:$0xff] %vm358_vm2, %v3586_v51  ;;  %367 = vst.msk [vmem:[#allocation2 + $0x40] sm:$0xff] %vm358_vm2, %v3586_v51 }
  0x2e   : > { %v507_v24 = vmul.f32 0.125, %v475_v23  ;;  %368 = vst.msk [vmem:[#allocation2 + $0x48] sm:$0xff] %vm358_vm2, %v3586_v51  ;;  %369 = vst.msk [vmem:[#allocation2 + $0x50] sm:$0xff] %vm358_vm2, %v3586_v51 }
  0x2f   : > { %370 = vst.msk [vmem:[#allocation2 + $0x58] sm:$0xff] %vm358_vm2, %v3586_v51  ;;  %371 = vst.msk [vmem:[#allocation2 + $0x60] sm:$0xff] %vm358_vm2, %v3586_v51 }
  0x30   : > { %372 = vst.msk [vmem:[#allocation2 + $0x68] sm:$0xff] %vm358_vm2, %v3586_v51  ;;  %373 = vst.msk [vmem:[#allocation2 + $0x70] sm:$0xff] %vm358_vm2, %v3586_v51 }
  0x31   : > { %374 = vst.msk [vmem:[#allocation2 + $0x78] sm:$0xff] %vm358_vm2, %v3586_v51  ;;  %375 = vst.msk [vmem:[#allocation2 + $0x80] sm:$0xff] %vm358_vm2, %v3586_v51 }
  0x32   : > { %376 = vst.msk [vmem:[#allocation2 + $0x88] sm:$0xff] %vm358_vm2, %v3586_v51  ;;  %377 = vst.msk [vmem:[#allocation2 + $0x90] sm:$0xff] %vm358_vm2, %v3586_v51 }
  0x33   : > { %378 = vst.msk [vmem:[#allocation2 + $0x98] sm:$0xff] %vm358_vm2, %v3586_v51  ;;  %379 = vst.msk [vmem:[#allocation2 + $0xa0] sm:$0xff] %vm358_vm2, %v3586_v51 }
  0x34   : > { %3170 = vmatpush3.bf16.xpose.msk.msra.mxu0 %vm3658_vm1, %v3168_v28  ;;  %v509_v28 = vmul.f32 0.125, %v477_v27  ;;  %380 = vst.msk [vmem:[#allocation2 + $0xa8] sm:$0xff] %vm358_vm2, %v3586_v51  ;;  %381 = vst.msk [vmem:[#allocation2 + $0xb0] sm:$0xff] %vm358_vm2, %v3586_v51 }
  0x35   : > { %3173 = vmatprep.subr.msk.bf16.mxu0 %vm3658_vm1, %v3171_v29  ;;  %v478_v29 = vld [vmem:[%s3682_s28 + $0xb0] sm:$0xff]  ;;  %382 = vst.msk [vmem:[#allocation2 + $0xb8] sm:$0xff] %vm358_vm2, %v3586_v51  ;;  %383 = vst.msk [vmem:[#allocation2 + $0xc0] sm:$0xff] %vm358_vm2, %v3586_v51 }
  0x36   : > { %v510_v30 = vmul.f32 0.125, %v478_v29  ;;  %384 = vst.msk [vmem:[#allocation2 + $0xc8] sm:$0xff] %vm358_vm2, %v3586_v51  ;;  %385 = vst.msk [vmem:[#allocation2 + $0xd0] sm:$0xff] %vm358_vm2, %v3586_v51 }
  0x37   : > { %386 = vst.msk [vmem:[#allocation2 + $0xd8] sm:$0xff] %vm358_vm2, %v3586_v51  ;;  %387 = vst.msk [vmem:[#allocation2 + $0xe0] sm:$0xff] %vm358_vm2, %v3586_v51 }
  0x38   : > { %388 = vst.msk [vmem:[#allocation2 + $0xe8] sm:$0xff] %vm358_vm2, %v3586_v51  ;;  %389 = vst.msk [vmem:[#allocation2 + $0xf0] sm:$0xff] %vm358_vm2, %v3586_v51 }
  0x39   : > { %390 = vst.msk [vmem:[#allocation2 + $0xf8] sm:$0xff] %vm358_vm2, %v3586_v51  ;;  %391 = vst.msk [vmem:[#allocation3] sm:$0xff] %vm358_vm2, %v3588_v9 }
  0x3a   : > { %425 = vst.msk [vmem:[#allocation4 + $0x8] sm:$0xff] %vm423_vm0, %v3588_v9  ;;  %424 = vst.msk [vmem:[#allocation4] sm:$0xff] %vm423_vm0, %v3588_v9 }
  0x3b   : > { %392 = vst.msk [vmem:[#allocation3 + $0x8] sm:$0xff] %vm358_vm2, %v3588_v9  ;;  %393 = vst.msk [vmem:[#allocation3 + $0x10] sm:$0xff] %vm358_vm2, %v3588_v9 }
  0x3c   : > { %3176 = vmatpush3.bf16.xpose.msk.msra.mxu0 %vm3658_vm1, %v3174_v34  ;;  %v512_v34 = vmul.f32 0.125, %v480_v33  ;;  %394 = vst.msk [vmem:[#allocation3 + $0x18] sm:$0xff] %vm358_vm2, %v3588_v9  ;;  %395 = vst.msk [vmem:[#allocation3 + $0x20] sm:$0xff] %vm358_vm2, %v3588_v9 }
  0x3d   : > { %3179 = vmatprep.subr.msk.bf16.mxu0 %vm3658_vm1, %v3177_v35  ;;  %v481_v35 = vld [vmem:[%s3682_s28 + $0xc8] sm:$0xff]  ;;  %396 = vst.msk [vmem:[#allocation3 + $0x28] sm:$0xff] %vm358_vm2, %v3588_v9  ;;  %397 = vst.msk [vmem:[#allocation3 + $0x30] sm:$0xff] %vm358_vm2, %v3588_v9 }
  0x3e   : > { %v513_v36 = vmul.f32 0.125, %v481_v35  ;;  %398 = vst.msk [vmem:[#allocation3 + $0x38] sm:$0xff] %vm358_vm2, %v3588_v9  ;;  %399 = vst.msk [vmem:[#allocation3 + $0x40] sm:$0xff] %vm358_vm2, %v3588_v9 }
  0x3f   : > { %400 = vst.msk [vmem:[#allocation3 + $0x48] sm:$0xff] %vm358_vm2, %v3588_v9  ;;  %401 = vst.msk [vmem:[#allocation3 + $0x50] sm:$0xff] %vm358_vm2, %v3588_v9 }
  0x40   : > { %402 = vst.msk [vmem:[#allocation3 + $0x58] sm:$0xff] %vm358_vm2, %v3588_v9  ;;  %403 = vst.msk [vmem:[#allocation3 + $0x60] sm:$0xff] %vm358_vm2, %v3588_v9 }
  0x41   : > { %404 = vst.msk [vmem:[#allocation3 + $0x68] sm:$0xff] %vm358_vm2, %v3588_v9  ;;  %405 = vst.msk [vmem:[#allocation3 + $0x70] sm:$0xff] %vm358_vm2, %v3588_v9 }
  0x42   : > { %406 = vst.msk [vmem:[#allocation3 + $0x78] sm:$0xff] %vm358_vm2, %v3588_v9  ;;  %407 = vst.msk [vmem:[#allocation3 + $0x80] sm:$0xff] %vm358_vm2, %v3588_v9 }
  0x43   : > { %408 = vst.msk [vmem:[#allocation3 + $0x88] sm:$0xff] %vm358_vm2, %v3588_v9  ;;  %409 = vst.msk [vmem:[#allocation3 + $0x90] sm:$0xff] %vm358_vm2, %v3588_v9 }
  0x44   : > { %3182 = vmatpush3.bf16.xpose.msk.msra.mxu0 %vm3658_vm1, %v3180_v40  ;;  %v515_v40 = vmul.f32 0.125, %v483_v39  ;;  %410 = vst.msk [vmem:[#allocation3 + $0x98] sm:$0xff] %vm358_vm2, %v3588_v9  ;;  %411 = vst.msk [vmem:[#allocation3 + $0xa0] sm:$0xff] %vm358_vm2, %v3588_v9 }
  0x45   : > { %3185 = vmatprep.subr.msk.bf16.mxu0 %vm3658_vm1, %v3183_v41  ;;  %v484_v41 = vld [vmem:[%s3682_s28 + $0xe0] sm:$0xff]  ;;  %412 = vst.msk [vmem:[#allocation3 + $0xa8] sm:$0xff] %vm358_vm2, %v3588_v9  ;;  %413 = vst.msk [vmem:[#allocation3 + $0xb0] sm:$0xff] %vm358_vm2, %v3588_v9 }
  0x46   : > { %v516_v42 = vmul.f32 0.125, %v484_v41  ;;  %414 = vst.msk [vmem:[#allocation3 + $0xb8] sm:$0xff] %vm358_vm2, %v3588_v9  ;;  %415 = vst.msk [vmem:[#allocation3 + $0xc0] sm:$0xff] %vm358_vm2, %v3588_v9 }
  0x47   : > { %416 = vst.msk [vmem:[#allocation3 + $0xc8] sm:$0xff] %vm358_vm2, %v3588_v9  ;;  %417 = vst.msk [vmem:[#allocation3 + $0xd0] sm:$0xff] %vm358_vm2, %v3588_v9 }
  0x48   : > { %418 = vst.msk [vmem:[#allocation3 + $0xd8] sm:$0xff] %vm358_vm2, %v3588_v9  ;;  %419 = vst.msk [vmem:[#allocation3 + $0xe0] sm:$0xff] %vm358_vm2, %v3588_v9 }
  0x49   : > { %420 = vst.msk [vmem:[#allocation3 + $0xe8] sm:$0xff] %vm358_vm2, %v3588_v9  ;;  %421 = vst.msk [vmem:[#allocation3 + $0xf0] sm:$0xff] %vm358_vm2, %v3588_v9 }
  0x4a   : > { %422 = vst.msk [vmem:[#allocation3 + $0xf8] sm:$0xff] %vm358_vm2, %v3588_v9 }
  0x4b   : > { %426 = vst.msk [vmem:[#allocation4 + $0x10] sm:$0xff] %vm423_vm0, %v3588_v9  ;;  %427 = vst.msk [vmem:[#allocation4 + $0x18] sm:$0xff] %vm423_vm0, %v3588_v9 }
  0x4c   : > { %3188 = vmatpush3.bf16.xpose.msk.msra.mxu0 %vm3658_vm1, %v3186_v46  ;;  %v518_v46 = vmul.f32 0.125, %v486_v45  ;;  %428 = vst.msk [vmem:[#allocation4 + $0x20] sm:$0xff] %vm423_vm0, %v3588_v9  ;;  %429 = vst.msk [vmem:[#allocation4 + $0x28] sm:$0xff] %vm423_vm0, %v3588_v9 }
  0x4d   : > { %3191 = vmatprep.subr.msk.bf16.mxu0 %vm3658_vm1, %v3189_v47  ;;  %v487_v47 = vld [vmem:[%s3682_s28 + $0xf8] sm:$0xff]  ;;  %430 = vst.msk [vmem:[#allocation4 + $0x30] sm:$0xff] %vm423_vm0, %v3588_v9  ;;  %431 = vst.msk [vmem:[#allocation4 + $0x38] sm:$0xff] %vm423_vm0, %v3588_v9 }
  0x4e   : > { %v519_v48 = vmul.f32 0.125, %v487_v47  ;;  %432 = vst.msk [vmem:[#allocation4 + $0x40] sm:$0xff] %vm423_vm0, %v3588_v9  ;;  %433 = vst.msk [vmem:[#allocation4 + $0x48] sm:$0xff] %vm423_vm0, %v3588_v9 }
  0x4f   : > { %434 = vst.msk [vmem:[#allocation4 + $0x50] sm:$0xff] %vm423_vm0, %v3588_v9  ;;  %435 = vst.msk [vmem:[#allocation4 + $0x58] sm:$0xff] %vm423_vm0, %v3588_v9 }
  0x50   : > { %436 = vst.msk [vmem:[#allocation4 + $0x60] sm:$0xff] %vm423_vm0, %v3588_v9  ;;  %437 = vst.msk [vmem:[#allocation4 + $0x68] sm:$0xff] %vm423_vm0, %v3588_v9 }
  0x51   : > { %438 = vst.msk [vmem:[#allocation4 + $0x70] sm:$0xff] %vm423_vm0, %v3588_v9  ;;  %439 = vst.msk [vmem:[#allocation4 + $0x78] sm:$0xff] %vm423_vm0, %v3588_v9 }
  0x52   : > { %440 = vst.msk [vmem:[#allocation4 + $0x80] sm:$0xff] %vm423_vm0, %v3588_v9  ;;  %441 = vst.msk [vmem:[#allocation4 + $0x88] sm:$0xff] %vm423_vm0, %v3588_v9 }
  0x53   : > { %442 = vst.msk [vmem:[#allocation4 + $0x90] sm:$0xff] %vm423_vm0, %v3588_v9  ;;  %443 = vst.msk [vmem:[#allocation4 + $0x98] sm:$0xff] %vm423_vm0, %v3588_v9 }
  0x54   : > { %3194 = vmatpush3.bf16.xpose.msk.msra.mxu0 %vm3658_vm1, %v3192_v50  ;;  %444 = vst.msk [vmem:[#allocation4 + $0xa0] sm:$0xff] %vm423_vm0, %v3588_v9  ;;  %445 = vst.msk [vmem:[#allocation4 + $0xa8] sm:$0xff] %vm423_vm0, %v3588_v9 }
  0x55   : > { %446 = vst.msk [vmem:[#allocation4 + $0xb0] sm:$0xff] %vm423_vm0, %v3588_v9  ;;  %447 = vst.msk [vmem:[#allocation4 + $0xb8] sm:$0xff] %vm423_vm0, %v3588_v9 }
  0x56   : > { %448 = vst.msk [vmem:[#allocation4 + $0xc0] sm:$0xff] %vm423_vm0, %v3588_v9  ;;  %449 = vst.msk [vmem:[#allocation4 + $0xc8] sm:$0xff] %vm423_vm0, %v3588_v9 }
  0x57   : > { %450 = vst.msk [vmem:[#allocation4 + $0xd0] sm:$0xff] %vm423_vm0, %v3588_v9  ;;  %451 = vst.msk [vmem:[#allocation4 + $0xd8] sm:$0xff] %vm423_vm0, %v3588_v9 }
  0x58   : > { %452 = vst.msk [vmem:[#allocation4 + $0xe0] sm:$0xff] %vm423_vm0, %v3588_v9  ;;  %453 = vst.msk [vmem:[#allocation4 + $0xe8] sm:$0xff] %vm423_vm0, %v3588_v9 }
  0x59   : > { %454 = vst.msk [vmem:[#allocation4 + $0xf0] sm:$0xff] %vm423_vm0, %v3588_v9  ;;  %455 = vst.msk [vmem:[#allocation4 + $0xf8] sm:$0xff] %vm423_vm0, %v3588_v9 }
  0x5b   : > { %3084 = vmatmul.mubr.msk.f32.vlgmr.msra.gmra.mrb[0].mxu0 %vm423_vm0, %v488_v17  ;;  %v472_v17 = vld [vmem:[%s3682_s28 + $0x80] sm:$0xff] }
  0x5c   : > { %3085 = vmatprep.mubr.msk.f32.mxu0 %vm423_vm0, %v489_v52  ;;  %v504_v18 = vmul.f32 0.125, %v472_v17 }
  0x5f   : > { %3086 = vmatmul.mubr.msk.f32.gmra.mrb[2].mxu0 %vm423_vm0, %v489_v52 }
  0x60   : > { %3087 = vmatprep.mubr.msk.f32.mxu0 %vm423_vm0, %v490_v54 }
  0x63   : > { %3088 = vmatmul.mubr.msk.f32.gmra.mrb[4].mxu0 %vm423_vm0, %v490_v54 }
  0x64   : > { %3089 = vmatprep.mubr.msk.f32.mxu0 %vm423_vm0, %v491_v56 }
  0x67   : > { %3090 = vmatmul.mubr.msk.f32.gmra.mrb[6].mxu0 %vm423_vm0, %v491_v56 }
  0x68   : > { %3091 = vmatprep.mubr.msk.f32.mxu0 %vm423_vm0, %v492_v58 }
  0x6b   : > { %3092 = vmatmul.mubr.msk.f32.gmra.mrb[8].mxu0 %vm423_vm0, %v492_v58 }
  0x6c   : > { %3093 = vmatprep.mubr.msk.f32.mxu0 %vm423_vm0, %v493_v60 }
  0x6f   : > { %3094 = vmatmul.mubr.msk.f32.gmra.mrb[10].mxu0 %vm423_vm0, %v493_v60 }
  0x70   : > { %3095 = vmatprep.mubr.msk.f32.mxu0 %vm423_vm0, %v494_v62 }
  0x73   : > { %3096 = vmatmul.mubr.msk.f32.gmra.mrb[12].mxu0 %vm423_vm0, %v494_v62 }
  0x74   : > { %3097 = vmatprep.mubr.msk.f32.mxu0 %vm423_vm0, %v495_v0 }
  0x77   : > { %3098 = vmatmul.mubr.msk.f32.gmra.mrb[14].mxu0 %vm423_vm0, %v495_v0 }
  0x78   : > { %3099 = vmatprep.mubr.msk.f32.mxu0 %vm423_vm0, %v496_v2 }
  0x7b   : > { %3100 = vmatmul.mubr.msk.f32.gmra.mrb[16].mxu0 %vm423_vm0, %v496_v2 }
  0x7c   : > { %3101 = vmatprep.mubr.msk.f32.mxu0 %vm423_vm0, %v497_v4 }
  0x7f   : > { %3102 = vmatmul.mubr.msk.f32.gmra.mrb[18].mxu0 %vm423_vm0, %v497_v4 }
  0x80   : > { %3103 = vmatprep.mubr.msk.f32.mxu0 %vm423_vm0, %v498_v6 }
  0x83   : > { %3104 = vmatmul.mubr.msk.f32.gmra.mrb[20].mxu0 %vm423_vm0, %v498_v6 }
  0x84   : > { %3105 = vmatprep.mubr.msk.f32.mxu0 %vm423_vm0, %v499_v8 }
  0x87   : > { %3106 = vmatmul.mubr.msk.f32.gmra.mrb[22].mxu0 %vm423_vm0, %v499_v8 }
  0x88   : > { %3107 = vmatprep.mubr.msk.f32.mxu0 %vm423_vm0, %v500_v10 }
  0x8b   : > { %3108 = vmatmul.mubr.msk.f32.gmra.mrb[24].mxu0 %vm423_vm0, %v500_v10 }
  0x8c   : > { %3109 = vmatprep.mubr.msk.f32.mxu0 %vm423_vm0, %v501_v12 }
  0x8f   : > { %3110 = vmatmul.mubr.msk.f32.gmra.mrb[26].mxu0 %vm423_vm0, %v501_v12 }
  0x90   : > { %3111 = vmatprep.mubr.msk.f32.mxu0 %vm423_vm0, %v502_v14 }
  0x93   : > { %3112 = vmatmul.mubr.msk.f32.gmra.mrb[28].mxu0 %vm423_vm0, %v502_v14 }
  0x94   : > { %3113 = vmatprep.mubr.msk.f32.mxu0 %vm423_vm0, %v503_v16 }
  0x97   : > { %3114 = vmatmul.mubr.msk.f32.gmra.mrb[30].mxu0 %vm423_vm0, %v503_v16 }
  0x98   : > { %3115 = vmatprep.mubr.msk.f32.mxu0 %vm423_vm0, %v504_v18 }
  0x9b   : > { %3116 = vmatmul.mubr.msk.f32.gmra.mrb[32].mxu0 %vm423_vm0, %v504_v18 }
  0x9c   : > { %3117 = vmatprep.mubr.msk.f32.mxu0 %vm423_vm0, %v505_v20 }
  0x9f   : > { %3118 = vmatmul.mubr.msk.f32.gmra.mrb[34].mxu0 %vm423_vm0, %v505_v20 }
  0xa0   : > { %3119 = vmatprep.mubr.msk.f32.mxu0 %vm423_vm0, %v506_v22 }
  0xa3   : > { %3120 = vmatmul.mubr.msk.f32.gmra.mrb[36].mxu0 %vm423_vm0, %v506_v22 }
  0xa4   : > { %3121 = vmatprep.mubr.msk.f32.mxu0 %vm423_vm0, %v507_v24 }
  0xa7   : > { %3122 = vmatmul.mubr.msk.f32.gmra.mrb[38].mxu0 %vm423_vm0, %v507_v24 }
  0xa8   : > { %3123 = vmatprep.mubr.msk.f32.mxu0 %vm423_vm0, %v508_v26 }
  0xab   : > { %3124 = vmatmul.mubr.msk.f32.gmra.mrb[40].mxu0 %vm423_vm0, %v508_v26 }
  0xac   : > { %3125 = vmatprep.mubr.msk.f32.mxu0 %vm423_vm0, %v509_v28 }
  0xaf   : > { %3126 = vmatmul.mubr.msk.f32.gmra.mrb[42].mxu0 %vm423_vm0, %v509_v28 }
  0xb0   : > { %3127 = vmatprep.mubr.msk.f32.mxu0 %vm423_vm0, %v510_v30 }
  0xb3   : > { %3128 = vmatmul.mubr.msk.f32.gmra.mrb[44].mxu0 %vm423_vm0, %v510_v30 }
  0xb4   : > { %3129 = vmatprep.mubr.msk.f32.mxu0 %vm423_vm0, %v511_v32 }
  0xb7   : > { %3130 = vmatmul.mubr.msk.f32.gmra.mrb[46].mxu0 %vm423_vm0, %v511_v32 }
  0xb8   : > { %3131 = vmatprep.mubr.msk.f32.mxu0 %vm423_vm0, %v512_v34 }
  0xbb   : > { %3132 = vmatmul.mubr.msk.f32.gmra.mrb[48].mxu0 %vm423_vm0, %v512_v34 }
  0xbc   : > { %3133 = vmatprep.mubr.msk.f32.mxu0 %vm423_vm0, %v513_v36 }
  0xbf   : > { %3134 = vmatmul.mubr.msk.f32.gmra.mrb[50].mxu0 %vm423_vm0, %v513_v36 }
  0xc0   : > { %3135 = vmatprep.mubr.msk.f32.mxu0 %vm423_vm0, %v514_v38 }
  0xc3   : > { %3136 = vmatmul.mubr.msk.f32.gmra.mrb[52].mxu0 %vm423_vm0, %v514_v38 }
  0xc4   : > { %3137 = vmatprep.mubr.msk.f32.mxu0 %vm423_vm0, %v515_v40 }
  0xc7   : > { %3138 = vmatmul.mubr.msk.f32.gmra.mrb[54].mxu0 %vm423_vm0, %v515_v40 }
  0xc8   : > { %3139 = vmatprep.mubr.msk.f32.mxu0 %vm423_vm0, %v516_v42 }
  0xcb   : > { %3140 = vmatmul.mubr.msk.f32.gmra.mrb[56].mxu0 %vm423_vm0, %v516_v42 }
  0xcc   : > { %3141 = vmatprep.mubr.msk.f32.mxu0 %vm423_vm0, %v517_v44 }
  0xcf   : > { %3142 = vmatmul.mubr.msk.f32.gmra.mrb[58].mxu0 %vm423_vm0, %v517_v44 }
  0xd0   : > { %3143 = vmatprep.mubr.msk.f32.mxu0 %vm423_vm0, %v518_v46 }
  0xd3   : > { %3144 = vmatmul.mubr.msk.f32.gmra.mrb[60].mxu0 %vm423_vm0, %v518_v46 }
  0xd4   : > { %3145 = vmatprep.mubr.msk.f32.mxu0 %vm423_vm0, %v519_v48 }
  0xd7   : > { %3146 = vmatmul.mubr.msk.f32.gmra.mrb[62].mxu0 %vm423_vm0, %v519_v48 }
 0x12e   : > { %v3828_v49 = vpop.f32.mrb[0].mxu0 }
 0x12f   : > { %v3830_v50 = vpop.f32.mrb[1].mxu0 }
 0x130   : > { %v1130_v52 = vmax.f32 %v3828_v49, %v3830_v50 }
 0x132   : > { %1131 = vmax.xlane.f32.xlu0 %v1130_v52  ;;  %v3866_v53 = vpop.f32.mrb[2].mxu0 }
 0x133   : > { %v3868_v54 = vpop.f32.mrb[3].mxu0 }
 0x134   : > { %v1133_v55 = vmax.f32 %v3866_v53, %v3868_v54 }
 0x136   : > { %1134 = vmax.xlane.f32.xlu0 %v1133_v55  ;;  %v3872_v56 = vpop.f32.mrb[4].mxu0 }
 0x137   : > { %v3874_v57 = vpop.f32.mrb[5].mxu0 }
 0x138   : > { %v1136_v58 = vmax.f32 %v3872_v56, %v3874_v57 }
 0x13a   : > { %1137 = vmax.xlane.f32.xlu1 %v1136_v58  ;;  %v3878_v59 = vpop.f32.mrb[6].mxu0 }
 0x13b   : > { %v3880_v60 = vpop.f32.mrb[7].mxu0 }
 0x13c   : > { %v1139_v61 = vmax.f32 %v3878_v59, %v3880_v60 }
 0x13e   : > { %1140 = vmax.xlane.f32.xlu1 %v1139_v61  ;;  %v3884_v62 = vpop.f32.mrb[8].mxu0 }
 0x13f   : > { %v3886_v63 = vpop.f32.mrb[9].mxu0 }
 0x140   : > { %v1142_v0 = vmax.f32 %v3884_v62, %v3886_v63 }
 0x142   : > { %1143 = vmax.xlane.f32.xlu0 %v1142_v0  ;;  %v3890_v2 = vpop.f32.mrb[10].mxu0 }
 0x143   : > { %v3892_v3 = vpop.f32.mrb[11].mxu0 }
 0x144   : > { %5210 = vst [vmem:[#allocation5_spill] sm:$0xff] %v3892_v3  ;;  %v1145_v4 = vmax.f32 %v3890_v2, %v3892_v3  ;;  %v4479_v3 = vld [vmem:[#allocation2 + $0xc8] sm:$0xff] }
 0x145   : > { %5269 = vst [vmem:[#allocation64_spill] sm:$0xff] %v4479_v3 }
 0x146   : > { %1146 = vmax.xlane.f32.xlu1 %v1145_v4  ;;  %v3896_v5 = vpop.f32.mrb[12].mxu0 }
 0x147   : > { %5211 = vst [vmem:[#allocation6_spill] sm:$0xff] %v3896_v5  ;;  %v3898_v6 = vpop.f32.mrb[13].mxu0 }
 0x148   : > { %5212 = vst [vmem:[#allocation7_spill] sm:$0xff] %v3898_v6  ;;  %v1148_v7 = vmax.f32 %v3896_v5, %v3898_v6  ;;  %v4469_v5 = vld [vmem:[#allocation2 + $0xc0] sm:$0xff] }
 0x149   : > { %5267 = vst [vmem:[#allocation62_spill] sm:$0xff] %v4469_v5 }
 0x14a   : > { %1149 = vmax.xlane.f32.xlu0 %v1148_v7  ;;  %v3902_v8 = vpop.f32.mrb[14].mxu0 }
 0x14b   : > { %5213 = vst [vmem:[#allocation8_spill] sm:$0xff] %v3902_v8  ;;  %v4032_v10 = vpop.f32.mrb[15].mxu0 }
 0x14c   : > { %5214 = vst [vmem:[#allocation9_spill] sm:$0xff] %v4032_v10  ;;  %v1151_v11 = vmax.f32 %v3902_v8, %v4032_v10  ;;  %v4459_v8 = vld [vmem:[#allocation2 + $0xb8] sm:$0xff] }
 0x14d   : > { %5265 = vst [vmem:[#allocation60_spill] sm:$0xff] %v4459_v8 }
 0x14e   : > { %1152 = vmax.xlane.f32.xlu1 %v1151_v11  ;;  %v4036_v12 = vpop.f32.mrb[16].mxu0 }
 0x14f   : > { %5215 = vst [vmem:[#allocation10_spill] sm:$0xff] %v4036_v12  ;;  %v4038_v13 = vpop.f32.mrb[17].mxu0 }
 0x150   : > { %5216 = vst [vmem:[#allocation11_spill] sm:$0xff] %v4038_v13  ;;  %v1154_v14 = vmax.f32 %v4036_v12, %v4038_v13  ;;  %v4449_v12 = vld [vmem:[#allocation2 + $0xb0] sm:$0xff] }
 0x151   : > { %5263 = vst [vmem:[#allocation58_spill] sm:$0xff] %v4449_v12 }
 0x152   : > { %1155 = vmax.xlane.f32.xlu0 %v1154_v14  ;;  %v4042_v15 = vpop.f32.mrb[18].mxu0 }
 0x153   : > { %5217 = vst [vmem:[#allocation12_spill] sm:$0xff] %v4042_v15  ;;  %v4044_v16 = vpop.f32.mrb[19].mxu0 }
 0x154   : > { %5218 = vst [vmem:[#allocation13_spill] sm:$0xff] %v4044_v16  ;;  %v1157_v17 = vmax.f32 %v4042_v15, %v4044_v16  ;;  %v4439_v15 = vld [vmem:[#allocation2 + $0xa8] sm:$0xff] }
 0x156   : > { %1158 = vmax.xlane.f32.xlu1 %v1157_v17  ;;  %v4048_v18 = vpop.f32.mrb[20].mxu0 }
 0x157   : > { %5219 = vst [vmem:[#allocation14_spill] sm:$0xff] %v4048_v18  ;;  %v4050_v19 = vpop.f32.mrb[21].mxu0 }
 0x158   : > { %5220 = vst [vmem:[#allocation15_spill] sm:$0xff] %v4050_v19  ;;  %v1160_v20 = vmax.f32 %v4048_v18, %v4050_v19  ;;  %v4429_v18 = vld [vmem:[#allocation2 + $0xa0] sm:$0xff] }
 0x15a   : > { %1161 = vmax.xlane.f32.xlu0 %v1160_v20  ;;  %v4054_v21 = vpop.f32.mrb[22].mxu0 }
 0x15b   : > { %5221 = vst [vmem:[#allocation16_spill] sm:$0xff] %v4054_v21  ;;  %v4056_v22 = vpop.f32.mrb[23].mxu0 }
 0x15c   : > { %5222 = vst [vmem:[#allocation17_spill] sm:$0xff] %v4056_v22  ;;  %v1163_v23 = vmax.f32 %v4054_v21, %v4056_v22  ;;  %v4419_v21 = vld [vmem:[#allocation2 + $0x98] sm:$0xff] }
 0x15e   : > { %1164 = vmax.xlane.f32.xlu1 %v1163_v23  ;;  %v4060_v24 = vpop.f32.mrb[24].mxu0  ;;  %v2953_v23 = vld [vmem:[%s4140_s4 + $0x400] sm:$0xff] }
 0x15f   : > { %5223 = vst [vmem:[#allocation18_spill] sm:$0xff] %v4060_v24  ;;  %v4062_v25 = vpop.f32.mrb[25].mxu0 }
 0x160   : > { %5224 = vst [vmem:[#allocation19_spill] sm:$0xff] %v4062_v25  ;;  %v1166_v26 = vmax.f32 %v4060_v24, %v4062_v25  ;;  %v4409_v24 = vld [vmem:[#allocation2 + $0x90] sm:$0xff] }
 0x162   : > { %1167 = vmax.xlane.f32.xlu0 %v1166_v26  ;;  %v4066_v27 = vpop.f32.mrb[26].mxu0  ;;  %v2954_v26 = vld [vmem:[%s4140_s4 + $0x408] sm:$0xff] }
 0x163   : > { %5225 = vst [vmem:[#allocation20_spill] sm:$0xff] %v4066_v27  ;;  %v4068_v28 = vpop.f32.mrb[27].mxu0 }
 0x164   : > { %5226 = vst [vmem:[#allocation21_spill] sm:$0xff] %v4068_v28  ;;  %v1169_v29 = vmax.f32 %v4066_v27, %v4068_v28  ;;  %v4399_v27 = vld [vmem:[#allocation2 + $0x88] sm:$0xff] }
 0x166   : > { %1170 = vmax.xlane.f32.xlu1 %v1169_v29  ;;  %v4072_v30 = vpop.f32.mrb[28].mxu0  ;;  %v3196_v29 = vpack.c.bf16 %v2954_v26, %v2953_v23  ;;  %v2958_v23 = vld [vmem:[%s4140_s4 + $0x428] sm:$0xff] }
 0x167   : > { %5227 = vst [vmem:[#allocation22_spill] sm:$0xff] %v4072_v30  ;;  %v4074_v31 = vpop.f32.mrb[29].mxu0 }
 0x168   : > { %5228 = vst [vmem:[#allocation23_spill] sm:$0xff] %v4074_v31  ;;  %v1172_v32 = vmax.f32 %v4072_v30, %v4074_v31  ;;  %v4389_v30 = vld [vmem:[#allocation2 + $0x80] sm:$0xff] }
 0x16a   : > { %1173 = vmax.xlane.f32.xlu0 %v1172_v32  ;;  %v4078_v33 = vpop.f32.mrb[30].mxu0 }
 0x16b   : > { %5229 = vst [vmem:[#allocation24_spill] sm:$0xff] %v4078_v33  ;;  %v4080_v34 = vpop.f32.mrb[31].mxu0 }
 0x16c   : > { %5230 = vst [vmem:[#allocation25_spill] sm:$0xff] %v4080_v34  ;;  %v1175_v35 = vmax.f32 %v4078_v33, %v4080_v34  ;;  %v4379_v33 = vld [vmem:[#allocation2 + $0x78] sm:$0xff] }
 0x16e   : > { %1176 = vmax.xlane.f32.xlu1 %v1175_v35  ;;  %v4084_v36 = vpop.f32.mrb[32].mxu0  ;;  %v3589_v35 = vmov 0.0|0.0  }
 0x16f   : > { %5231 = vst [vmem:[#allocation26_spill] sm:$0xff] %v4084_v36  ;;  %v4086_v37 = vpop.f32.mrb[33].mxu0  ;;  %3195 = vmatprep.subr.bf16.mxu1 %v3589_v35 }
 0x170   : > { %5232 = vst [vmem:[#allocation27_spill] sm:$0xff] %v4086_v37  ;;  %v1178_v38 = vmax.f32 %v4084_v36, %v4086_v37  ;;  %3197 = vmatpush1.bf16.msra.mxu1 %v3196_v29  ;;  %v4369_v36 = vld [vmem:[#allocation2 + $0x70] sm:$0xff] }
 0x171   : > { %3198 = vmatprep.subr.bf16.mxu1 %v3589_v35 }
 0x172   : > { %1179 = vmax.xlane.f32.xlu0 %v1178_v38  ;;  %v4090_v39 = vpop.f32.mrb[34].mxu0 }
 0x173   : > { %5233 = vst [vmem:[#allocation28_spill] sm:$0xff] %v4090_v39  ;;  %v4092_v40 = vpop.f32.mrb[35].mxu0 }
 0x174   : > { %5234 = vst [vmem:[#allocation29_spill] sm:$0xff] %v4092_v40  ;;  %v1181_v41 = vmax.f32 %v4090_v39, %v4092_v40  ;;  %v4359_v39 = vld [vmem:[#allocation2 + $0x68] sm:$0xff] }
 0x176   : > { %1182 = vmax.xlane.f32.xlu1 %v1181_v41  ;;  %v4096_v42 = vpop.f32.mrb[36].mxu0 }
 0x177   : > { %5235 = vst [vmem:[#allocation30_spill] sm:$0xff] %v4096_v42  ;;  %v4098_v43 = vpop.f32.mrb[37].mxu0 }
 0x178   : > { %5236 = vst [vmem:[#allocation31_spill] sm:$0xff] %v4098_v43  ;;  %v1184_v44 = vmax.f32 %v4096_v42, %v4098_v43  ;;  %v4349_v42 = vld [vmem:[#allocation2 + $0x60] sm:$0xff] }
 0x17a   : > { %1185 = vmax.xlane.f32.xlu0 %v1184_v44  ;;  %v4102_v45 = vpop.f32.mrb[38].mxu0  ;;  %v2955_v44 = vld [vmem:[%s4140_s4 + $0x410] sm:$0xff] }
 0x17b   : > { %5237 = vst [vmem:[#allocation32_spill] sm:$0xff] %v4102_v45  ;;  %v4104_v46 = vpop.f32.mrb[39].mxu0 }
 0x17c   : > { %5238 = vst [vmem:[#allocation33_spill] sm:$0xff] %v4104_v46  ;;  %v1187_v47 = vmax.f32 %v4102_v45, %v4104_v46  ;;  %v4339_v45 = vld [vmem:[#allocation2 + $0x58] sm:$0xff] }
 0x17e   : > { %1188 = vmax.xlane.f32.xlu1 %v1187_v47  ;;  %v4108_v48 = vpop.f32.mrb[40].mxu0  ;;  %v2956_v47 = vld [vmem:[%s4140_s4 + $0x418] sm:$0xff] }
 0x17f   : > { %5239 = vst [vmem:[#allocation34_spill] sm:$0xff] %v4108_v48  ;;  %v4110_v51 = vpop.f32.mrb[41].mxu0 }
 0x180   : > { %5240 = vst [vmem:[#allocation35_spill] sm:$0xff] %v4110_v51  ;;  %v1190_v52 = vmax.f32 %v4108_v48, %v4110_v51  ;;  %v4329_v48 = vld [vmem:[#allocation2 + $0x50] sm:$0xff] }
 0x182   : > { %1191 = vmax.xlane.f32.xlu0 %v1190_v52  ;;  %v4114_v55 = vpop.f32.mrb[42].mxu0  ;;  %v3199_v52 = vpack.c.bf16 %v2956_v47, %v2955_v44  ;;  %v2959_v47 = vld [vmem:[%s4140_s4 + $0x430] sm:$0xff] }
 0x183   : > { %5241 = vst [vmem:[#allocation36_spill] sm:$0xff] %v4114_v55  ;;  %v4116_v58 = vpop.f32.mrb[43].mxu0 }
 0x184   : > { %5242 = vst [vmem:[#allocation37_spill] sm:$0xff] %v4116_v58  ;;  %v1193_v61 = vmax.f32 %v4114_v55, %v4116_v58  ;;  %3200 = vmatpush1.bf16.msra.mxu1 %v3199_v52  ;;  %v2960_v52 = vld [vmem:[%s4140_s4 + $0x438] sm:$0xff]  ;;  %v4319_v55 = vld [vmem:[#allocation2 + $0x48] sm:$0xff] }
 0x185   : > { %3201 = vmatprep.subr.bf16.mxu1 %v3589_v35 }
 0x186   : > { %1194 = vmax.xlane.f32.xlu1 %v1193_v61  ;;  %v4120_v0 = vpop.f32.mrb[44].mxu0 }
 0x187   : > { %5243 = vst [vmem:[#allocation38_spill] sm:$0xff] %v4120_v0  ;;  %v4122_v1 = vpop.f32.mrb[45].mxu0 }
 0x188   : > { %5244 = vst [vmem:[#allocation39_spill] sm:$0xff] %v4122_v1  ;;  %v1196_v4 = vmax.f32 %v4120_v0, %v4122_v1  ;;  %v4309_v0 = vld [vmem:[#allocation2 + $0x40] sm:$0xff] }
 0x18a   : > { %1197 = vmax.xlane.f32.xlu0 %v1196_v4  ;;  %v4126_v7 = vpop.f32.mrb[46].mxu0 }
 0x18b   : > { %5245 = vst [vmem:[#allocation40_spill] sm:$0xff] %v4126_v7  ;;  %v4128_v9 = vpop.f32.mrb[47].mxu0 }
 0x18c   : > { %5246 = vst [vmem:[#allocation41_spill] sm:$0xff] %v4128_v9  ;;  %v1199_v11 = vmax.f32 %v4126_v7, %v4128_v9  ;;  %v2984_v9 = vld [vmem:[%s4140_s4 + $0x4f8] sm:$0xff] }
 0x18e   : > { %1200 = vmax.xlane.f32.xlu1 %v1199_v11  ;;  %v4132_v14 = vpop.f32.mrb[48].mxu0 }
 0x18f   : > { %5247 = vst [vmem:[#allocation42_spill] sm:$0xff] %v4132_v14  ;;  %v4134_v17 = vpop.f32.mrb[49].mxu0 }
 0x190   : > { %5248 = vst [vmem:[#allocation43_spill] sm:$0xff] %v4134_v17  ;;  %v1202_v20 = vmax.f32 %v4132_v14, %v4134_v17  ;;  %v2982_v17 = vld [vmem:[%s4140_s4 + $0x4e8] sm:$0xff]  ;;  %v2983_v14 = vld [vmem:[%s4140_s4 + $0x4f0] sm:$0xff] }
 0x192   : > { %1203 = vmax.xlane.f32.xlu0 %v1202_v20  ;;  %v4146_v32 = vpop.f32.mrb[50].mxu0  ;;  %v2957_v20 = vld [vmem:[%s4140_s4 + $0x420] sm:$0xff] }
 0x193   : > { %5249 = vst [vmem:[#allocation44_spill] sm:$0xff] %v4146_v32  ;;  %v4149_v38 = vpop.f32.mrb[51].mxu0  ;;  %v3202_v26 = vpack.c.bf16 %v2958_v23, %v2957_v20 }
 0x194   : > { %5250 = vst [vmem:[#allocation45_spill] sm:$0xff] %v4149_v38  ;;  %v1205_v41 = vmax.f32 %v4146_v32, %v4149_v38  ;;  %v2980_v38 = vld [vmem:[%s4140_s4 + $0x4d8] sm:$0xff]  ;;  %v2981_v32 = vld [vmem:[%s4140_s4 + $0x4e0] sm:$0xff] }
 0x195   : > { %3203 = vmatpush1.bf16.msra.mxu1 %v3202_v26  ;;  %v2961_v26 = vld [vmem:[%s4140_s4 + $0x440] sm:$0xff] }
 0x196   : > { %1206 = vmax.xlane.f32.xlu1 %v1205_v41  ;;  %v4156_v61 = vpop.f32.mrb[52].mxu0  ;;  %3204 = vmatprep.subr.bf16.mxu1 %v3589_v35 }
 0x197   : > { %5251 = vst [vmem:[#allocation46_spill] sm:$0xff] %v4156_v61  ;;  %v4158_v4 = vpop.f32.mrb[53].mxu0 }
 0x198   : > { %5252 = vst [vmem:[#allocation47_spill] sm:$0xff] %v4158_v4  ;;  %v1208_v11 = vmax.f32 %v4156_v61, %v4158_v4  ;;  %v3205_v4 = vpack.c.bf16 %v2960_v52, %v2959_v47  ;;  %v2976_v61 = vld [vmem:[%s4140_s4 + $0x4b8] sm:$0xff] }
 0x19a   : > { %1209 = vmax.xlane.f32.xlu0 %v1208_v11  ;;  %v4165_v29 = vpop.f32.mrb[54].mxu0  ;;  %3206 = vmatpush1.bf16.msra.mxu1 %v3205_v4  ;;  %v2963_v4 = vld [vmem:[%s4140_s4 + $0x450] sm:$0xff] }
 0x19b   : > { %5253 = vst [vmem:[#allocation48_spill] sm:$0xff] %v4165_v29  ;;  %v4167_v41 = vpop.f32.mrb[55].mxu0  ;;  %3207 = vmatprep.subr.bf16.mxu1 %v3589_v35 }
 0x19c   : > { %5254 = vst [vmem:[#allocation49_spill] sm:$0xff] %v4167_v41  ;;  %v1211_v44 = vmax.f32 %v4165_v29, %v4167_v41  ;;  %v2962_v41 = vld [vmem:[%s4140_s4 + $0x448] sm:$0xff] }
 0x19d   : > { %v3208_v29 = vpack.c.bf16 %v2962_v41, %v2961_v26 }
 0x19e   : > { %1212 = vmax.xlane.f32.xlu1 %v1211_v44  ;;  %v4174_v20 = vpop.f32.mrb[56].mxu0 }
 0x19f   : > { %5255 = vst [vmem:[#allocation50_spill] sm:$0xff] %v4174_v20  ;;  %v4176_v11 = vpop.f32.mrb[57].mxu0  ;;  %3209 = vmatpush1.bf16.msra.mxu1 %v3208_v29  ;;  %v2965_v29 = vld [vmem:[%s4140_s4 + $0x460] sm:$0xff] }
 0x1a0   : > { %5256 = vst [vmem:[#allocation51_spill] sm:$0xff] %v4176_v11  ;;  %v1214_v23 = vmax.f32 %v4174_v20, %v4176_v11  ;;  %3210 = vmatprep.subr.bf16.mxu1 %v3589_v35  ;;  %v2964_v11 = vld [vmem:[%s4140_s4 + $0x458] sm:$0xff] }
 0x1a1   : > { %v3211_v20 = vpack.c.bf16 %v2964_v11, %v2963_v4  ;;  %v2967_v4 = vld [vmem:[%s4140_s4 + $0x470] sm:$0xff] }
 0x1a2   : > { %1215 = vmax.xlane.f32.xlu0 %v1214_v23  ;;  %v4183_v47 = vpop.f32.mrb[58].mxu0 }
 0x1a3   : > { %5257 = vst [vmem:[#allocation52_spill] sm:$0xff] %v4183_v47  ;;  %v4185_v44 = vpop.f32.mrb[59].mxu0  ;;  %3212 = vmatpush1.bf16.msra.mxu1 %v3211_v20 }
 0x1a4   : > { %5258 = vst [vmem:[#allocation53_spill] sm:$0xff] %v4185_v44  ;;  %v1217_v52 = vmax.f32 %v4183_v47, %v4185_v44  ;;  %3213 = vmatprep.subr.bf16.mxu1 %v3589_v35  ;;  %v2966_v44 = vld [vmem:[%s4140_s4 + $0x468] sm:$0xff] }
 0x1a5   : > { %v3214_v47 = vpack.c.bf16 %v2966_v44, %v2965_v29  ;;  %v2969_v44 = vld [vmem:[%s4140_s4 + $0x480] sm:$0xff] }
 0x1a6   : > { %1218 = vmax.xlane.f32.xlu1 %v1217_v52  ;;  %v4192_v41 = vpop.f32.mrb[60].mxu0 }
 0x1a7   : > { %5259 = vst [vmem:[#allocation54_spill] sm:$0xff] %v4192_v41  ;;  %v4194_v23 = vpop.f32.mrb[61].mxu0  ;;  %3215 = vmatpush1.bf16.msra.mxu1 %v3214_v47  ;;  %v2971_v47 = vld [vmem:[%s4140_s4 + $0x490] sm:$0xff] }
 0x1a8   : > { %5260 = vst [vmem:[#allocation55_spill] sm:$0xff] %v4194_v23  ;;  %v1220_v26 = vmax.f32 %v4192_v41, %v4194_v23  ;;  %3216 = vmatprep.subr.bf16.mxu1 %v3589_v35  ;;  %v2968_v23 = vld [vmem:[%s4140_s4 + $0x478] sm:$0xff] }
 0x1a9   : > { %v3217_v41 = vpack.c.bf16 %v2968_v23, %v2967_v4  ;;  %v2973_v23 = vld [vmem:[%s4140_s4 + $0x4a0] sm:$0xff]  ;;  %v2975_v4 = vld [vmem:[%s4140_s4 + $0x4b0] sm:$0xff] }
 0x1aa   : > { %1221 = vmax.xlane.f32.xlu0 %v1220_v26  ;;  %v4201_v11 = vpop.f32.mrb[62].mxu0  ;;  %v2970_v26 = vld [vmem:[%s4140_s4 + $0x488] sm:$0xff] }
 0x1ab   : > { %5261 = vst [vmem:[#allocation56_spill] sm:$0xff] %v4201_v11  ;;  %v4203_v52 = vpop.f32.mrb[63].mxu0  ;;  %3218 = vmatpush1.bf16.msra.mxu1 %v3217_v41  ;;  %v3220_v29 = vpack.c.bf16 %v2970_v26, %v2969_v44  ;;  %v2974_v41 = vld [vmem:[%s4140_s4 + $0x4a8] sm:$0xff]  ;;  %v4222_v44 = vld [vmem:[#allocation2] sm:$0xff]  ;;  %v3229_v26 = vpack.c.bf16 %v2976_v61, %v2975_v4 }
 0x1ac   : > { %5262 = vst [vmem:[#allocation57_spill] sm:$0xff] %v4203_v52  ;;  %v1223_v20 = vmax.f32 %v4201_v11, %v4203_v52  ;;  %3219 = vmatprep.subr.bf16.mxu1 %v3589_v35  ;;  %v2972_v52 = vld [vmem:[%s4140_s4 + $0x498] sm:$0xff] }
 0x1ad   : > { %v3223_v11 = vpack.c.bf16 %v2972_v52, %v2971_v47  ;;  %v4228_v52 = vld [vmem:[#allocation2 + $0x8] sm:$0xff]  ;;  %v2977_v47 = vld [vmem:[%s4140_s4 + $0x4c0] sm:$0xff] }
 0x1ae   : > { %1224 = vmax.xlane.f32.xlu1 %v1223_v20  ;;  %v3226_v20 = vpack.c.bf16 %v2974_v41, %v2973_v23  ;;  %v2978_v23 = vld [vmem:[%s4140_s4 + $0x4c8] sm:$0xff] }
 0x1af   : > { %3221 = vmatpush1.bf16.msra.mxu1 %v3220_v29  ;;  %v3232_v61 = vpack.c.bf16 %v2978_v23, %v2977_v47 }
 0x1b0   : > { %3222 = vmatprep.subr.bf16.mxu1 %v3589_v35 }
 0x1b3   : > { %3224 = vmatpush1.bf16.msra.mxu1 %v3223_v11 }
 0x1b4   : > { %3225 = vmatprep.subr.bf16.mxu1 %v3589_v35 }
 0x1b7   : > { %3227 = vmatpush1.bf16.msra.mxu1 %v3226_v20 }
 0x1b8   : > { %3228 = vmatprep.subr.bf16.mxu1 %v3589_v35 }
 0x1bb   : > { %3230 = vmatpush1.bf16.msra.mxu1 %v3229_v26  ;;  %v4240_v26 = vld [vmem:[#allocation2 + $0x10] sm:$0xff] }
 0x1bc   : > { %3231 = vmatprep.subr.bf16.mxu1 %v3589_v35 }
 0x1bf   : > { %v1132_v29 = vpop.xlane.xlu0 %1131  ;;  %3233 = vmatpush1.bf16.msra.mxu1 %v3232_v61  ;;  %v4253_v61 = vld [vmem:[#allocation2 + $0x18] sm:$0xff] }
 0x1c0   : > { %v4225_v11 = vmax.f32 %v4222_v44, %v1132_v29  ;;  %3234 = vmatprep.subr.bf16.mxu1 %v3589_v35  ;;  %v2979_v29 = vld [vmem:[%s4140_s4 + $0x4d0] sm:$0xff] }
 0x1c1   : > { %v3235_v47 = vpack.c.bf16 %v2980_v38, %v2979_v29  ;;  %v3238_v38 = vpack.c.bf16 %v2982_v17, %v2981_v32  ;;  %v3241_v17 = vpack.c.bf16 %v2984_v9, %v2983_v14  ;;  %v4289_v9 = vld [vmem:[#allocation2 + $0x30] sm:$0xff] }
 0x1c2   : > { %2316 = vst.msk [vmem:[#allocation2] sm:$0xff] %vm358_vm2, %v4225_v11  ;;  %1356 = vperm.xlu0 %3288, %v4225_v11  }
 0x1c3   : > { %v1135_v20 = vpop.xlane.xlu0 %1134  ;;  %3236 = vmatpush1.bf16.msra.mxu1 %v3235_v47  ;;  %v4266_v47 = vld [vmem:[#allocation2 + $0x20] sm:$0xff] }
 0x1c4   : > { %v4238_v4 = vmax.f32 %v4228_v52, %v1135_v20  ;;  %3237 = vmatprep.subr.bf16.mxu1 %v3589_v35 }
 0x1c6   : > { %2317 = vst.msk [vmem:[#allocation2 + $0x8] sm:$0xff] %vm358_vm2, %v4238_v4  ;;  %1361 = vperm.xlu1 %3289, %v4238_v4  }
 0x1c7   : > { %v1138_v23 = vpop.xlane.xlu1 %1137  ;;  %3239 = vmatpush1.bf16.msra.mxu1 %v3238_v38  ;;  %v4279_v38 = vld [vmem:[#allocation2 + $0x28] sm:$0xff] }
 0x1c8   : > { %v4251_v20 = vmax.f32 %v4240_v26, %v1138_v23  ;;  %3240 = vmatprep.subr.bf16.mxu1 %v3589_v35  ;;  %v4299_v35 = vld [vmem:[#allocation2 + $0x38] sm:$0xff] }
 0x1ca   : > { %2318 = vst.msk [vmem:[#allocation2 + $0x10] sm:$0xff] %vm358_vm2, %v4251_v20  ;;  %1366 = vperm.xlu1 %3289, %v4251_v20  }
 0x1cb   : > { %v1141_v29 = vpop.xlane.xlu1 %1140  ;;  %3242 = vmatpush1.bf16.msra.mxu1 %v3241_v17 }
 0x1cc   : > { %v4264_v23 = vmax.f32 %v4253_v61, %v1141_v29 }
 0x1ce   : > { %2319 = vst.msk [vmem:[#allocation2 + $0x18] sm:$0xff] %vm358_vm2, %v4264_v23  ;;  %1371 = vperm.xlu1 %3289, %v4264_v23  }
 0x1cf   : > { %v1144_v32 = vpop.xlane.xlu0 %1143 }
 0x1d0   : > { %v4277_v29 = vmax.f32 %v4266_v47, %v1144_v32 }
 0x1d2   : > { %2320 = vst.msk [vmem:[#allocation2 + $0x20] sm:$0xff] %vm358_vm2, %v4277_v29  ;;  %1376 = vperm.xlu1 %3289, %v4277_v29  }
 0x1d3   : > { %v1147_v41 = vpop.xlane.xlu1 %1146 }
 0x1d4   : > { %v4287_v7 = vmax.f32 %v4279_v38, %v1147_v41 }
 0x1d6   : > { %2321 = vst.msk [vmem:[#allocation2 + $0x28] sm:$0xff] %vm358_vm2, %v4287_v7  ;;  %1381 = vperm.xlu1 %3289, %v4287_v7  }
 0x1d7   : > { %v1150_v17 = vpop.xlane.xlu0 %1149 }
 0x1d8   : > { %v4297_v32 = vmax.f32 %v4289_v9, %v1150_v17 }
 0x1da   : > { %2322 = vst.msk [vmem:[#allocation2 + $0x30] sm:$0xff] %vm358_vm2, %v4297_v32  ;;  %1386 = vperm.xlu1 %3289, %v4297_v32  }
 0x1db   : > { %v1153_v14 = vpop.xlane.xlu1 %1152 }
 0x1dc   : > { %v4307_v1 = vmax.f32 %v4299_v35, %v1153_v14 }
 0x1de   : > { %2323 = vst.msk [vmem:[#allocation2 + $0x38] sm:$0xff] %vm358_vm2, %v4307_v1  ;;  %1391 = vperm.xlu1 %3289, %v4307_v1  }
 0x1df   : > { %v1156_v41 = vpop.xlane.xlu0 %1155 }
 0x1e0   : > { %v4317_v58 = vmax.f32 %v4309_v0, %v1156_v41 }
 0x1e2   : > { %2324 = vst.msk [vmem:[#allocation2 + $0x40] sm:$0xff] %vm358_vm2, %v4317_v58  ;;  %1396 = vperm.xlu1 %3289, %v4317_v58  }
 0x1e3   : > { %v1159_v17 = vpop.xlane.xlu1 %1158 }
 0x1e4   : > { %v4327_v51 = vmax.f32 %v4319_v55, %v1159_v17 }
 0x1e6   : > { %2325 = vst.msk [vmem:[#allocation2 + $0x48] sm:$0xff] %vm358_vm2, %v4327_v51  ;;  %1401 = vperm.xlu0 %3288, %v4327_v51  }
 0x1e7   : > { %v1162_v14 = vpop.xlane.xlu0 %1161 }
 0x1e8   : > { %v4337_v46 = vmax.f32 %v4329_v48, %v1162_v14 }
 0x1ea   : > { %2326 = vst.msk [vmem:[#allocation2 + $0x50] sm:$0xff] %vm358_vm2, %v4337_v46  ;;  %1406 = vperm.xlu1 %3289, %v4337_v46  }
 0x1eb   : > { %v1165_v41 = vpop.xlane.xlu1 %1164 }
 0x1ec   : > { %v4347_v43 = vmax.f32 %v4339_v45, %v1165_v41 }
 0x1ee   : > { %2327 = vst.msk [vmem:[#allocation2 + $0x58] sm:$0xff] %vm358_vm2, %v4347_v43  ;;  %1411 = vperm.xlu0 %3288, %v4347_v43  }
 0x1ef   : > { %v1168_v17 = vpop.xlane.xlu0 %1167 }
 0x1f0   : > { %v4357_v40 = vmax.f32 %v4349_v42, %v1168_v17 }
 0x1f2   : > { %2328 = vst.msk [vmem:[#allocation2 + $0x60] sm:$0xff] %vm358_vm2, %v4357_v40  ;;  %1416 = vperm.xlu1 %3289, %v4357_v40  }
 0x1f3   : > { %v1171_v14 = vpop.xlane.xlu1 %1170 }
 0x1f4   : > { %v4367_v37 = vmax.f32 %v4359_v39, %v1171_v14 }
 0x1f6   : > { %2329 = vst.msk [vmem:[#allocation2 + $0x68] sm:$0xff] %vm358_vm2, %v4367_v37  ;;  %1421 = vperm.xlu0 %3288, %v4367_v37  }
 0x1f7   : > { %v1174_v41 = vpop.xlane.xlu0 %1173 }
 0x1f8   : > { %v4377_v34 = vmax.f32 %v4369_v36, %v1174_v41 }
 0x1fa   : > { %2330 = vst.msk [vmem:[#allocation2 + $0x70] sm:$0xff] %vm358_vm2, %v4377_v34  ;;  %1426 = vperm.xlu1 %3289, %v4377_v34  }
 0x1fb   : > { %v1177_v17 = vpop.xlane.xlu1 %1176 }
 0x1fc   : > { %v4387_v31 = vmax.f32 %v4379_v33, %v1177_v17 }
 0x1fe   : > { %2331 = vst.msk [vmem:[#allocation2 + $0x78] sm:$0xff] %vm358_vm2, %v4387_v31  ;;  %1431 = vperm.xlu0 %3288, %v4387_v31  }
 0x1ff   : > { %v1180_v14 = vpop.xlane.xlu0 %1179 }
 0x200   : > { %v4397_v28 = vmax.f32 %v4389_v30, %v1180_v14 }
 0x202   : > { %2332 = vst.msk [vmem:[#allocation2 + $0x80] sm:$0xff] %vm358_vm2, %v4397_v28  ;;  %1436 = vperm.xlu1 %3289, %v4397_v28  }
 0x203   : > { %v1183_v41 = vpop.xlane.xlu1 %1182 }
 0x204   : > { %v4407_v25 = vmax.f32 %v4399_v27, %v1183_v41 }
 0x206   : > { %2333 = vst.msk [vmem:[#allocation2 + $0x88] sm:$0xff] %vm358_vm2, %v4407_v25  ;;  %1441 = vperm.xlu0 %3288, %v4407_v25  }
 0x207   : > { %v1186_v17 = vpop.xlane.xlu0 %1185 }
 0x208   : > { %v4417_v22 = vmax.f32 %v4409_v24, %v1186_v17 }
 0x20a   : > { %2334 = vst.msk [vmem:[#allocation2 + $0x90] sm:$0xff] %vm358_vm2, %v4417_v22  ;;  %1446 = vperm.xlu1 %3289, %v4417_v22  }
 0x20b   : > { %v1189_v14 = vpop.xlane.xlu1 %1188 }
 0x20c   : > { %v4427_v19 = vmax.f32 %v4419_v21, %v1189_v14 }
 0x20e   : > { %2335 = vst.msk [vmem:[#allocation2 + $0x98] sm:$0xff] %vm358_vm2, %v4427_v19  ;;  %1451 = vperm.xlu0 %3288, %v4427_v19  }
 0x20f   : > { %v1192_v41 = vpop.xlane.xlu0 %1191 }
 0x210   : > { %v4437_v16 = vmax.f32 %v4429_v18, %v1192_v41 }
 0x212   : > { %2336 = vst.msk [vmem:[#allocation2 + $0xa0] sm:$0xff] %vm358_vm2, %v4437_v16  ;;  %1456 = vperm.xlu1 %3289, %v4437_v16  }
 0x213   : > { %v1195_v17 = vpop.xlane.xlu1 %1194 }
 0x214   : > { %v4447_v13 = vmax.f32 %v4439_v15, %v1195_v17 }
 0x216   : > { %2337 = vst.msk [vmem:[#allocation2 + $0xa8] sm:$0xff] %vm358_vm2, %v4447_v13  ;;  %1461 = vperm.xlu0 %3288, %v4447_v13  }
 0x217   : > { %v1198_v14 = vpop.xlane.xlu0 %1197 }
 0x218   : > { %v4457_v10 = vmax.f32 %v4449_v12, %v1198_v14  ;;  %v4487_v14 = vld [vmem:[#allocation2 + $0xd0] sm:$0xff] }
 0x219   : > { %5271 = vst [vmem:[#allocation66_spill] sm:$0xff] %v4487_v14 }
 0x21a   : > { %5264 = vst [vmem:[#allocation59_spill] sm:$0xff] %v4457_v10  ;;  %2338 = vst.msk [vmem:[#allocation2 + $0xb0] sm:$0xff] %vm358_vm2, %v4457_v10  ;;  %1466 = vperm.xlu1 %3289, %v4457_v10  }
 0x21b   : > { %v1201_v41 = vpop.xlane.xlu1 %1200 }
 0x21c   : > { %v4467_v6 = vmax.f32 %v4459_v8, %v1201_v41  ;;  %v4495_v8 = vld [vmem:[#allocation2 + $0xd8] sm:$0xff] }
 0x21d   : > { %5273 = vst [vmem:[#allocation68_spill] sm:$0xff] %v4495_v8 }
 0x21e   : > { %5266 = vst [vmem:[#allocation61_spill] sm:$0xff] %v4467_v6  ;;  %2339 = vst.msk [vmem:[#allocation2 + $0xb8] sm:$0xff] %vm358_vm2, %v4467_v6  ;;  %1471 = vperm.xlu0 %3288, %v4467_v6  }
 0x21f   : > { %v1204_v17 = vpop.xlane.xlu0 %1203 }
 0x220   : > { %v4477_v12 = vmax.f32 %v4469_v5, %v1204_v17  ;;  %v4503_v5 = vld [vmem:[#allocation2 + $0xe0] sm:$0xff] }
 0x222   : > { %5268 = vst [vmem:[#allocation63_spill] sm:$0xff] %v4477_v12  ;;  %2340 = vst.msk [vmem:[#allocation2 + $0xc0] sm:$0xff] %vm358_vm2, %v4477_v12  ;;  %1476 = vperm.xlu1 %3289, %v4477_v12  }
 0x223   : > { %v1207_v41 = vpop.xlane.xlu1 %1206 }
 0x224   : > { %v4485_v10 = vmax.f32 %v4479_v3, %v1207_v41 }
 0x226   : > { %5270 = vst [vmem:[#allocation65_spill] sm:$0xff] %v4485_v10  ;;  %2341 = vst.msk [vmem:[#allocation2 + $0xc8] sm:$0xff] %vm358_vm2, %v4485_v10  ;;  %1481 = vperm.xlu0 %3288, %v4485_v10  }
 0x227   : > { %v1210_v17 = vpop.xlane.xlu0 %1209 }
 0x228   : > { %v4493_v6 = vmax.f32 %v4487_v14, %v1210_v17  ;;  %v5275_v17 = vsub.f32 %v4228_v52, %v4238_v4  ;;  %v5277_v52 = vsub.f32 %v4240_v26, %v4251_v20  ;;  %v5279_v26 = vsub.f32 %v4266_v47, %v4277_v29 }
 0x22a   : > { %5272 = vst [vmem:[#allocation67_spill] sm:$0xff] %v4493_v6  ;;  %2342 = vst.msk [vmem:[#allocation2 + $0xd0] sm:$0xff] %vm358_vm2, %v4493_v6  ;;  %1486 = vperm.xlu1 %3289, %v4493_v6   ;;  %v1292_v14 = vmul.f32 1.442695, %v5275_v17  ;;  %v4514_v6 = vld [vmem:[#allocation2 + $0xe8] sm:$0xff] }
 0x22b   : > { %v1213_v41 = vpop.xlane.xlu1 %1212  ;;  %v1294_v4 = vmul.f32 1.442695, %v5277_v52  ;;  %v1298_v20 = vmul.f32 1.442695, %v5279_v26  ;;  %v4542_v52 = vld [vmem:[#allocation2 + $0xf8] sm:$0xff] }
 0x22c   : > { %v4501_v3 = vmax.f32 %v4495_v8, %v1213_v41  ;;  %v5276_v41 = vsub.f32 %v4222_v44, %v4225_v11  ;;  %3290 = vpow2.f32 %v1292_v14  ;;  %v5278_v44 = vsub.f32 %v4253_v61, %v4264_v23 }
 0x22d   : > { %v5281_v23 = vsub.f32 %v4289_v9, %v4297_v32 }
 0x22e   : > { %5274 = vst [vmem:[#allocation69_spill] sm:$0xff] %v4501_v3  ;;  %2343 = vst.msk [vmem:[#allocation2 + $0xd8] sm:$0xff] %vm358_vm2, %v4501_v3  ;;  %1491 = vperm.xlu0 %3288, %v4501_v3   ;;  %v1290_v8 = vmul.f32 1.442695, %v5276_v41  ;;  %v4528_v3 = vld [vmem:[#allocation2 + $0xf0] sm:$0xff] }
 0x22f   : > { %v1216_v10 = vpop.xlane.xlu0 %1215  ;;  %v1296_v11 = vmul.f32 1.442695, %v5278_v44  ;;  %v1302_v47 = vmul.f32 1.442695, %v5281_v23  ;;  %v5283_v44 = vsub.f32 %v4309_v0, %v4317_v58  ;;  %v5285_v58 = vsub.f32 %v4329_v48, %v4337_v46 }
 0x230   : > { %v4512_v12 = vmax.f32 %v4503_v5, %v1216_v10  ;;  %3292 = vpow2.f32 %v1290_v8  ;;  %v5280_v8 = vsub.f32 %v4279_v38, %v4287_v7  ;;  %v5282_v7 = vsub.f32 %v4299_v35, %v4307_v1 }
 0x231   : > { %3294 = vpow2.f32 %v1294_v4  ;;  %v5284_v1 = vsub.f32 %v4319_v55, %v4327_v51  ;;  %v1310_v0 = vmul.f32 1.442695, %v5285_v58  ;;  %v5287_v48 = vsub.f32 %v4349_v42, %v4357_v40 }
 0x232   : > { %2344 = vst.msk [vmem:[#allocation2 + $0xe0] sm:$0xff] %vm358_vm2, %v4512_v12  ;;  %1496 = vperm.xlu1 %3289, %v4512_v12   ;;  %3296 = vpow2.f32 %v1296_v11  ;;  %v1300_v61 = vmul.f32 1.442695, %v5280_v8  ;;  %v1304_v38 = vmul.f32 1.442695, %v5282_v7  ;;  %v5289_v42 = vsub.f32 %v4369_v36, %v4377_v34 }
 0x233   : > { %v1219_v17 = vpop.xlane.xlu1 %1218  ;;  %3298 = vpow2.f32 %v1298_v20  ;;  %v1306_v11 = vmul.f32 1.442695, %v5283_v44  ;;  %v1308_v35 = vmul.f32 1.442695, %v5284_v1  ;;  %v5286_v20 = vsub.f32 %v4339_v45, %v4347_v43 }
 0x234   : > { %v4526_v10 = vmax.f32 %v4514_v6, %v1219_v17  ;;  %3300 = vpow2.f32 %v1300_v61  ;;  %v1314_v55 = vmul.f32 1.442695, %v5287_v48 }
 0x235   : > { %3302 = vpow2.f32 %v1302_v47 }
 0x236   : > { %2345 = vst.msk [vmem:[#allocation2 + $0xe8] sm:$0xff] %vm358_vm2, %v4526_v10  ;;  %1501 = vperm.xlu0 %3288, %v4526_v10   ;;  %v4556_v17 = vpop.eup %3290  ;;  %3304 = vpow2.f32 %v1304_v38  ;;  %v1318_v38 = vmul.f32 1.442695, %v5289_v42 }
 0x237   : > { %v1222_v14 = vpop.xlane.xlu0 %1221  ;;  %3306 = vpow2.f32 %v1306_v11 }
 0x238   : > { %v4540_v41 = vmax.f32 %v4528_v3, %v1222_v14  ;;  %v1312_v14 = vmul.f32 1.442695, %v5286_v20  ;;  %3308 = vpow2.f32 %v1308_v35 }
 0x239   : > { %3310 = vpow2.f32 %v1310_v0 }
 0x23a   : > { %2346 = vst.msk [vmem:[#allocation2 + $0xf0] sm:$0xff] %vm358_vm2, %v4540_v41  ;;  %1506 = vperm.xlu1 %3289, %v4540_v41   ;;  %v4573_v9 = vpop.eup %3292  ;;  %3312 = vpow2.f32 %v1312_v14 }
 0x23b   : > { %v1225_v29 = vpop.xlane.xlu1 %1224  ;;  %v4578_v32 = vpop.eup %3294 }
 0x23c   : > { %v4554_v4 = vmax.f32 %v4542_v52, %v1225_v29  ;;  %v4587_v46 = vpop.eup %3296 }
 0x23d   : > { %v4592_v23 = vpop.eup %3298 }
 0x23e   : > { %2347 = vst.msk [vmem:[#allocation2 + $0xf8] sm:$0xff] %vm358_vm2, %v4554_v4  ;;  %1873 = vperm.xlu1 %3289, %v4556_v17   ;;  %1511 = vperm.xlu0 %3288, %v4554_v4   ;;  %v4601_v40 = vpop.eup %3300 }
 0x23f   : > { %v4606_v44 = vpop.eup %3302 }
 0x240   : > { %v4615_v34 = vpop.eup %3304 }
 0x241   : > { %v1357_v8 = vpop.permute.xlu0 %1356  ;;  %v4617_v36 = vpop.eup %3306 }
 0x242   : > { %v1514_v61 = vsub.f32 %v3828_v49, %v1357_v8  ;;  %v1515_v51 = vsub.f32 %v3830_v50, %v1357_v8  ;;  %1878 = vperm.xlu1 %3289, %v4578_v32   ;;  %1868 = vperm.xlu0 %3288, %v4573_v9   ;;  %v5288_v49 = vsub.f32 %v4359_v39, %v4367_v37  ;;  %v4622_v20 = vpop.eup %3308 }
 0x243   : > { %v4627_v8 = vpop.eup %3310 }
 0x244   : > { %v1578_v43 = vmul.f32 1.442695, %v1514_v61  ;;  %v1580_v45 = vmul.f32 1.442695, %v1515_v51  ;;  %v1316_v50 = vmul.f32 1.442695, %v5288_v49 }
 0x245   : > { %v1362_v47 = vpop.permute.xlu1 %1361 }
 0x246   : > { %3314 = vpow2.f32 %v1578_v43  ;;  %v1516_v29 = vsub.f32 %v3866_v53, %v1362_v47  ;;  %v1517_v7 = vsub.f32 %v3868_v54, %v1362_v47  ;;  %1888 = vperm.xlu1 %3289, %v4592_v23   ;;  %1883 = vperm.xlu0 %3288, %v4587_v46   ;;  %v5290_v53 = vsub.f32 %v4379_v33, %v4387_v31 }
 0x247   : > { %3316 = vpow2.f32 %v1580_v45  ;;  %v5291_v31 = vsub.f32 %v4389_v30, %v4397_v28  ;;  %v4633_v28 = vpop.eup %3312 }
 0x248   : > { %3318 = vpow2.f32 %v1314_v55  ;;  %v1582_v37 = vmul.f32 1.442695, %v1516_v29  ;;  %v1584_v39 = vmul.f32 1.442695, %v1517_v7  ;;  %v1320_v54 = vmul.f32 1.442695, %v5290_v53 }
 0x249   : > { %3320 = vpow2.f32 %v1316_v50  ;;  %v1367_v11 = vpop.permute.xlu1 %1366  ;;  %v1322_v33 = vmul.f32 1.442695, %v5291_v31  ;;  %v5298_v31 = vld [vmem:[#allocation58_spill] sm:$0xff] }
 0x24a   : > { %3322 = vpow2.f32 %v1582_v37  ;;  %v1518_v1 = vsub.f32 %v3872_v56, %v1367_v11  ;;  %v1519_v35 = vsub.f32 %v3874_v57, %v1367_v11  ;;  %1898 = vperm.xlu1 %3289, %v4606_v44   ;;  %1893 = vperm.xlu0 %3288, %v4601_v40   ;;  %v5292_v56 = vsub.f32 %v4399_v27, %v4407_v25 }
 0x24b   : > { %3324 = vpow2.f32 %v1584_v39  ;;  %v5293_v25 = vsub.f32 %v4409_v24, %v4417_v22 }
 0x24c   : > { %3326 = vpow2.f32 %v1318_v38  ;;  %v1586_v58 = vmul.f32 1.442695, %v1518_v1  ;;  %v1588_v0 = vmul.f32 1.442695, %v1519_v35  ;;  %v1324_v57 = vmul.f32 1.442695, %v5292_v56 }
 0x24d   : > { %3328 = vpow2.f32 %v1320_v54  ;;  %v1372_v14 = vpop.permute.xlu1 %1371  ;;  %v1326_v27 = vmul.f32 1.442695, %v5293_v25  ;;  %v5297_v54 = vld [vmem:[#allocation5_spill] sm:$0xff]  ;;  %v5302_v56 = vld [vmem:[#allocation62_spill] sm:$0xff]  ;;  %v5304_v25 = vld [vmem:[#allocation7_spill] sm:$0xff] }
 0x24e   : > { %3330 = vpow2.f32 %v1586_v58  ;;  %v1520_v61 = vsub.f32 %v3878_v59, %v1372_v14  ;;  %v1521_v51 = vsub.f32 %v3880_v60, %v1372_v14  ;;  %1908 = vperm.xlu1 %3289, %v4617_v36   ;;  %1903 = vperm.xlu0 %3288, %v4615_v34   ;;  %v5294_v59 = vsub.f32 %v4419_v21, %v4427_v19 }
 0x24f   : > { %3332 = vpow2.f32 %v1588_v0  ;;  %v5295_v21 = vsub.f32 %v4429_v18, %v4437_v16  ;;  %v5301_v0 = vld [vmem:[#allocation63_spill] sm:$0xff] }
 0x250   : > { %v3315_v30 = vpop.eup %3314  ;;  %3334 = vpow2.f32 %v1322_v33  ;;  %v1590_v48 = vmul.f32 1.442695, %v1520_v61  ;;  %v1592_v55 = vmul.f32 1.442695, %v1521_v51  ;;  %v1328_v60 = vmul.f32 1.442695, %v5294_v59 }
 0x251   : > { %v3317_v43 = vpop.eup %3316  ;;  %3336 = vpow2.f32 %v1324_v57  ;;  %v1377_v45 = vpop.permute.xlu1 %1376  ;;  %v1330_v29 = vmul.f32 1.442695, %v5295_v21  ;;  %v1282_v57 = vsub.f32 %v5302_v56, %v5301_v0  ;;  %v5303_v51 = vld [vmem:[#allocation6_spill] sm:$0xff]  ;;  %v5305_v59 = vld [vmem:[#allocation60_spill] sm:$0xff] }
 0x252   : > { %v4641_v49 = vpop.eup %3318  ;;  %3338 = vpow2.f32 %v1590_v48  ;;  %2122 = vmatprep.mubr.f32.mxu1 %v3317_v43  ;;  %v1522_v50 = vsub.f32 %v3884_v62, %v1377_v45  ;;  %v1523_v47 = vsub.f32 %v3886_v63, %v1377_v45  ;;  %1918 = vperm.xlu1 %3289, %v4627_v8   ;;  %v4646_v22 = vadd.f32 %v3317_v43, %v3315_v30 }
 0x253   : > { %v4648_v24 = vpop.eup %3320  ;;  %3340 = vpow2.f32 %v1592_v55  ;;  %2123 = vmatmul.mubr.f32.vlgmr.msra.gmra.mrb[0].mxu1 %v3315_v30  ;;  %1913 = vperm.xlu0 %3288, %v4622_v20   ;;  %v5296_v63 = vsub.f32 %v4439_v15, %v4447_v13 }
 0x254   : > { %v3323_v19 = vpop.eup %3322  ;;  %3342 = vpow2.f32 %v1326_v27  ;;  %v1594_v7 = vmul.f32 1.442695, %v1522_v50  ;;  %v1596_v62 = vmul.f32 1.442695, %v1523_v47  ;;  %v5308_v47 = vld [vmem:[#allocation65_spill] sm:$0xff] }
 0x255   : > { %v3325_v42 = vpop.eup %3324  ;;  %3344 = vpow2.f32 %v1328_v60  ;;  %v1332_v38 = vmul.f32 1.442695, %v5296_v63  ;;  %v1382_v37 = vpop.permute.xlu1 %1381  ;;  %v5306_v60 = vld [vmem:[#allocation61_spill] sm:$0xff]  ;;  %v5310_v63 = vld [vmem:[#allocation67_spill] sm:$0xff] }
 0x256   : > { %v4657_v39 = vpop.eup %3326  ;;  %3346 = vpow2.f32 %v1594_v7  ;;  %2127 = vmatprep.mubr.f32.mxu1 %v3325_v42  ;;  %v1524_v53 = vsub.f32 %v3890_v2, %v1382_v37  ;;  %v1525_v11 = vsub.f32 %v5297_v54, %v1382_v37  ;;  %1928 = vperm.xlu1 %3289, %v4641_v49   ;;  %v4662_v16 = vadd.f32 %v3325_v42, %v3323_v19  ;;  %v5299_v2 = vld [vmem:[#allocation59_spill] sm:$0xff] }
 0x257   : > { %v4664_v18 = vpop.eup %3328  ;;  %3348 = vpow2.f32 %v1596_v62  ;;  %1923 = vperm.xlu0 %3288, %v4633_v28   ;;  %2128 = vmatmul.mubr.f32.gmra.mrb[2].mxu1 %v3323_v19  ;;  %v5300_v33 = vsub.f32 %v5298_v31, %v5299_v2  ;;  %v5307_v45 = vsub.f32 %v5305_v59, %v5306_v60  ;;  %v5309_v19 = vld [vmem:[#allocation64_spill] sm:$0xff]  ;;  %v1338_v42 = vmul.f32 1.442695, %v1282_v57  ;;  %v5315_v59 = vld [vmem:[#allocation11_spill] sm:$0xff] }
 0x258   : > { %v3331_v13 = vpop.eup %3330  ;;  %3350 = vpow2.f32 %v1330_v29  ;;  %v1598_v15 = vmul.f32 1.442695, %v1524_v53  ;;  %v1600_v1 = vmul.f32 1.442695, %v1525_v11  ;;  %v1283_v21 = vsub.f32 %v5309_v19, %v5308_v47  ;;  %v5312_v11 = vld [vmem:[#allocation8_spill] sm:$0xff] }
 0x259   : > { %v3333_v35 = vpop.eup %3332  ;;  %3352 = vpow2.f32 %v1332_v38  ;;  %v1334_v58 = vmul.f32 1.442695, %v5300_v33  ;;  %v1387_v14 = vpop.permute.xlu1 %1386  ;;  %v1336_v50 = vmul.f32 1.442695, %v5307_v45  ;;  %v5311_v38 = vld [vmem:[#allocation66_spill] sm:$0xff] }
 0x25a   : > { %v4672_v61 = vpop.eup %3334  ;;  %3354 = vpow2.f32 %v1598_v15  ;;  %2132 = vmatprep.mubr.f32.mxu1 %v3333_v35  ;;  %v1526_v30 = vsub.f32 %v5303_v51, %v1387_v14  ;;  %v1527_v27 = vsub.f32 %v5304_v25, %v1387_v14  ;;  %1938 = vperm.xlu1 %3289, %v4657_v39   ;;  %v4677_v48 = vadd.f32 %v3333_v35, %v3331_v13  ;;  %v5313_v15 = vld [vmem:[#allocation9_spill] sm:$0xff]  ;;  %v5314_v25 = vld [vmem:[#allocation10_spill] sm:$0xff] }
 0x25b   : > { %v4679_v55 = vpop.eup %3336  ;;  %3356 = vpow2.f32 %v1600_v1  ;;  %1933 = vperm.xlu0 %3288, %v4648_v24   ;;  %2133 = vmatmul.mubr.f32.gmra.mrb[4].mxu1 %v3331_v13  ;;  %v1284_v37 = vsub.f32 %v5311_v38, %v5310_v63  ;;  %v1340_v33 = vmul.f32 1.442695, %v1283_v21  ;;  %v1286_v14 = vsub.f32 %v4503_v5, %v4512_v12  ;;  %v5316_v12 = vld [vmem:[#allocation69_spill] sm:$0xff]  ;;  %v5318_v63 = vld [vmem:[#allocation12_spill] sm:$0xff] }
 0x25c   : > { %v3339_v43 = vpop.eup %3338  ;;  %v1602_v29 = vmul.f32 1.442695, %v1526_v30  ;;  %v1604_v7 = vmul.f32 1.442695, %v1527_v27  ;;  %3358 = vpow2.f32 %v1334_v58 }
 0x25d   : > { %v3341_v62 = vpop.eup %3340  ;;  %v1392_v53 = vpop.permute.xlu1 %1391  ;;  %v1342_v57 = vmul.f32 1.442695, %v1284_v37  ;;  %v5319_v37 = vld [vmem:[#allocation13_spill] sm:$0xff] }
 0x25e   : > { %v4689_v54 = vpop.eup %3342  ;;  %3360 = vpow2.f32 %v1602_v29  ;;  %2137 = vmatprep.mubr.f32.mxu1 %v3341_v62  ;;  %v1528_v13 = vsub.f32 %v5312_v11, %v1392_v53  ;;  %v1529_v1 = vsub.f32 %v5313_v15, %v1392_v53  ;;  %1948 = vperm.xlu1 %3289, %v4672_v61   ;;  %v4694_v35 = vadd.f32 %v3341_v62, %v3339_v43 }
 0x25f   : > { %v4696_v31 = vpop.eup %3344  ;;  %3362 = vpow2.f32 %v1604_v7  ;;  %1943 = vperm.xlu0 %3288, %v4664_v18   ;;  %2138 = vmatmul.mubr.f32.gmra.mrb[6].mxu1 %v3339_v43  ;;  %v1346_v7 = vmul.f32 1.442695, %v1286_v14  ;;  %v1288_v62 = vsub.f32 %v4528_v3, %v4540_v41  ;;  %v1287_v3 = vsub.f32 %v4514_v6, %v4526_v10 }
 0x260   : > { %v3347_v2 = vpop.eup %3346  ;;  %3364 = vpow2.f32 %v1336_v50  ;;  %v1606_v58 = vmul.f32 1.442695, %v1528_v13  ;;  %v1608_v0 = vmul.f32 1.442695, %v1529_v1  ;;  %v5317_v50 = vld [vmem:[#allocation68_spill] sm:$0xff] }
 0x261   : > { %v3349_v56 = vpop.eup %3348  ;;  %3366 = vpow2.f32 %v1338_v42  ;;  %v1397_v51 = vpop.permute.xlu1 %1396  ;;  %v1285_v47 = vsub.f32 %v5317_v50, %v5316_v12  ;;  %v1348_v10 = vmul.f32 1.442695, %v1287_v3 }
 0x262   : > { %v4701_v30 = vpop.eup %3350  ;;  %3368 = vpow2.f32 %v1606_v58  ;;  %2142 = vmatprep.mubr.f32.mxu1 %v3349_v56  ;;  %v1530_v27 = vsub.f32 %v5314_v25, %v1397_v51  ;;  %v1531_v43 = vsub.f32 %v5315_v59, %v1397_v51  ;;  %1958 = vperm.xlu1 %3289, %v4689_v54   ;;  %v4706_v60 = vadd.f32 %v3349_v56, %v3347_v2  ;;  %v5321_v51 = vld [vmem:[#allocation15_spill] sm:$0xff] }
 0x263   : > { %v4708_v45 = vpop.eup %3352  ;;  %3370 = vpow2.f32 %v1608_v0  ;;  %1953 = vperm.xlu0 %3288, %v4679_v55   ;;  %2143 = vmatmul.mubr.f32.gmra.mrb[8].mxu1 %v3347_v2  ;;  %v1344_v1 = vmul.f32 1.442695, %v1285_v47  ;;  %v1350_v58 = vmul.f32 1.442695, %v1288_v62 }
 0x264   : > { %v3355_v5 = vpop.eup %3354  ;;  %3372 = vpow2.f32 %v1340_v33  ;;  %v1610_v19 = vmul.f32 1.442695, %v1530_v27  ;;  %v1612_v21 = vmul.f32 1.442695, %v1531_v43 }
 0x265   : > { %v3357_v29 = vpop.eup %3356  ;;  %3374 = vpow2.f32 %v1342_v57  ;;  %v1402_v42 = vpop.permute.xlu0 %1401  ;;  %v5320_v57 = vld [vmem:[#allocation14_spill] sm:$0xff] }
 0x266   : > { %3376 = vpow2.f32 %v1610_v19  ;;  %v1532_v38 = vsub.f32 %v5318_v63, %v1402_v42  ;;  %v1533_v53 = vsub.f32 %v5319_v37, %v1402_v42  ;;  %2147 = vmatprep.mubr.f32.mxu1 %v3357_v29  ;;  %1968 = vperm.xlu1 %3289, %v4701_v30   ;;  %v4718_v11 = vadd.f32 %v3357_v29, %v3355_v5  ;;  %v4720_v13 = vpop.eup %3358  ;;  %v5323_v19 = vld [vmem:[#allocation16_spill] sm:$0xff]  ;;  %v5324_v29 = vld [vmem:[#allocation17_spill] sm:$0xff] }
 0x267   : > { %3378 = vpow2.f32 %v1612_v21  ;;  %1963 = vperm.xlu0 %3288, %v4696_v31   ;;  %2148 = vmatmul.mubr.f32.gmra.mrb[10].mxu1 %v3355_v5 }
 0x268   : > { %v3361_v15 = vpop.eup %3360  ;;  %v1614_v41 = vmul.f32 1.442695, %v1532_v38  ;;  %v1616_v2 = vmul.f32 1.442695, %v1533_v53  ;;  %3380 = vpow2.f32 %v1346_v7 }
 0x269   : > { %v3363_v33 = vpop.eup %3362  ;;  %v1407_v0 = vpop.permute.xlu1 %1406 }
 0x26a   : > { %v4725_v56 = vpop.eup %3364  ;;  %3382 = vpow2.f32 %v1614_v41  ;;  %2152 = vmatprep.mubr.f32.mxu1 %v3363_v33  ;;  %v1534_v14 = vsub.f32 %v5320_v57, %v1407_v0  ;;  %v1535_v25 = vsub.f32 %v5321_v51, %v1407_v0  ;;  %1978 = vperm.xlu1 %3289, %v4720_v13   ;;  %v4730_v27 = vadd.f32 %v3363_v33, %v3361_v15  ;;  %v5326_v41 = vld [vmem:[#allocation19_spill] sm:$0xff] }
 0x26b   : > { %v4732_v59 = vpop.eup %3366  ;;  %3384 = vpow2.f32 %v1616_v2  ;;  %1973 = vperm.xlu0 %3288, %v4708_v45   ;;  %2153 = vmatmul.mubr.f32.gmra.mrb[12].mxu1 %v3361_v15 }
 0x26c   : > { %v3369_v6 = vpop.eup %3368  ;;  %3386 = vpow2.f32 %v1344_v1  ;;  %v1618_v43 = vmul.f32 1.442695, %v1534_v14  ;;  %v1620_v5 = vmul.f32 1.442695, %v1535_v25  ;;  %v5325_v1 = vld [vmem:[#allocation18_spill] sm:$0xff] }
 0x26d   : > { %v3371_v12 = vpop.eup %3370  ;;  %3388 = vpow2.f32 %v1350_v58  ;;  %v1412_v50 = vpop.permute.xlu0 %1411 }
 0x26e   : > { %v4735_v47 = vpop.eup %3372  ;;  %3390 = vpow2.f32 %v1618_v43  ;;  %v1536_v21 = vsub.f32 %v5323_v19, %v1412_v50  ;;  %v1537_v7 = vsub.f32 %v5324_v29, %v1412_v50  ;;  %2157 = vmatprep.mubr.f32.mxu1 %v3371_v12  ;;  %1988 = vperm.xlu1 %3289, %v4732_v59   ;;  %v4740_v62 = vadd.f32 %v3371_v12, %v3369_v6 }
 0x26f   : > { %5322 = vst [vmem:[#allocation5_spill] sm:$0xff] %v4735_v47  ;;  %v4742_v42 = vpop.eup %3374  ;;  %3392 = vpow2.f32 %v1620_v5  ;;  %1983 = vperm.xlu0 %3288, %v4725_v56   ;;  %2158 = vmatmul.mubr.f32.gmra.mrb[14].mxu1 %v3369_v6  ;;  %v5330_v5 = vld [vmem:[#allocation21_spill] sm:$0xff] }
 0x270   : > { %v3377_v63 = vpop.eup %3376  ;;  %3394 = vpow2.f32 %v1348_v10  ;;  %v1622_v38 = vmul.f32 1.442695, %v1536_v21  ;;  %v1624_v37 = vmul.f32 1.442695, %v1537_v7  ;;  %v5329_v10 = vld [vmem:[#allocation20_spill] sm:$0xff] }
 0x271   : > { %v3379_v53 = vpop.eup %3378  ;;  %v1417_v15 = vpop.permute.xlu1 %1416 }
 0x272   : > { %3396 = vpow2.f32 %v1622_v38  ;;  %2162 = vmatprep.mubr.f32.mxu1 %v3379_v53  ;;  %v1538_v3 = vsub.f32 %v5325_v1, %v1417_v15  ;;  %v1539_v2 = vsub.f32 %v5326_v41, %v1417_v15  ;;  %1998 = vperm.xlu1 %3289, %v4742_v42   ;;  %v4748_v33 = vadd.f32 %v3379_v53, %v3377_v63  ;;  %v4750_v58 = vpop.eup %3380  ;;  %v5333_v53 = vld [vmem:[#allocation22_spill] sm:$0xff]  ;;  %v5334_v1 = vld [vmem:[#allocation23_spill] sm:$0xff] }
 0x273   : > { %5327 = vst [vmem:[#allocation58_spill] sm:$0xff] %v4750_v58  ;;  %3398 = vpow2.f32 %v1624_v37  ;;  %1993 = vperm.xlu0 %3288, %v4735_v47   ;;  %2163 = vmatmul.mubr.f32.gmra.mrb[16].mxu1 %v3377_v63 }
 0x274   : > { %v3383_v0 = vpop.eup %3382  ;;  %v1626_v57 = vmul.f32 1.442695, %v1538_v3  ;;  %v1628_v14 = vmul.f32 1.442695, %v1539_v2 }
 0x275   : > { %v3385_v51 = vpop.eup %3384  ;;  %v1422_v25 = vpop.permute.xlu0 %1421 }
 0x276   : > { %v4753_v6 = vpop.eup %3386  ;;  %3400 = vpow2.f32 %v1626_v57  ;;  %v1540_v43 = vsub.f32 %v5329_v10, %v1422_v25  ;;  %v1541_v12 = vsub.f32 %v5330_v5, %v1422_v25  ;;  %2167 = vmatprep.mubr.f32.mxu1 %v3385_v51  ;;  %2008 = vperm.xlu1 %3289, %v4750_v58   ;;  %v4758_v50 = vadd.f32 %v3385_v51, %v3383_v0  ;;  %v5335_v25 = vld [vmem:[#allocation24_spill] sm:$0xff] }
 0x277   : > { %5328 = vst [vmem:[#allocation59_spill] sm:$0xff] %v4753_v6  ;;  %v4760_v19 = vpop.eup %3388  ;;  %3402 = vpow2.f32 %v1628_v14  ;;  %2003 = vperm.xlu0 %3288, %v4753_v6   ;;  %2168 = vmatmul.mubr.f32.gmra.mrb[18].mxu1 %v3383_v0 }
 0x278   : > { %5331 = vst [vmem:[#allocation63_spill] sm:$0xff] %v4760_v19  ;;  %v3391_v21 = vpop.eup %3390  ;;  %v1630_v29 = vmul.f32 1.442695, %v1540_v43  ;;  %v1632_v7 = vmul.f32 1.442695, %v1541_v12  ;;  %v5336_v43 = vld [vmem:[#allocation25_spill] sm:$0xff] }
 0x279   : > { %v3393_v63 = vpop.eup %3392  ;;  %v1427_v38 = vpop.permute.xlu1 %1426 }
 0x27a   : > { %v4763_v37 = vpop.eup %3394  ;;  %3404 = vpow2.f32 %v1630_v29  ;;  %2172 = vmatprep.mubr.f32.mxu1 %v3393_v63  ;;  %v1542_v15 = vsub.f32 %v5333_v53, %v1427_v38  ;;  %v1543_v3 = vsub.f32 %v5334_v1, %v1427_v38  ;;  %2018 = vperm.xlu1 %3289, %v4760_v19   ;;  %v4768_v41 = vadd.f32 %v3393_v63, %v3391_v21  ;;  %v5337_v53 = vld [vmem:[#allocation26_spill] sm:$0xff]  ;;  %v5338_v1 = vld [vmem:[#allocation27_spill] sm:$0xff] }
 0x27b   : > { %5332 = vst [vmem:[#allocation62_spill] sm:$0xff] %v4763_v37  ;;  %3406 = vpow2.f32 %v1632_v7  ;;  %2013 = vperm.xlu0 %3288, %v4763_v37   ;;  %2173 = vmatmul.mubr.f32.gmra.mrb[20].mxu1 %v3391_v21 }
 0x27c   : > { %v3397_v2 = vpop.eup %3396  ;;  %v1634_v0 = vmul.f32 1.442695, %v1542_v15  ;;  %v1636_v57 = vmul.f32 1.442695, %v1543_v3 }
 0x27d   : > { %v3399_v14 = vpop.eup %3398  ;;  %v1432_v51 = vpop.permute.xlu0 %1431 }
 0x27e   : > { %3408 = vpow2.f32 %v1634_v0  ;;  %v1544_v10 = vsub.f32 %v5335_v25, %v1432_v51  ;;  %v1545_v5 = vsub.f32 %v5336_v43, %v1432_v51  ;;  %2177 = vmatprep.mubr.f32.mxu1 %v3399_v14  ;;  %v4773_v12 = vadd.f32 %v3399_v14, %v3397_v2 }
 0x27f   : > { %3410 = vpow2.f32 %v1636_v57  ;;  %2178 = vmatmul.mubr.f32.gmra.mrb[22].mxu1 %v3397_v2 }
 0x280   : > { %v3401_v29 = vpop.eup %3400  ;;  %v1638_v7 = vmul.f32 1.442695, %v1544_v10  ;;  %v1640_v63 = vmul.f32 1.442695, %v1545_v5  ;;  %v5339_v10 = vld [vmem:[#allocation28_spill] sm:$0xff]  ;;  %v5340_v5 = vld [vmem:[#allocation29_spill] sm:$0xff] }
 0x281   : > { %v3403_v38 = vpop.eup %3402  ;;  %v1437_v21 = vpop.permute.xlu1 %1436 }
 0x282   : > { %3412 = vpow2.f32 %v1638_v7  ;;  %2182 = vmatprep.mubr.f32.mxu1 %v3403_v38  ;;  %v1546_v15 = vsub.f32 %v5337_v53, %v1437_v21  ;;  %v1547_v3 = vsub.f32 %v5338_v1, %v1437_v21  ;;  %v4777_v0 = vadd.f32 %v3403_v38, %v3401_v29 }
 0x283   : > { %3414 = vpow2.f32 %v1640_v63  ;;  %2183 = vmatmul.mubr.f32.gmra.mrb[24].mxu1 %v3401_v29 }
 0x284   : > { %v3405_v51 = vpop.eup %3404  ;;  %v1642_v14 = vmul.f32 1.442695, %v1546_v15  ;;  %v1644_v25 = vmul.f32 1.442695, %v1547_v3  ;;  %v5341_v15 = vld [vmem:[#allocation30_spill] sm:$0xff]  ;;  %v5342_v3 = vld [vmem:[#allocation31_spill] sm:$0xff] }
 0x285   : > { %v3407_v57 = vpop.eup %3406  ;;  %v1442_v2 = vpop.permute.xlu0 %1441 }
 0x286   : > { %3416 = vpow2.f32 %v1642_v14  ;;  %v1548_v43 = vsub.f32 %v5339_v10, %v1442_v2  ;;  %v1549_v26 = vsub.f32 %v5340_v5, %v1442_v2  ;;  %2187 = vmatprep.mubr.f32.mxu1 %v3407_v57  ;;  %v4781_v7 = vadd.f32 %v3407_v57, %v3405_v51  ;;  %v5344_v5 = vld [vmem:[#allocation33_spill] sm:$0xff] }
 0x287   : > { %3418 = vpow2.f32 %v1644_v25  ;;  %2188 = vmatmul.mubr.f32.gmra.mrb[26].mxu1 %v3405_v51 }
 0x288   : > { %v3409_v21 = vpop.eup %3408  ;;  %v1646_v38 = vmul.f32 1.442695, %v1548_v43  ;;  %v1648_v53 = vmul.f32 1.442695, %v1549_v26  ;;  %v5343_v43 = vld [vmem:[#allocation32_spill] sm:$0xff] }
 0x289   : > { %v3411_v63 = vpop.eup %3410  ;;  %v1447_v29 = vpop.permute.xlu1 %1446 }
 0x28a   : > { %3420 = vpow2.f32 %v1646_v38  ;;  %2192 = vmatprep.mubr.f32.mxu1 %v3411_v63  ;;  %v1550_v1 = vsub.f32 %v5341_v15, %v1447_v29  ;;  %v1551_v14 = vsub.f32 %v5342_v3, %v1447_v29  ;;  %v4785_v37 = vadd.f32 %v3411_v63, %v3409_v21 }
 0x28b   : > { %3422 = vpow2.f32 %v1648_v53  ;;  %2193 = vmatmul.mubr.f32.gmra.mrb[28].mxu1 %v3409_v21 }
 0x28c   : > { %v3413_v2 = vpop.eup %3412  ;;  %v1650_v57 = vmul.f32 1.442695, %v1550_v1  ;;  %v1652_v10 = vmul.f32 1.442695, %v1551_v14  ;;  %v5345_v1 = vld [vmem:[#allocation34_spill] sm:$0xff]  ;;  %v5346_v14 = vld [vmem:[#allocation35_spill] sm:$0xff] }
 0x28d   : > { %v3415_v25 = vpop.eup %3414  ;;  %v1452_v51 = vpop.permute.xlu0 %1451 }
 0x28e   : > { %3424 = vpow2.f32 %v1650_v57  ;;  %v1552_v26 = vsub.f32 %v5343_v43, %v1452_v51  ;;  %v1553_v19 = vsub.f32 %v5344_v5, %v1452_v51  ;;  %2197 = vmatprep.mubr.f32.mxu1 %v3415_v25  ;;  %v4789_v38 = vadd.f32 %v3415_v25, %v3413_v2  ;;  %v5348_v5 = vld [vmem:[#allocation37_spill] sm:$0xff] }
 0x28f   : > { %3426 = vpow2.f32 %v1652_v10  ;;  %2198 = vmatmul.mubr.f32.gmra.mrb[30].mxu1 %v3413_v2 }
 0x290   : > { %v3417_v29 = vpop.eup %3416  ;;  %v1654_v63 = vmul.f32 1.442695, %v1552_v26  ;;  %v1656_v15 = vmul.f32 1.442695, %v1553_v19  ;;  %v5347_v26 = vld [vmem:[#allocation36_spill] sm:$0xff] }
 0x291   : > { %v3419_v53 = vpop.eup %3418  ;;  %v1457_v21 = vpop.permute.xlu1 %1456 }
 0x292   : > { %3428 = vpow2.f32 %v1654_v63  ;;  %2202 = vmatprep.mubr.f32.mxu1 %v3419_v53  ;;  %v1554_v3 = vsub.f32 %v5345_v1, %v1457_v21  ;;  %v1555_v57 = vsub.f32 %v5346_v14, %v1457_v21  ;;  %v4793_v6 = vadd.f32 %v3419_v53, %v3417_v29 }
 0x293   : > { %3430 = vpow2.f32 %v1656_v15  ;;  %2203 = vmatmul.mubr.f32.gmra.mrb[32].mxu1 %v3417_v29 }
 0x294   : > { %v3421_v51 = vpop.eup %3420  ;;  %v1658_v25 = vmul.f32 1.442695, %v1554_v3  ;;  %v1660_v43 = vmul.f32 1.442695, %v1555_v57  ;;  %v5349_v3 = vld [vmem:[#allocation38_spill] sm:$0xff]  ;;  %v5350_v57 = vld [vmem:[#allocation39_spill] sm:$0xff] }
 0x295   : > { %v3423_v10 = vpop.eup %3422  ;;  %v1462_v2 = vpop.permute.xlu0 %1461 }
 0x296   : > { %3432 = vpow2.f32 %v1658_v25  ;;  %v1556_v19 = vsub.f32 %v5347_v26, %v1462_v2  ;;  %v1557_v58 = vsub.f32 %v5348_v5, %v1462_v2  ;;  %2207 = vmatprep.mubr.f32.mxu1 %v3423_v10  ;;  %v4797_v63 = vadd.f32 %v3423_v10, %v3421_v51 }
 0x297   : > { %3434 = vpow2.f32 %v1660_v43  ;;  %2208 = vmatmul.mubr.f32.gmra.mrb[34].mxu1 %v3421_v51 }
 0x298   : > { %v3425_v21 = vpop.eup %3424  ;;  %v1662_v53 = vmul.f32 1.442695, %v1556_v19  ;;  %v1664_v1 = vmul.f32 1.442695, %v1557_v58  ;;  %v5351_v58 = vld [vmem:[#allocation40_spill] sm:$0xff] }
 0x299   : > { %v3427_v15 = vpop.eup %3426  ;;  %v1467_v29 = vpop.permute.xlu1 %1466 }
 0x29a   : > { %3436 = vpow2.f32 %v1662_v53  ;;  %1742 = vadd.xlane.f32.xlu0 %v4662_v16  ;;  %2212 = vmatprep.mubr.f32.mxu1 %v3427_v15  ;;  %v1558_v14 = vsub.f32 %v5349_v3, %v1467_v29  ;;  %v1559_v25 = vsub.f32 %v5350_v57, %v1467_v29  ;;  %v4802_v26 = vadd.f32 %v3427_v15, %v3425_v21  ;;  %v5352_v53 = vld [vmem:[#allocation41_spill] sm:$0xff] }
 0x29b   : > { %3438 = vpow2.f32 %v1664_v1  ;;  %2213 = vmatmul.mubr.f32.gmra.mrb[36].mxu1 %v3425_v21 }
 0x29c   : > { %v3429_v10 = vpop.eup %3428  ;;  %v1666_v43 = vmul.f32 1.442695, %v1558_v14  ;;  %v1668_v51 = vmul.f32 1.442695, %v1559_v25  ;;  %v5353_v14 = vld [vmem:[#allocation42_spill] sm:$0xff]  ;;  %v5354_v25 = vld [vmem:[#allocation43_spill] sm:$0xff] }
 0x29d   : > { %v3431_v2 = vpop.eup %3430  ;;  %v1472_v19 = vpop.permute.xlu0 %1471 }
 0x29e   : > { %3440 = vpow2.f32 %v1666_v43  ;;  %v1560_v5 = vsub.f32 %v5351_v58, %v1472_v19  ;;  %v1561_v47 = vsub.f32 %v5352_v53, %v1472_v19  ;;  %1745 = vadd.xlane.f32.xlu0 %v4677_v48  ;;  %2217 = vmatprep.mubr.f32.mxu1 %v3431_v2  ;;  %v4807_v16 = vadd.f32 %v3431_v2, %v3429_v10  ;;  %v5355_v19 = vld [vmem:[#allocation44_spill] sm:$0xff] }
 0x29f   : > { %3442 = vpow2.f32 %v1668_v51  ;;  %1739 = vadd.xlane.f32.xlu1 %v4646_v22  ;;  %2218 = vmatmul.mubr.f32.gmra.mrb[38].mxu1 %v3429_v10 }
 0x2a0   : > { %v3433_v21 = vpop.eup %3432  ;;  %v1670_v1 = vmul.f32 1.442695, %v1560_v5  ;;  %v1672_v15 = vmul.f32 1.442695, %v1561_v47 }
 0x2a1   : > { %v3435_v29 = vpop.eup %3434  ;;  %v1477_v3 = vpop.permute.xlu1 %1476 }
 0x2a2   : > { %3444 = vpow2.f32 %v1670_v1  ;;  %1751 = vadd.xlane.f32.xlu0 %v4706_v60  ;;  %2222 = vmatprep.mubr.f32.mxu1 %v3435_v29  ;;  %v1562_v57 = vsub.f32 %v5353_v14, %v1477_v3  ;;  %v1563_v48 = vsub.f32 %v5354_v25, %v1477_v3  ;;  %v4813_v43 = vadd.f32 %v3435_v29, %v3433_v21  ;;  %v5356_v60 = vld [vmem:[#allocation45_spill] sm:$0xff]  ;;  %v5357_v3 = vld [vmem:[#allocation46_spill] sm:$0xff] }
 0x2a3   : > { %3446 = vpow2.f32 %v1672_v15  ;;  %1748 = vadd.xlane.f32.xlu1 %v4694_v35  ;;  %2223 = vmatmul.mubr.f32.gmra.mrb[40].mxu1 %v3433_v21 }
 0x2a4   : > { %v3437_v22 = vpop.eup %3436  ;;  %v1674_v10 = vmul.f32 1.442695, %v1562_v57  ;;  %v1676_v51 = vmul.f32 1.442695, %v1563_v48  ;;  %v5358_v57 = vld [vmem:[#allocation47_spill] sm:$0xff] }
 0x2a5   : > { %v3439_v47 = vpop.eup %3438  ;;  %v1482_v2 = vpop.permute.xlu0 %1481 }
 0x2a6   : > { %3448 = vpow2.f32 %v1674_v10  ;;  %v1564_v58 = vsub.f32 %v5355_v19, %v1482_v2  ;;  %v1565_v5 = vsub.f32 %v5356_v60, %v1482_v2  ;;  %1757 = vadd.xlane.f32.xlu0 %v4730_v27  ;;  %2227 = vmatprep.mubr.f32.mxu1 %v3439_v47  ;;  %v4819_v53 = vadd.f32 %v3439_v47, %v3437_v22  ;;  %v5359_v47 = vld [vmem:[#allocation48_spill] sm:$0xff] }
 0x2a7   : > { %3450 = vpow2.f32 %v1676_v51  ;;  %1754 = vadd.xlane.f32.xlu1 %v4718_v11  ;;  %2228 = vmatmul.mubr.f32.gmra.mrb[42].mxu1 %v3437_v22 }
 0x2a8   : > { %v3441_v35 = vpop.eup %3440  ;;  %v1678_v21 = vmul.f32 1.442695, %v1564_v58  ;;  %v1680_v1 = vmul.f32 1.442695, %v1565_v5 }
 0x2a9   : > { %v3443_v15 = vpop.eup %3442  ;;  %v1487_v29 = vpop.permute.xlu1 %1486 }
 0x2aa   : > { %3452 = vpow2.f32 %v1678_v21  ;;  %1763 = vadd.xlane.f32.xlu0 %v4748_v33  ;;  %2232 = vmatprep.mubr.f32.mxu1 %v3443_v15  ;;  %v1566_v14 = vsub.f32 %v5357_v3, %v1487_v29  ;;  %v1567_v27 = vsub.f32 %v5358_v57, %v1487_v29  ;;  %v4825_v25 = vadd.f32 %v3443_v15, %v3441_v35  ;;  %v5360_v33 = vld [vmem:[#allocation49_spill] sm:$0xff]  ;;  %v5362_v29 = vld [vmem:[#allocation51_spill] sm:$0xff] }
 0x2ab   : > { %3454 = vpow2.f32 %v1680_v1  ;;  %1760 = vadd.xlane.f32.xlu1 %v4740_v62  ;;  %2233 = vmatmul.mubr.f32.gmra.mrb[44].mxu1 %v3441_v35  ;;  %v5361_v1 = vld [vmem:[#allocation50_spill] sm:$0xff] }
 0x2ac   : > { %v3445_v11 = vpop.eup %3444  ;;  %v1682_v48 = vmul.f32 1.442695, %v1566_v14  ;;  %v1684_v22 = vmul.f32 1.442695, %v1567_v27 }
 0x2ad   : > { %v3447_v10 = vpop.eup %3446  ;;  %v1492_v51 = vpop.permute.xlu0 %1491 }
 0x2ae   : > { %3456 = vpow2.f32 %v1682_v48  ;;  %v1568_v2 = vsub.f32 %v5359_v47, %v1492_v51  ;;  %v1569_v19 = vsub.f32 %v5360_v33, %v1492_v51  ;;  %1769 = vadd.xlane.f32.xlu0 %v4768_v41  ;;  %2237 = vmatprep.mubr.f32.mxu1 %v3447_v10  ;;  %v4831_v58 = vadd.f32 %v3447_v10, %v3445_v11  ;;  %v5363_v48 = vld [vmem:[#allocation52_spill] sm:$0xff] }
 0x2af   : > { %3458 = vpow2.f32 %v1684_v22  ;;  %1766 = vadd.xlane.f32.xlu1 %v4758_v50  ;;  %2238 = vmatmul.mubr.f32.gmra.mrb[46].mxu1 %v3445_v11 }
 0x2b0   : > { %v3449_v62 = vpop.eup %3448  ;;  %v1686_v60 = vmul.f32 1.442695, %v1568_v2  ;;  %v1688_v5 = vmul.f32 1.442695, %v1569_v19 }
 0x2b1   : > { %v3451_v35 = vpop.eup %3450  ;;  %v1497_v21 = vpop.permute.xlu1 %1496 }
 0x2b2   : > { %3460 = vpow2.f32 %v1686_v60  ;;  %1775 = vadd.xlane.f32.xlu0 %v4777_v0  ;;  %2242 = vmatprep.mubr.f32.mxu1 %v3451_v35  ;;  %v1570_v15 = vsub.f32 %v5361_v1, %v1497_v21  ;;  %v1571_v41 = vsub.f32 %v5362_v29, %v1497_v21  ;;  %v4837_v3 = vadd.f32 %v3451_v35, %v3449_v62  ;;  %v5364_v0 = vld [vmem:[#allocation53_spill] sm:$0xff] }
 0x2b3   : > { %3462 = vpow2.f32 %v1688_v5  ;;  %1772 = vadd.xlane.f32.xlu1 %v4773_v12  ;;  %2243 = vmatmul.mubr.f32.gmra.mrb[48].mxu1 %v3449_v62  ;;  %v5365_v62 = vld [vmem:[#allocation54_spill] sm:$0xff]  ;;  %v5366_v5 = vld [vmem:[#allocation55_spill] sm:$0xff] }
 0x2b4   : > { %v3453_v50 = vpop.eup %3452  ;;  %v1690_v14 = vmul.f32 1.442695, %v1570_v15  ;;  %v1692_v57 = vmul.f32 1.442695, %v1571_v41  ;;  %v5367_v41 = vld [vmem:[#allocation56_spill] sm:$0xff] }
 0x2b5   : > { %v3455_v27 = vpop.eup %3454  ;;  %v1502_v11 = vpop.permute.xlu0 %1501 }
 0x2b6   : > { %3464 = vpow2.f32 %v1690_v14  ;;  %v1572_v22 = vsub.f32 %v5363_v48, %v1502_v11  ;;  %v1573_v10 = vsub.f32 %v5364_v0, %v1502_v11  ;;  %1781 = vadd.xlane.f32.xlu0 %v4785_v37  ;;  %2247 = vmatprep.mubr.f32.mxu1 %v3455_v27  ;;  %v4843_v51 = vadd.f32 %v3455_v27, %v3453_v50  ;;  %v5368_v14 = vld [vmem:[#allocation57_spill] sm:$0xff] }
 0x2b7   : > { %3466 = vpow2.f32 %v1692_v57  ;;  %1778 = vadd.xlane.f32.xlu1 %v4781_v7  ;;  %2248 = vmatmul.mubr.f32.gmra.mrb[50].mxu1 %v3453_v50 }
 0x2b8   : > { %v3457_v12 = vpop.eup %3456  ;;  %v1694_v47 = vmul.f32 1.442695, %v1572_v22  ;;  %v1696_v2 = vmul.f32 1.442695, %v1573_v10 }
 0x2b9   : > { %v3459_v33 = vpop.eup %3458  ;;  %v1507_v19 = vpop.permute.xlu1 %1506 }
 0x2ba   : > { %3468 = vpow2.f32 %v1694_v47  ;;  %1787 = vadd.xlane.f32.xlu0 %v4793_v6  ;;  %2252 = vmatprep.mubr.f32.mxu1 %v3459_v33  ;;  %v1574_v60 = vsub.f32 %v5365_v62, %v1507_v19  ;;  %v1575_v37 = vsub.f32 %v5366_v5, %v1507_v19  ;;  %v1816_v35 = vadd.f32 %v3459_v33, %v3457_v12 }
 0x2bb   : > { %3470 = vpow2.f32 %v1696_v2  ;;  %1784 = vadd.xlane.f32.xlu1 %v4789_v38  ;;  %2253 = vmatmul.mubr.f32.gmra.mrb[52].mxu1 %v3457_v12  ;;  %v5369_v62 = vsub.f32 %v4542_v52, %v4554_v4 }
 0x2bc   : > { %v3461_v7 = vpop.eup %3460  ;;  %v1698_v21 = vmul.f32 1.442695, %v1574_v60  ;;  %v1700_v1 = vmul.f32 1.442695, %v1575_v37 }
 0x2bd   : > { %v3463_v15 = vpop.eup %3462  ;;  %v1512_v29 = vpop.permute.xlu0 %1511  ;;  %v1352_v60 = vmul.f32 1.442695, %v5369_v62 }
 0x2be   : > { %3472 = vpow2.f32 %v1698_v21  ;;  %v1576_v50 = vsub.f32 %v5367_v41, %v1512_v29  ;;  %v1577_v6 = vsub.f32 %v5368_v14, %v1512_v29  ;;  %1793 = vadd.xlane.f32.xlu0 %v4802_v26  ;;  %2257 = vmatprep.mubr.f32.mxu1 %v3463_v15  ;;  %v1819_v57 = vadd.f32 %v3463_v15, %v3461_v7  ;;  %v1874_v2 = vpop.permute.xlu1 %1873 }
 0x2bf   : > { %3474 = vpow2.f32 %v1700_v1  ;;  %1790 = vadd.xlane.f32.xlu1 %v4797_v63  ;;  %2258 = vmatmul.mubr.f32.gmra.mrb[54].mxu1 %v3461_v7 }
 0x2c0   : > { %v3465_v38 = vpop.eup %3464  ;;  %v1702_v27 = vmul.f32 1.442695, %v1576_v50  ;;  %v1704_v11 = vmul.f32 1.442695, %v1577_v6 }
 0x2c1   : > { %v3467_v48 = vpop.eup %3466  ;;  %v1869_v33 = vpop.permute.xlu0 %1868 }
 0x2c2   : > { %3476 = vpow2.f32 %v1702_v27  ;;  %1799 = vadd.xlane.f32.xlu0 %v4813_v43  ;;  %2262 = vmatprep.mubr.f32.mxu1 %v3467_v48  ;;  %v1822_v22 = vadd.f32 %v3467_v48, %v3465_v38 }
 0x2c3   : > { %3478 = vpow2.f32 %v1704_v11  ;;  %1796 = vadd.xlane.f32.xlu1 %v4807_v16  ;;  %2263 = vmatmul.mubr.f32.gmra.mrb[56].mxu1 %v3465_v38 }
 0x2c4   : > { %v3469_v26 = vpop.eup %3468  ;;  %3480 = vpow2.f32 %v1352_v60 }
 0x2c5   : > { %v3471_v0 = vpop.eup %3470  ;;  %v4861_v19 = vpop.permute.xlu0 %1883 }
 0x2c6   : > { %1805 = vadd.xlane.f32.xlu0 %v4825_v25  ;;  %2267 = vmatprep.mubr.f32.mxu1 %v3471_v0  ;;  %v1825_v63 = vadd.f32 %v3471_v0, %v3469_v26 }
 0x2c7   : > { %1802 = vadd.xlane.f32.xlu1 %v4819_v53  ;;  %2268 = vmatmul.mubr.f32.gmra.mrb[58].mxu1 %v3469_v26  ;;  %v1879_v53 = vpop.permute.xlu1 %1878 }
 0x2c8   : > { %v3473_v10 = vpop.eup %3472 }
 0x2c9   : > { %v3475_v12 = vpop.eup %3474 }
 0x2ca   : > { %1811 = vadd.xlane.f32.xlu0 %v4837_v3  ;;  %2272 = vmatprep.mubr.f32.mxu1 %v3475_v12  ;;  %v1828_v43 = vadd.f32 %v3475_v12, %v3473_v10 }
 0x2cb   : > { %1808 = vadd.xlane.f32.xlu1 %v4831_v58  ;;  %2273 = vmatmul.mubr.f32.gmra.mrb[60].mxu1 %v3473_v10  ;;  %v4863_v3 = vpop.permute.xlu1 %1888  ;;  %v4865_v58 = vpop.permute.xlu0 %1893 }
 0x2cc   : > { %v3477_v16 = vpop.eup %3476 }
 0x2cd   : > { %v3479_v47 = vpop.eup %3478 }
 0x2ce   : > { %1817 = vadd.xlane.f32.xlu0 %v1816_v35  ;;  %2277 = vmatprep.mubr.f32.mxu1 %v3479_v47  ;;  %v1831_v25 = vadd.f32 %v3479_v47, %v3477_v16  ;;  %v4878_v7 = vpop.eup %3480  ;;  %v585_v47 = vld [vmem:[#allocation4 + $0x8] sm:$0xff] }
 0x2cf   : > { %1814 = vadd.xlane.f32.xlu1 %v4843_v51  ;;  %2278 = vmatmul.mubr.f32.gmra.mrb[62].mxu1 %v3477_v16  ;;  %v4870_v5 = vpop.permute.xlu1 %1898  ;;  %v4872_v51 = vpop.permute.xlu0 %1903 }
 0x2d2   : > { %1823 = vadd.xlane.f32.xlu0 %v1822_v22 }
 0x2d3   : > { %1820 = vadd.xlane.f32.xlu1 %v1819_v57  ;;  %v4874_v37 = vpop.permute.xlu1 %1908  ;;  %v4876_v35 = vpop.permute.xlu0 %1913 }
 0x2d6   : > { %1829 = vadd.xlane.f32.xlu0 %v1828_v43  ;;  %v553_v43 = vld [vmem:[#allocation3 + $0x8] sm:$0xff] }
 0x2d7   : > { %1826 = vadd.xlane.f32.xlu1 %v1825_v63  ;;  %v4880_v21 = vpop.permute.xlu1 %1918  ;;  %v4883_v1 = vpop.permute.xlu0 %1923  ;;  %v584_v63 = vld [vmem:[#allocation4] sm:$0xff]  ;;  %v1707_v62 = vmul.f32 %v4556_v17, %v553_v43 }
 0x2d8   : > { %v2026_v16 = vmul.f32 %v1869_v33, %v584_v63  ;;  %v556_v43 = vld [vmem:[#allocation3 + $0x20] sm:$0xff] }
 0x2db   : > { %1832 = vadd.xlane.f32.xlu1 %v1831_v25  ;;  %v4885_v15 = vpop.permute.xlu1 %1928  ;;  %v4887_v52 = vpop.permute.xlu0 %1933 }
 0x2df   : > { %v4889_v4 = vpop.permute.xlu1 %1938  ;;  %v4891_v29 = vpop.permute.xlu0 %1943 }
 0x2e3   : > { %v4893_v41 = vpop.permute.xlu1 %1948  ;;  %v4895_v50 = vpop.permute.xlu0 %1953 }
 0x2e7   : > { %v4897_v14 = vpop.permute.xlu1 %1958  ;;  %v4899_v6 = vpop.permute.xlu0 %1963 }
 0x2eb   : > { %v4901_v57 = vpop.permute.xlu1 %1968  ;;  %v4903_v38 = vpop.permute.xlu0 %1973 }
 0x2ec   : > { %2023 = vperm.xlu0 %3288, %v4878_v7   ;;  %5370 = vst [vmem:[#allocation6_spill] sm:$0xff] %v4901_v57  ;;  %5371 = vst [vmem:[#allocation7_spill] sm:$0xff] %v4903_v38  ;;  %v552_v38 = vld [vmem:[#allocation3] sm:$0xff] }
 0x2ef   : > { %v4905_v27 = vpop.permute.xlu1 %1978  ;;  %v4907_v11 = vpop.permute.xlu0 %1983 }
 0x2f0   : > { %5372 = vst [vmem:[#allocation60_spill] sm:$0xff] %v4905_v27  ;;  %5373 = vst [vmem:[#allocation61_spill] sm:$0xff] %v4907_v11  ;;  %v554_v27 = vld [vmem:[#allocation3 + $0x10] sm:$0xff] }
 0x2f1   : > { %v1708_v33 = vmul.f32 %v4578_v32, %v554_v27 }
 0x2f3   : > { %v4909_v48 = vpop.permute.xlu1 %1988  ;;  %v4911_v22 = vpop.permute.xlu0 %1993 }
 0x2f4   : > { %5374 = vst [vmem:[#allocation65_spill] sm:$0xff] %v4909_v48  ;;  %5375 = vst [vmem:[#allocation64_spill] sm:$0xff] %v4911_v22 }
 0x2f7   : > { %v4913_v26 = vpop.permute.xlu1 %1998  ;;  %v4915_v0 = vpop.permute.xlu0 %2003 }
 0x2f8   : > { %5376 = vst [vmem:[#allocation67_spill] sm:$0xff] %v4913_v26  ;;  %5377 = vst [vmem:[#allocation66_spill] sm:$0xff] %v4915_v0  ;;  %v2027_v0 = vmul.f32 %v1874_v2, %v585_v47  ;;  %v587_v47 = vld [vmem:[#allocation4 + $0x18] sm:$0xff] }
 0x2fb   : > { %v4917_v10 = vpop.permute.xlu1 %2008  ;;  %v4919_v12 = vpop.permute.xlu0 %2013 }
 0x2fc   : > { %5378 = vst [vmem:[#allocation8_spill] sm:$0xff] %v4917_v10  ;;  %5379 = vst [vmem:[#allocation9_spill] sm:$0xff] %v4919_v12  ;;  %v586_v10 = vld [vmem:[#allocation4 + $0x10] sm:$0xff] }
 0x2ff   : > { %v4922_v22 = vpop.permute.xlu1 %2018 }
 0x300   : > { %5380 = vst [vmem:[#allocation10_spill] sm:$0xff] %v4922_v22  ;;  %v555_v22 = vld [vmem:[#allocation3 + $0x18] sm:$0xff] }
 0x326   : > { %v2124_v25 = vpop.f32.mrb[0].mxu1 }
 0x327   : > { %v2283_v60 = vadd.f32 %v2124_v25, %v2026_v16  ;;  %v2126_v11 = vpop.f32.mrb[1].mxu1  ;;  %v1743_v48 = vpop.xlane.xlu0 %1742 }
 0x328   : > { %v1835_v26 = vadd.f32 %v1743_v48, %v1707_v62  ;;  %v1706_v11 = vmul.f32 %v4573_v9, %v552_v38  ;;  %v2028_v48 = vmul.f32 %v1879_v53, %v586_v10  ;;  %v1710_v62 = vmul.f32 %v4592_v23, %v556_v43  ;;  %v558_v38 = vld [vmem:[#allocation3 + $0x30] sm:$0xff]  ;;  %v557_v53 = vld [vmem:[#allocation3 + $0x28] sm:$0xff] }
 0x329   : > { %2380 = vst.msk [vmem:[#allocation4] sm:$0xff] %vm423_vm0, %v2283_v60  ;;  %v1709_v9 = vmul.f32 %v4587_v46, %v555_v22  ;;  %v2029_v10 = vmul.f32 %v4861_v19, %v587_v47  ;;  %v1711_v43 = vmul.f32 %v4601_v40, %v557_v53  ;;  %v561_v53 = vld [vmem:[#allocation3 + $0x48] sm:$0xff] }
 0x32a   : > { %2349 = vst.msk [vmem:[#allocation3 + $0x8] sm:$0xff] %vm358_vm2, %v1835_v26  ;;  %v2129_v12 = vpop.f32.mrb[2].mxu1 }
 0x32b   : > { %v2284_v63 = vadd.f32 %v2129_v12, %v2027_v0  ;;  %v2131_v57 = vpop.f32.mrb[3].mxu1  ;;  %v1746_v17 = vpop.xlane.xlu0 %1745 }
 0x32c   : > { %v1836_v16 = vadd.f32 %v1746_v17, %v1708_v33  ;;  %v1740_v25 = vpop.xlane.xlu1 %1739  ;;  %v1712_v17 = vmul.f32 %v4606_v44, %v558_v38 }
 0x32d   : > { %2381 = vst.msk [vmem:[#allocation4 + $0x8] sm:$0xff] %vm423_vm0, %v2284_v63  ;;  %v1834_v2 = vadd.f32 %v1740_v25, %v1706_v11  ;;  %v588_v63 = vld [vmem:[#allocation4 + $0x20] sm:$0xff] }
 0x32e   : > { %2350 = vst.msk [vmem:[#allocation3 + $0x10] sm:$0xff] %vm358_vm2, %v1836_v16  ;;  %v2134_v26 = vpop.f32.mrb[4].mxu1  ;;  %v560_v16 = vld [vmem:[#allocation3 + $0x40] sm:$0xff] }
 0x32f   : > { %2348 = vst.msk [vmem:[#allocation3] sm:$0xff] %vm358_vm2, %v1834_v2  ;;  %v2285_v32 = vadd.f32 %v2134_v26, %v2028_v48  ;;  %v2136_v57 = vpop.f32.mrb[5].mxu1  ;;  %v1752_v27 = vpop.xlane.xlu0 %1751  ;;  %v559_v48 = vld [vmem:[#allocation3 + $0x38] sm:$0xff]  ;;  %v2030_v2 = vmul.f32 %v4863_v3, %v588_v63  ;;  %v589_v26 = vld [vmem:[#allocation4 + $0x28] sm:$0xff]  ;;  %v562_v3 = vld [vmem:[#allocation3 + $0x50] sm:$0xff] }
 0x330   : > { %v1838_v0 = vadd.f32 %v1752_v27, %v1710_v62  ;;  %v1749_v12 = vpop.xlane.xlu1 %1748  ;;  %v1713_v38 = vmul.f32 %v4615_v34, %v559_v48 }
 0x331   : > { %v2448_v60 = vld [vmem:[#allocation3 + $0x8] sm:$0xff]  ;;  %2382 = vst.msk [vmem:[#allocation4 + $0x10] sm:$0xff] %vm423_vm0, %v2285_v32  ;;  %v1837_v33 = vadd.f32 %v1749_v12, %v1709_v9  ;;  %v1714_v32 = vmul.f32 %v4617_v36, %v560_v16 }
 0x332   : > { %3482 = vrcp.f32 %v2448_v60  ;;  %2352 = vst.msk [vmem:[#allocation3 + $0x20] sm:$0xff] %vm358_vm2, %v1838_v0  ;;  %v2139_v23 = vpop.f32.mrb[6].mxu1 }
 0x333   : > { %2351 = vst.msk [vmem:[#allocation3 + $0x18] sm:$0xff] %vm358_vm2, %v1837_v33  ;;  %v2286_v46 = vadd.f32 %v2139_v23, %v2029_v10  ;;  %v2141_v22 = vpop.f32.mrb[7].mxu1  ;;  %v1758_v11 = vpop.xlane.xlu0 %1757  ;;  %v2031_v10 = vmul.f32 %v4865_v58, %v589_v26  ;;  %v590_v33 = vld [vmem:[#allocation4 + $0x30] sm:$0xff]  ;;  %v1716_v23 = vmul.f32 %v4627_v8, %v562_v3  ;;  %v1715_v58 = vmul.f32 %v4622_v20, %v561_v53  ;;  %v591_v8 = vld [vmem:[#allocation4 + $0x38] sm:$0xff] }
 0x334   : > { %v1840_v19 = vadd.f32 %v1758_v11, %v1712_v17  ;;  %v1755_v25 = vpop.xlane.xlu1 %1754  ;;  %v564_v11 = vld [vmem:[#allocation3 + $0x60] sm:$0xff]  ;;  %v2032_v48 = vmul.f32 %v4870_v5, %v590_v33 }
 0x335   : > { %2383 = vst.msk [vmem:[#allocation4 + $0x18] sm:$0xff] %vm423_vm0, %v2286_v46  ;;  %v1839_v47 = vadd.f32 %v1755_v25, %v1711_v43  ;;  %v2449_v57 = vld [vmem:[#allocation3 + $0x10] sm:$0xff]  ;;  %v563_v25 = vld [vmem:[#allocation3 + $0x58] sm:$0xff] }
 0x336   : > { %v2447_v62 = vld [vmem:[#allocation3] sm:$0xff]  ;;  %2354 = vst.msk [vmem:[#allocation3 + $0x30] sm:$0xff] %vm358_vm2, %v1840_v19  ;;  %v2144_v44 = vpop.f32.mrb[8].mxu1  ;;  %v1717_v5 = vmul.f32 %v4633_v28, %v563_v25 }
 0x337   : > { %3484 = vrcp.f32 %v2447_v62  ;;  %2353 = vst.msk [vmem:[#allocation3 + $0x28] sm:$0xff] %vm358_vm2, %v1839_v47  ;;  %v2287_v40 = vadd.f32 %v2144_v44, %v2030_v2  ;;  %v2146_v27 = vpop.f32.mrb[9].mxu1  ;;  %v1764_v9 = vpop.xlane.xlu0 %1763  ;;  %v1718_v62 = vmul.f32 %v4641_v49, %v564_v11  ;;  %v592_v49 = vld [vmem:[#allocation4 + $0x40] sm:$0xff] }
 0x338   : > { %v1842_v0 = vadd.f32 %v1764_v9, %v1714_v32  ;;  %v1761_v12 = vpop.xlane.xlu1 %1760  ;;  %3486 = vrcp.f32 %v2449_v57  ;;  %v2034_v11 = vmul.f32 %v4874_v37, %v592_v49 }
 0x339   : > { %2384 = vst.msk [vmem:[#allocation4 + $0x20] sm:$0xff] %vm423_vm0, %v2287_v40  ;;  %v1841_v60 = vadd.f32 %v1761_v12, %v1713_v38  ;;  %v2451_v17 = vld [vmem:[#allocation3 + $0x20] sm:$0xff]  ;;  %v566_v40 = vld [vmem:[#allocation3 + $0x70] sm:$0xff]  ;;  %v565_v38 = vld [vmem:[#allocation3 + $0x68] sm:$0xff] }
 0x33a   : > { %v2450_v36 = vld [vmem:[#allocation3 + $0x18] sm:$0xff]  ;;  %2356 = vst.msk [vmem:[#allocation3 + $0x40] sm:$0xff] %vm358_vm2, %v1842_v0  ;;  %v2149_v63 = vpop.f32.mrb[10].mxu1  ;;  %v2033_v0 = vmul.f32 %v4872_v51, %v591_v8  ;;  %v1719_v51 = vmul.f32 %v4648_v24, %v565_v38 }
 0x33b   : > { %3488 = vrcp.f32 %v2450_v36  ;;  %2355 = vst.msk [vmem:[#allocation3 + $0x38] sm:$0xff] %vm358_vm2, %v1841_v60  ;;  %v2288_v34 = vadd.f32 %v2149_v63, %v2031_v10  ;;  %v2151_v46 = vpop.f32.mrb[11].mxu1  ;;  %v1770_v22 = vpop.xlane.xlu0 %1769  ;;  %v1720_v60 = vmul.f32 %v4657_v39, %v566_v40 }
 0x33c   : > { %v3483_v43 = vpop.eup %3482  ;;  %v1844_v16 = vadd.f32 %v1770_v22, %v1716_v23  ;;  %v1767_v19 = vpop.xlane.xlu1 %1766  ;;  %3490 = vrcp.f32 %v2451_v17  ;;  %v568_v23 = vld [vmem:[#allocation3 + $0x80] sm:$0xff]  ;;  %v567_v22 = vld [vmem:[#allocation3 + $0x78] sm:$0xff] }
 0x33d   : > { %2385 = vst.msk [vmem:[#allocation4 + $0x28] sm:$0xff] %vm423_vm0, %v2288_v34  ;;  %v1843_v2 = vadd.f32 %v1767_v19, %v1715_v58  ;;  %2518 = vperm.xlu0 %3288, %v3483_v43   ;;  %v2453_v20 = vld [vmem:[#allocation3 + $0x30] sm:$0xff]  ;;  %v593_v43 = vld [vmem:[#allocation4 + $0x48] sm:$0xff]  ;;  %v1722_v24 = vmul.f32 %v4672_v61, %v568_v23  ;;  %v1721_v8 = vmul.f32 %v4664_v18, %v567_v22 }
 0x33e   : > { %v2452_v47 = vld [vmem:[#allocation3 + $0x28] sm:$0xff]  ;;  %2358 = vst.msk [vmem:[#allocation3 + $0x50] sm:$0xff] %vm358_vm2, %v1844_v16  ;;  %v2154_v26 = vpop.f32.mrb[12].mxu1  ;;  %v574_v22 = vld [vmem:[#allocation3 + $0xb0] sm:$0xff] }
 0x33f   : > { %3492 = vrcp.f32 %v2452_v47  ;;  %2357 = vst.msk [vmem:[#allocation3 + $0x48] sm:$0xff] %vm358_vm2, %v1843_v2  ;;  %v2289_v44 = vadd.f32 %v2154_v26, %v2032_v48  ;;  %v2156_v32 = vpop.f32.mrb[13].mxu1  ;;  %v1776_v57 = vpop.xlane.xlu0 %1775  ;;  %v570_v47 = vld [vmem:[#allocation3 + $0x90] sm:$0xff] }
 0x340   : > { %v1846_v27 = vadd.f32 %v1776_v57, %v1718_v62  ;;  %v1773_v9 = vpop.xlane.xlu1 %1772  ;;  %3494 = vrcp.f32 %v2453_v20  ;;  %v2035_v57 = vmul.f32 %v4876_v35, %v593_v43  ;;  %v1724_v18 = vmul.f32 %v4689_v54, %v570_v47  ;;  %v573_v43 = vld [vmem:[#allocation3 + $0xa8] sm:$0xff] }
 0x341   : > { %v3485_v3 = vpop.eup %3484  ;;  %2386 = vst.msk [vmem:[#allocation4 + $0x30] sm:$0xff] %vm423_vm0, %v2289_v44  ;;  %v1845_v12 = vadd.f32 %v1773_v9, %v1717_v5  ;;  %v2455_v28 = vld [vmem:[#allocation3 + $0x40] sm:$0xff]  ;;  %v569_v44 = vld [vmem:[#allocation3 + $0x88] sm:$0xff]  ;;  %v594_v5 = vld [vmem:[#allocation4 + $0x50] sm:$0xff]  ;;  %v1727_v47 = vmul.f32 %v4708_v45, %v573_v43 }
 0x342   : > { %v2454_v53 = vld [vmem:[#allocation3 + $0x38] sm:$0xff]  ;;  %2360 = vst.msk [vmem:[#allocation3 + $0x60] sm:$0xff] %vm358_vm2, %v1846_v27  ;;  %v2159_v10 = vpop.f32.mrb[14].mxu1  ;;  %2513 = vperm.xlu1 %3289, %v3485_v3   ;;  %v3487_v17 = vpop.eup %3486 }
 0x343   : > { %3496 = vrcp.f32 %v2454_v53  ;;  %2359 = vst.msk [vmem:[#allocation3 + $0x58] sm:$0xff] %vm358_vm2, %v1845_v12  ;;  %v2290_v33 = vadd.f32 %v2159_v10, %v2033_v0  ;;  %v2161_v36 = vpop.f32.mrb[15].mxu1  ;;  %v1782_v63 = vpop.xlane.xlu0 %1781  ;;  %v1723_v0 = vmul.f32 %v4679_v55, %v569_v44  ;;  %v572_v12 = vld [vmem:[#allocation3 + $0xa0] sm:$0xff] }
 0x344   : > { %v1848_v34 = vadd.f32 %v1782_v63, %v1720_v60  ;;  %v1779_v46 = vpop.xlane.xlu1 %1778  ;;  %3498 = vrcp.f32 %v2455_v28  ;;  %v571_v60 = vld [vmem:[#allocation3 + $0x98] sm:$0xff]  ;;  %v1726_v55 = vmul.f32 %v4701_v30, %v572_v12 }
 0x345   : > { %v3489_v58 = vpop.eup %3488  ;;  %2387 = vst.msk [vmem:[#allocation4 + $0x38] sm:$0xff] %vm423_vm0, %v2290_v33  ;;  %v1847_v39 = vadd.f32 %v1779_v46, %v1719_v51  ;;  %v2457_v25 = vld [vmem:[#allocation3 + $0x50] sm:$0xff]  ;;  %v2036_v33 = vmul.f32 %v4880_v21, %v594_v5  ;;  %v595_v36 = vld [vmem:[#allocation4 + $0x58] sm:$0xff]  ;;  %v1725_v46 = vmul.f32 %v4696_v31, %v571_v60  ;;  %v1728_v31 = vmul.f32 %v4720_v13, %v574_v22  ;;  %v597_v5 = vld [vmem:[#allocation4 + $0x68] sm:$0xff] }
 0x346   : > { %v2456_v16 = vld [vmem:[#allocation3 + $0x48] sm:$0xff]  ;;  %2362 = vst.msk [vmem:[#allocation3 + $0x70] sm:$0xff] %vm358_vm2, %v1848_v34  ;;  %v2164_v19 = vpop.f32.mrb[16].mxu1  ;;  %2523 = vperm.xlu1 %3289, %v3487_v17   ;;  %2528 = vperm.xlu0 %3288, %v3489_v58   ;;  %v3491_v26 = vpop.eup %3490  ;;  %v2039_v60 = vmul.f32 %v4887_v52, %v597_v5  ;;  %v579_v22 = vld [vmem:[#allocation3 + $0xd8] sm:$0xff] }
 0x347   : > { %3500 = vrcp.f32 %v2456_v16  ;;  %2361 = vst.msk [vmem:[#allocation3 + $0x68] sm:$0xff] %vm358_vm2, %v1847_v39  ;;  %v2291_v48 = vadd.f32 %v2164_v19, %v2034_v11  ;;  %v2166_v2 = vpop.f32.mrb[17].mxu1  ;;  %v1788_v37 = vpop.xlane.xlu0 %1787  ;;  %v2037_v19 = vmul.f32 %v4883_v1, %v595_v36 }
 0x348   : > { %v1850_v62 = vadd.f32 %v1788_v37, %v1722_v24  ;;  %v1785_v20 = vpop.xlane.xlu1 %1784  ;;  %3502 = vrcp.f32 %v2457_v25  ;;  %v596_v24 = vld [vmem:[#allocation4 + $0x60] sm:$0xff] }
 0x349   : > { %v3493_v32 = vpop.eup %3492  ;;  %2388 = vst.msk [vmem:[#allocation4 + $0x40] sm:$0xff] %vm423_vm0, %v2291_v48  ;;  %v1849_v61 = vadd.f32 %v1785_v20, %v1721_v8  ;;  %v2459_v9 = vld [vmem:[#allocation3 + $0x60] sm:$0xff] }
 0x34a   : > { %v2458_v40 = vld [vmem:[#allocation3 + $0x58] sm:$0xff]  ;;  %2364 = vst.msk [vmem:[#allocation3 + $0x80] sm:$0xff] %vm358_vm2, %v1850_v62  ;;  %v2169_v27 = vpop.f32.mrb[18].mxu1  ;;  %2533 = vperm.xlu1 %3289, %v3491_v26   ;;  %2538 = vperm.xlu0 %3288, %v3493_v32   ;;  %v3495_v49 = vpop.eup %3494  ;;  %v576_v26 = vld [vmem:[#allocation3 + $0xc0] sm:$0xff] }
 0x34b   : > { %3504 = vrcp.f32 %v2458_v40  ;;  %2363 = vst.msk [vmem:[#allocation3 + $0x78] sm:$0xff] %vm358_vm2, %v1849_v61  ;;  %v2292_v38 = vadd.f32 %v2169_v27, %v2035_v57  ;;  %v2171_v3 = vpop.f32.mrb[19].mxu1  ;;  %v1794_v35 = vpop.xlane.xlu0 %1793  ;;  %v575_v32 = vld [vmem:[#allocation3 + $0xb8] sm:$0xff]  ;;  %v2038_v61 = vmul.f32 %v4885_v15, %v596_v24  ;;  %v1730_v45 = vmul.f32 %v4732_v59, %v576_v26  ;;  %v581_v26 = vld [vmem:[#allocation3 + $0xe8] sm:$0xff] }
 0x34c   : > { %v1852_v53 = vadd.f32 %v1794_v35, %v1724_v18  ;;  %v1791_v10 = vpop.xlane.xlu1 %1790  ;;  %3506 = vrcp.f32 %v2459_v9  ;;  %v1729_v3 = vmul.f32 %v4725_v56, %v575_v32  ;;  %v578_v35 = vld [vmem:[#allocation3 + $0xd0] sm:$0xff]  ;;  %v600_v32 = vld [vmem:[#allocation4 + $0x80] sm:$0xff] }
 0x34d   : > { %v3497_v28 = vpop.eup %3496  ;;  %2389 = vst.msk [vmem:[#allocation4 + $0x48] sm:$0xff] %vm423_vm0, %v2292_v38  ;;  %v1851_v54 = vadd.f32 %v1791_v10, %v1723_v0  ;;  %v2461_v23 = vld [vmem:[#allocation3 + $0x70] sm:$0xff]  ;;  %v1732_v56 = vmul.f32 %v4742_v42, %v578_v35  ;;  %v583_v35 = vld [vmem:[#allocation3 + $0xf8] sm:$0xff] }
 0x34e   : > { %v2460_v63 = vld [vmem:[#allocation3 + $0x68] sm:$0xff]  ;;  %2366 = vst.msk [vmem:[#allocation3 + $0x90] sm:$0xff] %vm358_vm2, %v1852_v53  ;;  %v2174_v51 = vpop.f32.mrb[20].mxu1  ;;  %2543 = vperm.xlu1 %3289, %v3495_v49   ;;  %2548 = vperm.xlu0 %3288, %v3497_v28   ;;  %v3499_v58 = vpop.eup %3498  ;;  %v598_v28 = vld [vmem:[#allocation4 + $0x70] sm:$0xff] }
 0x34f   : > { %3508 = vrcp.f32 %v2460_v63  ;;  %2365 = vst.msk [vmem:[#allocation3 + $0x88] sm:$0xff] %vm358_vm2, %v1851_v54  ;;  %v2293_v17 = vadd.f32 %v2174_v51, %v2036_v33  ;;  %v2176_v34 = vpop.f32.mrb[21].mxu1  ;;  %v1800_v21 = vpop.xlane.xlu0 %1799  ;;  %v577_v53 = vld [vmem:[#allocation3 + $0xc8] sm:$0xff] }
 0x350   : > { %v1854_v11 = vadd.f32 %v1800_v21, %v1726_v55  ;;  %v1797_v39 = vpop.xlane.xlu1 %1796  ;;  %3510 = vrcp.f32 %v2461_v23  ;;  %v5381_v55 = vld [vmem:[#allocation5_spill] sm:$0xff] }
 0x351   : > { %v3501_v16 = vpop.eup %3500  ;;  %2390 = vst.msk [vmem:[#allocation4 + $0x50] sm:$0xff] %vm423_vm0, %v2293_v17  ;;  %v1853_v30 = vadd.f32 %v1797_v39, %v1725_v46  ;;  %v2463_v2 = vld [vmem:[#allocation3 + $0x80] sm:$0xff]  ;;  %v1731_v23 = vmul.f32 %v5381_v55, %v577_v53  ;;  %v599_v39 = vld [vmem:[#allocation4 + $0x78] sm:$0xff]  ;;  %v601_v53 = vld [vmem:[#allocation4 + $0x88] sm:$0xff] }
 0x352   : > { %v2462_v25 = vld [vmem:[#allocation3 + $0x78] sm:$0xff]  ;;  %2368 = vst.msk [vmem:[#allocation3 + $0xa0] sm:$0xff] %vm358_vm2, %v1854_v11  ;;  %v2179_v48 = vpop.f32.mrb[22].mxu1  ;;  %2553 = vperm.xlu1 %3289, %v3499_v58   ;;  %2558 = vperm.xlu0 %3288, %v3501_v16   ;;  %v3503_v62 = vpop.eup %3502  ;;  %v580_v17 = vld [vmem:[#allocation3 + $0xe0] sm:$0xff]  ;;  %v2040_v11 = vmul.f32 %v4889_v4, %v598_v28 }
 0x353   : > { %3512 = vrcp.f32 %v2462_v25  ;;  %2367 = vst.msk [vmem:[#allocation3 + $0x98] sm:$0xff] %vm358_vm2, %v1853_v30  ;;  %v2294_v37 = vadd.f32 %v2179_v48, %v2037_v19  ;;  %v2181_v8 = vpop.f32.mrb[23].mxu1  ;;  %v1806_v1 = vpop.xlane.xlu0 %1805  ;;  %v5382_v19 = vld [vmem:[#allocation58_spill] sm:$0xff] }
 0x354   : > { %v1856_v20 = vadd.f32 %v1806_v1, %v1728_v31  ;;  %v1803_v44 = vpop.xlane.xlu1 %1802  ;;  %3514 = vrcp.f32 %v2463_v2  ;;  %v1734_v30 = vmul.f32 %v5382_v19, %v580_v17  ;;  %v5383_v31 = vld [vmem:[#allocation59_spill] sm:$0xff] }
 0x355   : > { %v3505_v57 = vpop.eup %3504  ;;  %2391 = vst.msk [vmem:[#allocation4 + $0x58] sm:$0xff] %vm423_vm0, %v2294_v37  ;;  %v1855_v13 = vadd.f32 %v1803_v44, %v1727_v47  ;;  %v2465_v18 = vld [vmem:[#allocation3 + $0x90] sm:$0xff]  ;;  %v1733_v2 = vmul.f32 %v5383_v31, %v579_v22 }
 0x356   : > { %v2464_v40 = vld [vmem:[#allocation3 + $0x88] sm:$0xff]  ;;  %2370 = vst.msk [vmem:[#allocation3 + $0xb0] sm:$0xff] %vm358_vm2, %v1856_v20  ;;  %v2184_v27 = vpop.f32.mrb[24].mxu1  ;;  %2563 = vperm.xlu1 %3289, %v3503_v62   ;;  %2568 = vperm.xlu0 %3288, %v3505_v57   ;;  %v3507_v0 = vpop.eup %3506  ;;  %v582_v37 = vld [vmem:[#allocation3 + $0xf0] sm:$0xff]  ;;  %v2041_v20 = vmul.f32 %v4891_v29, %v599_v39 }
 0x357   : > { %3516 = vrcp.f32 %v2464_v40  ;;  %2369 = vst.msk [vmem:[#allocation3 + $0xa8] sm:$0xff] %vm358_vm2, %v1855_v13  ;;  %v2295_v9 = vadd.f32 %v2184_v27, %v2038_v61  ;;  %v2186_v38 = vpop.f32.mrb[25].mxu1  ;;  %v1812_v15 = vpop.xlane.xlu0 %1811  ;;  %v5384_v13 = vld [vmem:[#allocation63_spill] sm:$0xff] }
 0x358   : > { %v1858_v12 = vadd.f32 %v1812_v15, %v1730_v45  ;;  %v1809_v49 = vpop.xlane.xlu1 %1808  ;;  %3518 = vrcp.f32 %v2465_v18  ;;  %v1736_v5 = vmul.f32 %v5384_v13, %v582_v37  ;;  %v5385_v18 = vld [vmem:[#allocation62_spill] sm:$0xff] }
 0x359   : > { %v3509_v10 = vpop.eup %3508  ;;  %2392 = vst.msk [vmem:[#allocation4 + $0x60] sm:$0xff] %vm423_vm0, %v2295_v9  ;;  %v1857_v59 = vadd.f32 %v1809_v49, %v1729_v3  ;;  %v2467_v36 = vld [vmem:[#allocation3 + $0xa0] sm:$0xff]  ;;  %v1735_v9 = vmul.f32 %v5385_v18, %v581_v26  ;;  %v5386_v37 = vld [vmem:[#allocation6_spill] sm:$0xff]  ;;  %v607_v18 = vld [vmem:[#allocation4 + $0xb8] sm:$0xff] }
 0x35a   : > { %v2466_v33 = vld [vmem:[#allocation3 + $0x98] sm:$0xff]  ;;  %2372 = vst.msk [vmem:[#allocation3 + $0xc0] sm:$0xff] %vm358_vm2, %v1858_v12  ;;  %v2189_v54 = vpop.f32.mrb[26].mxu1  ;;  %2573 = vperm.xlu1 %3289, %v3507_v0   ;;  %2578 = vperm.xlu0 %3288, %v3509_v10   ;;  %v3511_v34 = vpop.eup %3510  ;;  %v2042_v12 = vmul.f32 %v4893_v41, %v600_v32 }
 0x35b   : > { %3520 = vrcp.f32 %v2466_v33  ;;  %2371 = vst.msk [vmem:[#allocation3 + $0xb8] sm:$0xff] %vm358_vm2, %v1857_v59  ;;  %v2296_v63 = vadd.f32 %v2189_v54, %v2039_v60  ;;  %v2191_v51 = vpop.f32.mrb[27].mxu1  ;;  %v1818_v52 = vpop.xlane.xlu0 %1817  ;;  %v1737_v54 = vmul.f32 %v4878_v7, %v583_v35 }
 0x35c   : > { %v1860_v21 = vadd.f32 %v1818_v52, %v1732_v56  ;;  %v1815_v46 = vpop.xlane.xlu1 %1814  ;;  %3522 = vrcp.f32 %v2467_v36  ;;  %v602_v52 = vld [vmem:[#allocation4 + $0x90] sm:$0xff] }
 0x35d   : > { %v3513_v58 = vpop.eup %3512  ;;  %2393 = vst.msk [vmem:[#allocation4 + $0x68] sm:$0xff] %vm423_vm0, %v2296_v63  ;;  %v1859_v42 = vadd.f32 %v1815_v46, %v1731_v23  ;;  %v2469_v24 = vld [vmem:[#allocation3 + $0xb0] sm:$0xff]  ;;  %v2043_v63 = vmul.f32 %v4895_v50, %v601_v53  ;;  %v2044_v22 = vmul.f32 %v4897_v14, %v602_v52  ;;  %v603_v50 = vld [vmem:[#allocation4 + $0x98] sm:$0xff] }
 0x35e   : > { %v2468_v43 = vld [vmem:[#allocation3 + $0xa8] sm:$0xff]  ;;  %2374 = vst.msk [vmem:[#allocation3 + $0xd0] sm:$0xff] %vm358_vm2, %v1860_v21  ;;  %v2194_v16 = vpop.f32.mrb[28].mxu1  ;;  %2583 = vperm.xlu1 %3289, %v3511_v34   ;;  %2588 = vperm.xlu0 %3288, %v3513_v58   ;;  %v3515_v8 = vpop.eup %3514 }
 0x35f   : > { %3524 = vrcp.f32 %v2468_v43  ;;  %2373 = vst.msk [vmem:[#allocation3 + $0xc8] sm:$0xff] %vm358_vm2, %v1859_v42  ;;  %v2297_v25 = vadd.f32 %v2194_v16, %v2040_v11  ;;  %v2196_v48 = vpop.f32.mrb[29].mxu1  ;;  %v1824_v4 = vpop.xlane.xlu0 %1823 }
 0x360   : > { %v1862_v1 = vadd.f32 %v1824_v4, %v1734_v30  ;;  %v1821_v47 = vpop.xlane.xlu1 %1820  ;;  %3526 = vrcp.f32 %v2469_v24  ;;  %v2045_v30 = vmul.f32 %v4899_v6, %v603_v50  ;;  %v604_v24 = vld [vmem:[#allocation4 + $0xa0] sm:$0xff] }
 0x361   : > { %v3517_v62 = vpop.eup %3516  ;;  %2394 = vst.msk [vmem:[#allocation4 + $0x70] sm:$0xff] %vm423_vm0, %v2297_v25  ;;  %v1861_v44 = vadd.f32 %v1821_v47, %v1733_v2  ;;  %v2471_v40 = vld [vmem:[#allocation3 + $0xc0] sm:$0xff] }
 0x362   : > { %v2470_v57 = vld [vmem:[#allocation3 + $0xb8] sm:$0xff]  ;;  %2376 = vst.msk [vmem:[#allocation3 + $0xe0] sm:$0xff] %vm358_vm2, %v1862_v1  ;;  %v2199_v61 = vpop.f32.mrb[30].mxu1  ;;  %2593 = vperm.xlu1 %3289, %v3515_v8   ;;  %2598 = vperm.xlu0 %3288, %v3517_v62   ;;  %v3519_v38 = vpop.eup %3518  ;;  %v2046_v8 = vmul.f32 %v5386_v37, %v604_v24  ;;  %v605_v1 = vld [vmem:[#allocation4 + $0xa8] sm:$0xff]  ;;  %v612_v50 = vld [vmem:[#allocation4 + $0xe0] sm:$0xff] }
 0x363   : > { %3528 = vrcp.f32 %v2470_v57  ;;  %2375 = vst.msk [vmem:[#allocation3 + $0xd8] sm:$0xff] %vm358_vm2, %v1861_v44  ;;  %v2298_v27 = vadd.f32 %v2199_v61, %v2041_v20  ;;  %v2201_v45 = vpop.f32.mrb[31].mxu1  ;;  %v1830_v29 = vpop.xlane.xlu0 %1829  ;;  %v5387_v44 = vld [vmem:[#allocation7_spill] sm:$0xff]  ;;  %v5396_v37 = vld [vmem:[#allocation10_spill] sm:$0xff] }
 0x364   : > { %v1864_v15 = vadd.f32 %v1830_v29, %v1736_v5  ;;  %v1827_v3 = vpop.xlane.xlu1 %1826  ;;  %3530 = vrcp.f32 %v2471_v40  ;;  %v2047_v32 = vmul.f32 %v5387_v44, %v605_v1  ;;  %v606_v57 = vld [vmem:[#allocation4 + $0xb0] sm:$0xff]  ;;  %v5388_v45 = vld [vmem:[#allocation60_spill] sm:$0xff] }
 0x365   : > { %v3521_v0 = vpop.eup %3520  ;;  %2395 = vst.msk [vmem:[#allocation4 + $0x78] sm:$0xff] %vm423_vm0, %v2298_v27  ;;  %v1863_v49 = vadd.f32 %v1827_v3, %v1735_v9  ;;  %v2473_v59 = vld [vmem:[#allocation3 + $0xd0] sm:$0xff]  ;;  %v2048_v29 = vmul.f32 %v5388_v45, %v606_v57  ;;  %v5389_v3 = vld [vmem:[#allocation61_spill] sm:$0xff]  ;;  %v615_v1 = vld [vmem:[#allocation4 + $0xf8] sm:$0xff] }
 0x366   : > { %v2472_v10 = vld [vmem:[#allocation3 + $0xc8] sm:$0xff]  ;;  %2378 = vst.msk [vmem:[#allocation3 + $0xf0] sm:$0xff] %vm358_vm2, %v1864_v15  ;;  %v2204_v60 = vpop.f32.mrb[32].mxu1  ;;  %2603 = vperm.xlu1 %3289, %v3519_v38   ;;  %2608 = vperm.xlu0 %3288, %v3521_v0   ;;  %v3523_v41 = vpop.eup %3522  ;;  %v2049_v35 = vmul.f32 %v5389_v3, %v607_v18  ;;  %v608_v0 = vld [vmem:[#allocation4 + $0xc0] sm:$0xff] }
 0x367   : > { %3532 = vrcp.f32 %v2472_v10  ;;  %2377 = vst.msk [vmem:[#allocation3 + $0xe8] sm:$0xff] %vm358_vm2, %v1863_v49  ;;  %v2299_v28 = vadd.f32 %v2204_v60, %v2042_v12  ;;  %v2206_v33 = vpop.f32.mrb[33].mxu1  ;;  %v5390_v10 = vld [vmem:[#allocation65_spill] sm:$0xff] }
 0x368   : > { %v1833_v56 = vpop.xlane.xlu1 %1832  ;;  %3534 = vrcp.f32 %v2473_v59  ;;  %v2050_v60 = vmul.f32 %v5390_v10, %v608_v0  ;;  %v609_v59 = vld [vmem:[#allocation4 + $0xc8] sm:$0xff] }
 0x369   : > { %v3525_v36 = vpop.eup %3524  ;;  %2396 = vst.msk [vmem:[#allocation4 + $0x80] sm:$0xff] %vm423_vm0, %v2299_v28  ;;  %v1865_v51 = vadd.f32 %v1833_v56, %v1737_v54  ;;  %v2475_v17 = vld [vmem:[#allocation3 + $0xe0] sm:$0xff] }
 0x36a   : > { %v2474_v55 = vld [vmem:[#allocation3 + $0xd8] sm:$0xff]  ;;  %v2209_v23 = vpop.f32.mrb[34].mxu1  ;;  %2613 = vperm.xlu1 %3289, %v3523_v41   ;;  %2618 = vperm.xlu0 %3288, %v3525_v36   ;;  %v3527_v21 = vpop.eup %3526  ;;  %v610_v36 = vld [vmem:[#allocation4 + $0xd0] sm:$0xff] }
 0x36b   : > { %3536 = vrcp.f32 %v2474_v55  ;;  %2379 = vst.msk [vmem:[#allocation3 + $0xf8] sm:$0xff] %vm358_vm2, %v1865_v51  ;;  %v2300_v34 = vadd.f32 %v2209_v23, %v2043_v63  ;;  %v2211_v7 = vpop.f32.mrb[35].mxu1  ;;  %v5391_v41 = vld [vmem:[#allocation64_spill] sm:$0xff]  ;;  %v5392_v55 = vld [vmem:[#allocation67_spill] sm:$0xff] }
 0x36c   : > { %3538 = vrcp.f32 %v2475_v17  ;;  %v2051_v56 = vmul.f32 %v5391_v41, %v609_v59  ;;  %v2052_v23 = vmul.f32 %v5392_v55, %v610_v36  ;;  %v611_v17 = vld [vmem:[#allocation4 + $0xd8] sm:$0xff] }
 0x36d   : > { %v3529_v46 = vpop.eup %3528  ;;  %2397 = vst.msk [vmem:[#allocation4 + $0x88] sm:$0xff] %vm423_vm0, %v2300_v34  ;;  %v2477_v42 = vld [vmem:[#allocation3 + $0xf0] sm:$0xff] }
 0x36e   : > { %v2476_v58 = vld [vmem:[#allocation3 + $0xe8] sm:$0xff]  ;;  %v2214_v11 = vpop.f32.mrb[36].mxu1  ;;  %2623 = vperm.xlu1 %3289, %v3527_v21   ;;  %2628 = vperm.xlu0 %3288, %v3529_v46   ;;  %v3531_v16 = vpop.eup %3530 }
 0x36f   : > { %3540 = vrcp.f32 %v2476_v58  ;;  %v2301_v39 = vadd.f32 %v2214_v11, %v2044_v22  ;;  %v2216_v43 = vpop.f32.mrb[37].mxu1  ;;  %v5393_v46 = vld [vmem:[#allocation66_spill] sm:$0xff] }
 0x370   : > { %3542 = vrcp.f32 %v2477_v42  ;;  %v2053_v22 = vmul.f32 %v5393_v46, %v611_v17 }
 0x371   : > { %v3533_v19 = vpop.eup %3532  ;;  %2398 = vst.msk [vmem:[#allocation4 + $0x90] sm:$0xff] %vm423_vm0, %v2301_v39  ;;  %v5394_v39 = vld [vmem:[#allocation8_spill] sm:$0xff] }
 0x372   : > { %v2478_v14 = vld [vmem:[#allocation3 + $0xf8] sm:$0xff]  ;;  %v2219_v25 = vpop.f32.mrb[38].mxu1  ;;  %2633 = vperm.xlu1 %3289, %v3531_v16   ;;  %2638 = vperm.xlu0 %3288, %v3533_v19   ;;  %v3535_v31 = vpop.eup %3534  ;;  %v2054_v43 = vmul.f32 %v5394_v39, %v612_v50  ;;  %v613_v16 = vld [vmem:[#allocation4 + $0xe8] sm:$0xff] }
 0x373   : > { %3544 = vrcp.f32 %v2478_v14  ;;  %v2302_v48 = vadd.f32 %v2219_v25, %v2045_v30  ;;  %v2221_v4 = vpop.f32.mrb[39].mxu1  ;;  %v5395_v14 = vld [vmem:[#allocation9_spill] sm:$0xff] }
 0x374   : > { %v2055_v25 = vmul.f32 %v5395_v14, %v613_v16 }
 0x375   : > { %v3537_v2 = vpop.eup %3536  ;;  %2399 = vst.msk [vmem:[#allocation4 + $0x98] sm:$0xff] %vm423_vm0, %v2302_v48  ;;  %v614_v48 = vld [vmem:[#allocation4 + $0xf0] sm:$0xff] }
 0x376   : > { %v2224_v47 = vpop.f32.mrb[40].mxu1  ;;  %2643 = vperm.xlu1 %3289, %v3535_v31   ;;  %2648 = vperm.xlu0 %3288, %v3537_v2   ;;  %v3539_v62 = vpop.eup %3538 }
 0x377   : > { %v2303_v6 = vadd.f32 %v2224_v47, %v2046_v8  ;;  %v2226_v26 = vpop.f32.mrb[41].mxu1  ;;  %v2056_v8 = vmul.f32 %v5396_v37, %v614_v48  ;;  %v2024_v47 = vpop.permute.xlu0 %2023 }
 0x379   : > { %v3541_v20 = vpop.eup %3540  ;;  %2400 = vst.msk [vmem:[#allocation4 + $0xa0] sm:$0xff] %vm423_vm0, %v2303_v6 }
 0x37a   : > { %v2229_v61 = vpop.f32.mrb[42].mxu1  ;;  %2653 = vperm.xlu1 %3289, %v3539_v62   ;;  %2658 = vperm.xlu0 %3288, %v3541_v20   ;;  %v3543_v40 = vpop.eup %3542  ;;  %v2057_v20 = vmul.f32 %v2024_v47, %v615_v1  ;;  %v2433_v47 = vld [vmem:[#allocation4 + $0x90] sm:$0xff] }
 0x37b   : > { %v2304_v13 = vadd.f32 %v2229_v61, %v2047_v32  ;;  %v2231_v5 = vpop.f32.mrb[43].mxu1 }
 0x37d   : > { %v3545_v27 = vpop.eup %3544  ;;  %2401 = vst.msk [vmem:[#allocation4 + $0xa8] sm:$0xff] %vm423_vm0, %v2304_v13  ;;  %v2416_v13 = vld [vmem:[#allocation4 + $0x8] sm:$0xff] }
 0x37e   : > { %v2234_v9 = vpop.f32.mrb[44].mxu1  ;;  %2663 = vperm.xlu1 %3289, %v3543_v40   ;;  %2668 = vperm.xlu0 %3288, %v3545_v27   ;;  %v2415_v40 = vld [vmem:[#allocation4] sm:$0xff] }
 0x37f   : > { %v2305_v38 = vadd.f32 %v2234_v9, %v2048_v29  ;;  %v2236_v15 = vpop.f32.mrb[45].mxu1  ;;  %v2418_v29 = vld [vmem:[#allocation4 + $0x18] sm:$0xff]  ;;  %v2417_v9 = vld [vmem:[#allocation4 + $0x10] sm:$0xff] }
 0x381   : > { %2402 = vst.msk [vmem:[#allocation4 + $0xb0] sm:$0xff] %vm423_vm0, %v2305_v38 }
 0x382   : > { %v2239_v12 = vpop.f32.mrb[46].mxu1 }
 0x383   : > { %v2306_v49 = vadd.f32 %v2239_v12, %v2049_v35  ;;  %v2241_v53 = vpop.f32.mrb[47].mxu1  ;;  %v2420_v35 = vld [vmem:[#allocation4 + $0x28] sm:$0xff]  ;;  %v2419_v12 = vld [vmem:[#allocation4 + $0x20] sm:$0xff] }
 0x385   : > { %2403 = vst.msk [vmem:[#allocation4 + $0xb8] sm:$0xff] %vm423_vm0, %v2306_v49 }
 0x386   : > { %v2244_v28 = vpop.f32.mrb[48].mxu1 }
 0x387   : > { %v2307_v33 = vadd.f32 %v2244_v28, %v2050_v60  ;;  %v2246_v54 = vpop.f32.mrb[49].mxu1  ;;  %v2422_v60 = vld [vmem:[#allocation4 + $0x38] sm:$0xff]  ;;  %v2421_v28 = vld [vmem:[#allocation4 + $0x30] sm:$0xff] }
 0x389   : > { %2404 = vst.msk [vmem:[#allocation4 + $0xc0] sm:$0xff] %vm423_vm0, %v2307_v33 }
 0x38a   : > { %v2249_v63 = vpop.f32.mrb[50].mxu1 }
 0x38b   : > { %v2308_v51 = vadd.f32 %v2249_v63, %v2051_v56  ;;  %v2251_v52 = vpop.f32.mrb[51].mxu1  ;;  %v2424_v56 = vld [vmem:[#allocation4 + $0x48] sm:$0xff]  ;;  %v2423_v63 = vld [vmem:[#allocation4 + $0x40] sm:$0xff] }
 0x38d   : > { %2405 = vst.msk [vmem:[#allocation4 + $0xc8] sm:$0xff] %vm423_vm0, %v2308_v51 }
 0x38e   : > { %v2254_v34 = vpop.f32.mrb[52].mxu1 }
 0x38f   : > { %v2309_v7 = vadd.f32 %v2254_v34, %v2052_v23  ;;  %v2256_v21 = vpop.f32.mrb[53].mxu1  ;;  %v2426_v23 = vld [vmem:[#allocation4 + $0x58] sm:$0xff]  ;;  %v2425_v34 = vld [vmem:[#allocation4 + $0x50] sm:$0xff] }
 0x391   : > { %2406 = vst.msk [vmem:[#allocation4 + $0xd0] sm:$0xff] %vm423_vm0, %v2309_v7 }
 0x392   : > { %v2259_v58 = vpop.f32.mrb[54].mxu1 }
 0x393   : > { %v2310_v11 = vadd.f32 %v2259_v58, %v2053_v22  ;;  %v2261_v42 = vpop.f32.mrb[55].mxu1  ;;  %v2428_v22 = vld [vmem:[#allocation4 + $0x68] sm:$0xff]  ;;  %v2427_v58 = vld [vmem:[#allocation4 + $0x60] sm:$0xff] }
 0x395   : > { %2407 = vst.msk [vmem:[#allocation4 + $0xd8] sm:$0xff] %vm423_vm0, %v2310_v11 }
 0x396   : > { %v2264_v19 = vpop.f32.mrb[56].mxu1 }
 0x397   : > { %v2311_v30 = vadd.f32 %v2264_v19, %v2054_v43  ;;  %v2266_v24 = vpop.f32.mrb[57].mxu1  ;;  %v2430_v43 = vld [vmem:[#allocation4 + $0x78] sm:$0xff]  ;;  %v2429_v19 = vld [vmem:[#allocation4 + $0x70] sm:$0xff] }
 0x399   : > { %2408 = vst.msk [vmem:[#allocation4 + $0xe0] sm:$0xff] %vm423_vm0, %v2311_v30 }
 0x39a   : > { %v2269_v4 = vpop.f32.mrb[58].mxu1 }
 0x39b   : > { %v2312_v31 = vadd.f32 %v2269_v4, %v2055_v25  ;;  %v2271_v2 = vpop.f32.mrb[59].mxu1  ;;  %v2432_v25 = vld [vmem:[#allocation4 + $0x88] sm:$0xff]  ;;  %v2431_v4 = vld [vmem:[#allocation4 + $0x80] sm:$0xff] }
 0x39d   : > { %2409 = vst.msk [vmem:[#allocation4 + $0xe8] sm:$0xff] %vm423_vm0, %v2312_v31 }
 0x39e   : > { %v2274_v6 = vpop.f32.mrb[60].mxu1 }
 0x39f   : > { %v2313_v26 = vadd.f32 %v2274_v6, %v2056_v8  ;;  %v2276_v62 = vpop.f32.mrb[61].mxu1  ;;  %v2434_v8 = vld [vmem:[#allocation4 + $0x98] sm:$0xff] }
 0x3a1   : > { %2410 = vst.msk [vmem:[#allocation4 + $0xf0] sm:$0xff] %vm423_vm0, %v2313_v26 }
 0x3a2   : > { %v2279_v44 = vpop.f32.mrb[62].mxu1 }
 0x3a3   : > { %v2314_v32 = vadd.f32 %v2279_v44, %v2057_v20  ;;  %v2281_v57 = vpop.f32.mrb[63].mxu1  ;;  %v2436_v20 = vld [vmem:[#allocation4 + $0xa8] sm:$0xff] }
 0x3a5   : > { %2411 = vst.msk [vmem:[#allocation4 + $0xf8] sm:$0xff] %vm423_vm0, %v2314_v32  ;;  %v2435_v32 = vld [vmem:[#allocation4 + $0xa0] sm:$0xff] }
 0x3bc   : > { %v2519_v61 = vpop.permute.xlu0 %2518 }
 0x3bd   : > { %v2672_v5 = vmul.f32 %v2519_v61, %v2416_v13 }
 0x3bf   : > { %2704 = vst.msk [vmem:[%s5053_s10 + $0x8] sm:$0xff] %vm423_vm0, %v2672_v5  ;;  %v2438_v5 = vld [vmem:[#allocation4 + $0xb8] sm:$0xff] }
 0x3c1   : > { %v2514_v27 = vpop.permute.xlu1 %2513 }
 0x3c2   : > { %v2671_v45 = vmul.f32 %v2514_v27, %v2415_v40  ;;  %v2437_v27 = vld [vmem:[#allocation4 + $0xb0] sm:$0xff] }
 0x3c4   : > { %2703 = vst.msk [vmem:[%s5053_s10] sm:$0xff] %vm423_vm0, %v2671_v45 }
 0x3c5   : > { %v2529_v18 = vpop.permute.xlu0 %2528  ;;  %v2524_v38 = vpop.permute.xlu1 %2523 }
 0x3c6   : > { %v2674_v15 = vmul.f32 %v2529_v18, %v2418_v29  ;;  %v2673_v3 = vmul.f32 %v2524_v38, %v2417_v9  ;;  %v2440_v9 = vld [vmem:[#allocation4 + $0xc8] sm:$0xff] }
 0x3c8   : > { %2706 = vst.msk [vmem:[%s5053_s10 + $0x18] sm:$0xff] %vm423_vm0, %v2674_v15  ;;  %2705 = vst.msk [vmem:[%s5053_s10 + $0x10] sm:$0xff] %vm423_vm0, %v2673_v3  ;;  %v2439_v15 = vld [vmem:[#allocation4 + $0xc0] sm:$0xff] }
 0x3c9   : > { %v2539_v0 = vpop.permute.xlu0 %2538  ;;  %v2534_v49 = vpop.permute.xlu1 %2533 }
 0x3ca   : > { %v2676_v53 = vmul.f32 %v2539_v0, %v2420_v35  ;;  %v2675_v10 = vmul.f32 %v2534_v49, %v2419_v12  ;;  %v2442_v12 = vld [vmem:[#allocation4 + $0xd8] sm:$0xff] }
 0x3cc   : > { %2708 = vst.msk [vmem:[%s5053_s10 + $0x28] sm:$0xff] %vm423_vm0, %v2676_v53  ;;  %2707 = vst.msk [vmem:[%s5053_s10 + $0x20] sm:$0xff] %vm423_vm0, %v2675_v10  ;;  %v2441_v53 = vld [vmem:[#allocation4 + $0xd0] sm:$0xff] }
 0x3cd   : > { %v2549_v59 = vpop.permute.xlu0 %2548  ;;  %v2544_v33 = vpop.permute.xlu1 %2543 }
 0x3ce   : > { %v2678_v54 = vmul.f32 %v2549_v59, %v2422_v60  ;;  %v2677_v41 = vmul.f32 %v2544_v33, %v2421_v28  ;;  %v2444_v28 = vld [vmem:[#allocation4 + $0xe8] sm:$0xff] }
 0x3d0   : > { %2710 = vst.msk [vmem:[%s5053_s10 + $0x38] sm:$0xff] %vm423_vm0, %v2678_v54  ;;  %2709 = vst.msk [vmem:[%s5053_s10 + $0x30] sm:$0xff] %vm423_vm0, %v2677_v41  ;;  %v2443_v54 = vld [vmem:[#allocation4 + $0xe0] sm:$0xff] }
 0x3d1   : > { %v2559_v36 = vpop.permute.xlu0 %2558  ;;  %v2554_v51 = vpop.permute.xlu1 %2553 }
 0x3d2   : > { %v2680_v52 = vmul.f32 %v2559_v36, %v2424_v56  ;;  %v2679_v55 = vmul.f32 %v2554_v51, %v2423_v63  ;;  %v2446_v63 = vld [vmem:[#allocation4 + $0xf8] sm:$0xff] }
 0x3d4   : > { %2712 = vst.msk [vmem:[%s5053_s10 + $0x48] sm:$0xff] %vm423_vm0, %v2680_v52  ;;  %2711 = vst.msk [vmem:[%s5053_s10 + $0x40] sm:$0xff] %vm423_vm0, %v2679_v55  ;;  %v2445_v52 = vld [vmem:[#allocation4 + $0xf0] sm:$0xff] }
 0x3d5   : > { %v2569_v17 = vpop.permute.xlu0 %2568  ;;  %v2564_v7 = vpop.permute.xlu1 %2563 }
 0x3d6   : > { %v2682_v21 = vmul.f32 %v2569_v17, %v2426_v23  ;;  %v2681_v46 = vmul.f32 %v2564_v7, %v2425_v34 }
 0x3d8   : > { %2714 = vst.msk [vmem:[%s5053_s10 + $0x58] sm:$0xff] %vm423_vm0, %v2682_v21  ;;  %2713 = vst.msk [vmem:[%s5053_s10 + $0x50] sm:$0xff] %vm423_vm0, %v2681_v46 }
 0x3d9   : > { %v2579_v50 = vpop.permute.xlu0 %2578  ;;  %v2574_v11 = vpop.permute.xlu1 %2573 }
 0x3da   : > { %v2684_v42 = vmul.f32 %v2579_v50, %v2428_v22  ;;  %v2683_v39 = vmul.f32 %v2574_v11, %v2427_v58 }
 0x3dc   : > { %2716 = vst.msk [vmem:[%s5053_s10 + $0x68] sm:$0xff] %vm423_vm0, %v2684_v42  ;;  %2715 = vst.msk [vmem:[%s5053_s10 + $0x60] sm:$0xff] %vm423_vm0, %v2683_v39 }
 0x3dd   : > { %v2589_v16 = vpop.permute.xlu0 %2588  ;;  %v2584_v30 = vpop.permute.xlu1 %2583 }
 0x3de   : > { %v2686_v24 = vmul.f32 %v2589_v16, %v2430_v43  ;;  %v2685_v14 = vmul.f32 %v2584_v30, %v2429_v19 }
 0x3e0   : > { %2718 = vst.msk [vmem:[%s5053_s10 + $0x78] sm:$0xff] %vm423_vm0, %v2686_v24  ;;  %2717 = vst.msk [vmem:[%s5053_s10 + $0x70] sm:$0xff] %vm423_vm0, %v2685_v14 }
 0x3e1   : > { %v2599_v48 = vpop.permute.xlu0 %2598  ;;  %v2594_v31 = vpop.permute.xlu1 %2593 }
 0x3e2   : > { %v2688_v2 = vmul.f32 %v2599_v48, %v2432_v25  ;;  %v2687_v37 = vmul.f32 %v2594_v31, %v2431_v4 }
 0x3e4   : > { %2720 = vst.msk [vmem:[%s5053_s10 + $0x88] sm:$0xff] %vm423_vm0, %v2688_v2  ;;  %2719 = vst.msk [vmem:[%s5053_s10 + $0x80] sm:$0xff] %vm423_vm0, %v2687_v37 }
 0x3e5   : > { %v2609_v1 = vpop.permute.xlu0 %2608  ;;  %v2604_v6 = vpop.permute.xlu1 %2603 }
 0x3e6   : > { %v2690_v26 = vmul.f32 %v2609_v1, %v2434_v8  ;;  %v2689_v62 = vmul.f32 %v2604_v6, %v2433_v47 }
 0x3e8   : > { %2722 = vst.msk [vmem:[%s5053_s10 + $0x98] sm:$0xff] %vm423_vm0, %v2690_v26  ;;  %2721 = vst.msk [vmem:[%s5053_s10 + $0x90] sm:$0xff] %vm423_vm0, %v2689_v62 }
 0x3e9   : > { %v2619_v44 = vpop.permute.xlu0 %2618  ;;  %v2614_v57 = vpop.permute.xlu1 %2613 }
 0x3ea   : > { %v2692_v61 = vmul.f32 %v2619_v44, %v2436_v20  ;;  %v2691_v13 = vmul.f32 %v2614_v57, %v2435_v32 }
 0x3ec   : > { %2724 = vst.msk [vmem:[%s5053_s10 + $0xa8] sm:$0xff] %vm423_vm0, %v2692_v61  ;;  %2723 = vst.msk [vmem:[%s5053_s10 + $0xa0] sm:$0xff] %vm423_vm0, %v2691_v13 }
 0x3ed   : > { %v2629_v40 = vpop.permute.xlu0 %2628  ;;  %v2624_v45 = vpop.permute.xlu1 %2623 }
 0x3ee   : > { %v2694_v29 = vmul.f32 %v2629_v40, %v2438_v5  ;;  %v2693_v18 = vmul.f32 %v2624_v45, %v2437_v27 }
 0x3f0   : > { %2726 = vst.msk [vmem:[%s5053_s10 + $0xb8] sm:$0xff] %vm423_vm0, %v2694_v29  ;;  %2725 = vst.msk [vmem:[%s5053_s10 + $0xb0] sm:$0xff] %vm423_vm0, %v2693_v18 }
 0x3f1   : > { %v2639_v38 = vpop.permute.xlu0 %2638  ;;  %v2634_v3 = vpop.permute.xlu1 %2633 }
 0x3f2   : > { %v2696_v35 = vmul.f32 %v2639_v38, %v2440_v9  ;;  %v2695_v0 = vmul.f32 %v2634_v3, %v2439_v15 }
 0x3f4   : > { %2728 = vst.msk [vmem:[%s5053_s10 + $0xc8] sm:$0xff] %vm423_vm0, %v2696_v35  ;;  %2727 = vst.msk [vmem:[%s5053_s10 + $0xc0] sm:$0xff] %vm423_vm0, %v2695_v0 }
 0x3f5   : > { %v2649_v49 = vpop.permute.xlu0 %2648  ;;  %v2644_v10 = vpop.permute.xlu1 %2643 }
 0x3f6   : > { %v2698_v60 = vmul.f32 %v2649_v49, %v2442_v12  ;;  %v2697_v59 = vmul.f32 %v2644_v10, %v2441_v53 }
 0x3f8   : > { %2730 = vst.msk [vmem:[%s5053_s10 + $0xd8] sm:$0xff] %vm423_vm0, %v2698_v60  ;;  %2729 = vst.msk [vmem:[%s5053_s10 + $0xd0] sm:$0xff] %vm423_vm0, %v2697_v59 }
 0x3f9   : > { %v2659_v33 = vpop.permute.xlu0 %2658  ;;  %v2654_v41 = vpop.permute.xlu1 %2653 }
 0x3fa   : > { %v2700_v56 = vmul.f32 %v2659_v33, %v2444_v28  ;;  %v2699_v36 = vmul.f32 %v2654_v41, %v2443_v54 }
 0x3fc   : > { %2732 = vst.msk [vmem:[%s5053_s10 + $0xe8] sm:$0xff] %vm423_vm0, %v2700_v56  ;;  %2731 = vst.msk [vmem:[%s5053_s10 + $0xe0] sm:$0xff] %vm423_vm0, %v2699_v36 }
 0x3fd   : > { %v2669_v51 = vpop.permute.xlu0 %2668  ;;  %v2664_v55 = vpop.permute.xlu1 %2663 }
 0x3fe   : > { %v2702_v23 = vmul.f32 %v2669_v51, %v2446_v63  ;;  %v2701_v17 = vmul.f32 %v2664_v55, %v2445_v52 }
 0x400   : > { %2734 = vst.msk [vmem:[%s5053_s10 + $0xf8] sm:$0xff] %vm423_vm0, %v2702_v23  ;;  %2733 = vst.msk [vmem:[%s5053_s10 + $0xf0] sm:$0xff] %vm423_vm0, %v2701_v17 }
 0x401 PF: > { %s13_s16 = sadd.s32 1, %s3584_s16   ;;  %s5397_s12 = smov %s3576_s14 }
 0x402   : > { %p10_p7 = scmp.ge.s32.totalorder %s13_s16, 6   ;;  %s5398_s13 = smov %s3580_s15 }
 0x403   : > { %s5399_s14 = smov %s5402_s17  ;;  %s5400_s15 = smov %s5406_s18 }
 0x404   :  { %12 = sbr.rel (!%p10_p7) target bundleno = 3 (0x3), region = 76 }

</bundles_post_ra>
